<compile_context>
chip_gen: v5e
topology: v5e:2x2
jax: 0.10.0
libtpu: 0.0.40
codegen_flags: <defaults>
</compile_context>

<pallas_src>
import numpy as np

import jax
import jax.numpy as jnp
from jax.experimental import pallas as pl
from jax.experimental.pallas import tpu as pltpu


def _pairwise(l):
    return list(zip(l[:-1], l[1:]))


class CNNMapEncoderV2Pallas:
    """Fused Pallas forward pass for CNNMapEncoderV2 (ReLU everywhere, like the spec)."""

    def __init__(self, config, key, max_batch=8):
        patch_size = config["patch_size"]
        self.patch_size = (patch_size[0] + patch_size[2],
                           patch_size[1] + patch_size[3])
        self.image_channels = config["map_channels"]
        self.hidden_channels = config["hidden_channels"]
        self.output_size = config["output_size"]
        self.filters = config["masks"]
        self.strides = config.get("strides", [1 for _ in self.filters])
        self.paddings = config.get("paddings", [0 for _ in self.filters])
        self.poolings = config.get("poolings", [None for _ in self.filters])
        self.fc_features = config.get("fc_features", [])
        # batch rows padded to a sublane tile so all row blocks are 8-aligned
        self.Bp = int(-(-max_batch // 8) * 8)

        # ---- f32 master parameters (deterministic synthetic init) -----------
        channels = _pairwise((self.image_channels, *self.hidden_channels))
        self.conv_params = []     # (w OIHW, b, stride, pad, pool, kh, kw)
        self.layer_dims = []      # (in_h, in_w, out_h, out_w, fin_h, fin_w)
        h, w = self.patch_size
        for (cin, cout), filt, stride, pad, pool in zip(
                channels, self.filters, self.strides, self.paddings, self.poolings):
            kh, kw = (filt, filt) if isinstance(filt, int) else tuple(filt)
            key, k_w, k_b = jax.random.split(key, 3)
            wgt = jax.random.normal(k_w, (cout, cin, kh, kw), jnp.float32) * 0.05
            b = jax.random.normal(k_b, (cout,), jnp.float32) * 0.05
            in_h, in_w = h, w
            h = (h + 2 * pad - kh) // stride + 1
            w = (w + 2 * pad - kw) // stride + 1
            out_h, out_w = h, w
            if pool == "max":
                h, w = h // 2, w // 2
            self.conv_params.append((wgt, b, stride, pad, pool, kh, kw))
            self.layer_dims.append((in_h, in_w, out_h, out_w, h, w))

        self.final_channels = self.hidden_channels[-1]
        self.final_hw = (h, w)
        self.fc_inputs = self.final_channels * h * w

        features = _pairwise((self.fc_inputs, *self.fc_features, self.output_size))
        self.fc_params = []
        for fin, fout in features:
            key, k_w, k_b = jax.random.split(key, 3)
            wgt = jax.random.normal(k_w, (fout, fin), jnp.float32) * 0.02
            b = jax.random.normal(k_b, (fout,), jnp.float32) * 0.02
            self.fc_params.append((wgt, b))

        self._build_kernel()
        self._forward_jit = jax.jit(self._forward)

    # ----------------------------------------------------------------- build
    def _build_kernel(self):
        Bp = self.Bp
        consts = []
        conv_struct = []
        scratch_shapes = []

        for li, ((wgt, b, stride, pad, pool, kh, kw), dims) in enumerate(
                zip(self.conv_params, self.layer_dims)):
            in_h, in_w, out_h, out_w, fin_h, fin_w = dims
            cout, cin = wgt.shape[0], wgt.shape[1]
            ntaps = kh * kw
            s_in, s_out = in_h * in_w, out_h * out_w

            w_np = np.asarray(wgt, np.float32)
            eye = np.eye(Bp, dtype=np.float32)
            # kron(W_tap, I_Bp): row = co*Bp + b, col = ci*Bp + b  (block diagonal
            # over the padded batch), one per filter tap, dy-major.
            k_taps = np.stack(
                [np.kron(w_np[:, :, dy, dx], eye)
                 for dy in range(kh) for dx in range(kw)], axis=0)
            # tap-major column concatenation -> one weight matmul per conv layer
            k_all = np.concatenate(list(k_taps), axis=1)   # (cout*Bp, ntaps*cin*Bp)

            if li == 0:
                # first conv consumes the wrapper-side im2col row-stack directly.
                consts.append(jnp.asarray(k_all, dtype=jnp.bfloat16))
            else:
                # in-kernel im2col: 0/1 lane-gather matrices from the previous
                # activation space to this layer's output space (zero columns
                # implement the conv zero padding).  Stored bf16 (exact 0/1).
                gim = np.zeros((ntaps, s_in, s_out), np.float32)
                t = 0
                for dy in range(kh):
                    for dx in range(kw):
                        for yo in range(out_h):
                            yi = yo * stride + dy - pad
                            if 0 <= yi < in_h:
                                for xo in range(out_w):
                                    xi = xo * stride + dx - pad
                                    if 0 <= xi < in_w:
                                        gim[t, yi * in_w + xi, yo * out_w + xo] = 1.0
                        t += 1
                consts.append(jnp.asarray(gim, dtype=jnp.bfloat16))
                consts.append(jnp.asarray(k_all, dtype=jnp.bfloat16))
                # bf16 VMEM scratch that row-stacks the ntaps gathered patches
                scratch_shapes.append(
                    pltpu.VMEM((ntaps * cin * Bp, s_out), jnp.bfloat16))

            b_rows = np.repeat(np.asarray(b, np.float32), Bp).reshape(cout * Bp, 1)
            consts.append(jnp.asarray(b_rows, dtype=jnp.float32))

            if pool == "max":
                ph, pw = fin_h, fin_w
                # 4 corner-selection matrices for MaxPool2d(2, 2), bf16 (exact 0/1)
                gp = np.zeros((4, s_out, ph * pw), np.float32)
                for k, (dy, dx) in enumerate(((0, 0), (0, 1), (1, 0), (1, 1))):
                    for yp in range(ph):
                        for xp in range(pw):
                            gp[k, (2 * yp + dy) * out_w + (2 * xp + dx),
                               yp * pw + xp] = 1.0
                consts.append(jnp.asarray(gp, dtype=jnp.bfloat16))

            conv_struct.append(dict(first=(li == 0), ntaps=ntaps, cin=cin,
                                    cout=cout, s_out=s_out, pool=(pool == "max")))

        fc_struct = []
        for fi, (wgt, b) in enumerate(self.fc_params):
            fout, fin = wgt.shape
            # W^T so the kernel contracts rows [co*S:(co+1)*S] per channel block;
            # the torch flatten order (C-major, then y, x) is exactly this layout.
            consts.append(jnp.asarray(np.asarray(wgt, np.float32).T,
                                      dtype=jnp.bfloat16))
            consts.append(jnp.asarray(np.asarray(b, np.float32).reshape(1, fout),
                                      dtype=jnp.float32))
            fc_struct.append(dict(fin=fin, fout=fout, first=(fi == 0)))

        self._consts = tuple(consts)
        self._scratch_shapes = tuple(scratch_shapes)
        n_in = 1 + len(consts)           # x im2col stack + all constants

        c_last = conv_struct[-1]["cout"]
        s_last = self.fc_inputs // c_last

        def kernel(*refs):
            x_ref = refs[0]                          # (ntaps*Cin*Bp, S1) bf16 im2col
            o_ref = refs[n_in]
            scratch_refs = refs[n_in + 1:]
            ri = 1
            si = 0
            act = None                               # f32 activation (C*Bp, S)
            act_b = None                             # bf16 copy for matmul operands
            # ---------------- conv (+ReLU, + optional 2x2 max-pool) stack ----
            for cs in conv_struct:
                if cs["first"]:
                    k_ref = refs[ri]; b_ref = refs[ri + 1]; ri += 2
                    acc = jnp.dot(k_ref[...], x_ref[...],
                                  preferred_element_type=jnp.float32)
                else:
                    gim_ref = refs[ri]; k_ref = refs[ri + 1]; b_ref = refs[ri + 2]
                    ri += 3
                    patches = scratch_refs[si]; si += 1
                    rows = cs["cin"] * Bp
                    # in-kernel im2col taps (bf16 selection matmuls), row-stacked
                    # into the scratch so ONE big weight matmul does the conv.
                    for t in range(cs["ntaps"]):
                        tap = jnp.dot(act_b, gim_ref[t],
                                      preferred_element_type=jnp.float32)
                        patches[t * rows:(t + 1) * rows, :] = tap.astype(jnp.bfloat16)
                    acc = jnp.dot(k_ref[...], patches[...],
                                  preferred_element_type=jnp.float32)
                act = jnp.maximum(acc + b_ref[...], 0.0)     # bias + ReLU (f32)
                act_b = act.astype(jnp.bfloat16)
                if cs["pool"]:
                    gp_ref = refs[ri]; ri += 1
                    c00 = jnp.dot(act_b, gp_ref[0], preferred_element_type=jnp.float32)
                    c01 = jnp.dot(act_b, gp_ref[1], preferred_element_type=jnp.float32)
                    c10 = jnp.dot(act_b, gp_ref[2], preferred_element_type=jnp.float32)
                    c11 = jnp.dot(act_b, gp_ref[3], preferred_element_type=jnp.float32)
                    act = jnp.maximum(jnp.maximum(c00, c01), jnp.maximum(c10, c11))
                    act_b = act.astype(jnp.bfloat16)
            # ---------------- flatten (torch order) + Linear/ReLU stack ------
            for fs in fc_struct:
                w_ref = refs[ri]; b_ref = refs[ri + 1]; ri += 2
                if fs["first"]:
                    out = None
                    for co in range(c_last):
                        a_blk = act[co * Bp:(co + 1) * Bp, :].astype(jnp.bfloat16)
                        w_blk = w_ref[co * s_last:(co + 1) * s_last, :]
                        p = jnp.dot(a_blk, w_blk, preferred_element_type=jnp.float32)
                        out = p if out is None else out + p
                    out = out + b_ref[...]
                else:
                    out = jnp.dot(act.astype(jnp.bfloat16), w_ref[...],
                                  preferred_element_type=jnp.float32) + b_ref[...]
                act = jnp.maximum(out, 0.0)
            o_ref[...] = act

        self._kernel = kernel

    # --------------------------------------------------------------- forward
    def _first_layer_im2col(self, x_nchw):
        """Input-side im2col for conv layer 0, rows = (tap, cin, batch), lanes = oh*ow."""
        _, _, stride, pad, _, kh, kw = self.conv_params[0]
        _, _, out_h, out_w, _, _ = self.layer_dims[0]
        B = x_nchw.shape[0]
        x = x_nchw.astype(jnp.float32)
        if B < self.Bp:
            x = jnp.pad(x, ((0, self.Bp - B), (0, 0), (0, 0), (0, 0)))
        if pad > 0:
            x = jnp.pad(x, ((0, 0), (0, 0), (pad, pad), (pad, pad)))
        cin = x.shape[1]
        x = jnp.transpose(x, (1, 0, 2, 3))            # (cin, Bp, Hp, Wp) — one transpose
        pieces = []
        for dy in range(kh):
            for dx in range(kw):
                win = x[:, :, dy:dy + stride * out_h:stride,
                        dx:dx + stride * out_w:stride]        # (cin, Bp, oh, ow)
                pieces.append(win.reshape(cin * self.Bp, out_h * out_w))
        return jnp.concatenate(pieces, axis=0).astype(jnp.bfloat16)

    def _forward(self, x_nchw, consts):
        x1 = self._first_layer_im2col(x_nchw)
        args = (x1,) + consts
        return pl.pallas_call(
            self._kernel,
            out_shape=jax.ShapeDtypeStruct((self.Bp, self.output_size), jnp.float32),
            in_specs=[pl.BlockSpec(memory_space=pltpu.MemorySpace.VMEM)
                      for _ in args],
            out_specs=pl.BlockSpec(memory_space=pltpu.MemorySpace.VMEM),
            scratch_shapes=list(self._scratch_shapes),
        )(*args)

    def __call__(self, x_nchw, training=False):
        B = x_nchw.shape[0]
        assert B <= self.Bp, f"batch {B} exceeds padded batch {self.Bp}"
        out = self._forward_jit(x_nchw, self._consts)
        return out[:B]


# ---------------------------------------------------------------------------
# Plain-JAX reference of CNNMapEncoderV2.forward (for validation only)
# ---------------------------------------------------------------------------
def reference_forward(model, x_nchw):
    x = x_nchw.astype(jnp.float32)
    for wgt, b, stride, pad, pool, kh, kw in model.conv_params:
        x = jax.lax.conv_general_dilated(
            x, wgt, window_strides=(stride, stride),
            padding=((pad, pad), (pad, pad)),
            dimension_numbers=("NCHW", "OIHW", "NCHW"),
            precision=jax.lax.Precision.HIGHEST)
        x = jnp.maximum(x + b.reshape(1, -1, 1, 1), 0.0)
        if pool == "max":
            x = jax.lax.reduce_window(x, -jnp.inf, jax.lax.max,
                                      (1, 1, 2, 2), (1, 1, 2, 2), "VALID")
    x = x.reshape(x.shape[0], -1)
    for wgt, b in model.fc_params:
        x = jnp.maximum(
            jnp.dot(x, wgt.T, precision=jax.lax.Precision.HIGHEST) + b, 0.0)
    return x


# ---------------------------------------------------------------------------
# main
# ---------------------------------------------------------------------------
if __name__ == "__main__":
    config = {
        "patch_size": [8, 8, 8, 8],        # -> (16, 16) patch
        "map_channels": 4,
        "hidden_channels": [8, 16],
        "output_size": 32,
        "masks": [3, 3],                   # conv filter sizes
        "strides": [1, 1],
        "paddings": [1, 1],
        "poolings": ["max", None],
        # no 'fc_features' -> single Linear(fc_inputs, output_size) + ReLU
    }

    root = jax.random.PRNGKey(0)
    x_key, param_key = jax.random.split(root)
    model = CNNMapEncoderV2Pallas(config, param_key, max_batch=8)

    B = 2
    x = jax.random.normal(
        x_key, (B, config["map_channels"], *model.patch_size), jnp.float32)

    out = model(x, training=False)
    out = jax.block_until_ready(out)

    assert out.shape == (B, config["output_size"]), out.shape
    assert out.dtype == jnp.float32
    assert bool(jnp.all(jnp.isfinite(out)))

    # validate against a plain-JAX reference (bf16 MXU operands => loose tol)
    ref = reference_forward(model, x)
    max_err = float(jnp.max(jnp.abs(out - ref)))
    assert jnp.allclose(out, ref, rtol=5e-2, atol=3e-2), f"max |err| = {max_err}"

    print("KERNEL_OK")
</pallas_src>

<mosaic_0001>
module attributes {stable_mosaic.version = 11 : i64} {
  func.func @kernel(%arg0: memref<288x256xbf16, #tpu.memory_space<vmem>>, %arg1: memref<64x288xbf16, #tpu.memory_space<vmem>>, %arg2: memref<64x1xf32, #tpu.memory_space<vmem>>, %arg3: memref<4x256x64xbf16, #tpu.memory_space<vmem>>, %arg4: memref<9x64x64xbf16, #tpu.memory_space<vmem>>, %arg5: memref<128x576xbf16, #tpu.memory_space<vmem>>, %arg6: memref<128x1xf32, #tpu.memory_space<vmem>>, %arg7: memref<1024x32xbf16, #tpu.memory_space<vmem>>, %arg8: memref<1x32xf32, #tpu.memory_space<vmem>>, %arg9: memref<8x32xf32, #tpu.memory_space<vmem>>, %arg10: memref<576x64xbf16, #tpu.memory_space<vmem>>) attributes {dimension_semantics = [], scalar_prefetch = 0 : i64, scratch_operands = 1 : i64, tpu.core_type = #tpu.core_type<tc>} {
    %c0 = arith.constant 0 : index
    %c0_0 = arith.constant 0 : index
    %0 = vector.load %arg1[%c0, %c0_0] : memref<64x288xbf16, #tpu.memory_space<vmem>>, vector<64x288xbf16>
    %c0_1 = arith.constant 0 : index
    %c0_2 = arith.constant 0 : index
    %1 = vector.load %arg0[%c0_1, %c0_2] : memref<288x256xbf16, #tpu.memory_space<vmem>>, vector<288x256xbf16>
    %cst = arith.constant dense<0.000000e+00> : vector<64x256xf32>
    %2 = tpu.matmul %0, %1, %cst {dimension_numbers = #tpu.dot_dimension_numbers<[1], [0], [0], [1], [0, 0, 1, 1], [], []>} : vector<64x288xbf16>, vector<288x256xbf16>, vector<64x256xf32> -> vector<64x256xf32>
    %c0_3 = arith.constant 0 : index
    %c0_4 = arith.constant 0 : index
    %3 = vector.load %arg2[%c0_3, %c0_4] : memref<64x1xf32, #tpu.memory_space<vmem>>, vector<64x1xf32>
    %4 = vector.broadcast %3 : vector<64x1xf32> to vector<64x256xf32>
    %5 = arith.addf %2, %4 : vector<64x256xf32>
    %cst_5 = arith.constant 0.000000e+00 : f32
    %6 = vector.broadcast %cst_5 : f32 to vector<64x256xf32>
    %7 = arith.maximumf %5, %6 : vector<64x256xf32>
    %8 = arith.truncf %7 : vector<64x256xf32> to vector<64x256xbf16>
    %c0_6 = arith.constant 0 : index
    %c0_7 = arith.constant 0 : index
    %c0_8 = arith.constant 0 : index
    %9 = vector.load %arg3[%c0_6, %c0_7, %c0_8] : memref<4x256x64xbf16, #tpu.memory_space<vmem>>, vector<1x256x64xbf16>
    %10 = vector.shape_cast %9 : vector<1x256x64xbf16> to vector<256x64xbf16>
    %cst_9 = arith.constant dense<0.000000e+00> : vector<64x64xf32>
    %11 = tpu.matmul %8, %10, %cst_9 {dimension_numbers = #tpu.dot_dimension_numbers<[1], [0], [0], [1], [0, 0, 1, 1], [], []>} : vector<64x256xbf16>, vector<256x64xbf16>, vector<64x64xf32> -> vector<64x64xf32>
    %c1 = arith.constant 1 : index
    %c0_10 = arith.constant 0 : index
    %c0_11 = arith.constant 0 : index
    %12 = vector.load %arg3[%c1, %c0_10, %c0_11] : memref<4x256x64xbf16, #tpu.memory_space<vmem>>, vector<1x256x64xbf16>
    %13 = vector.shape_cast %12 : vector<1x256x64xbf16> to vector<256x64xbf16>
    %cst_12 = arith.constant dense<0.000000e+00> : vector<64x64xf32>
    %14 = tpu.matmul %8, %13, %cst_12 {dimension_numbers = #tpu.dot_dimension_numbers<[1], [0], [0], [1], [0, 0, 1, 1], [], []>} : vector<64x256xbf16>, vector<256x64xbf16>, vector<64x64xf32> -> vector<64x64xf32>
    %c2 = arith.constant 2 : index
    %c0_13 = arith.constant 0 : index
    %c0_14 = arith.constant 0 : index
    %15 = vector.load %arg3[%c2, %c0_13, %c0_14] : memref<4x256x64xbf16, #tpu.memory_space<vmem>>, vector<1x256x64xbf16>
    %16 = vector.shape_cast %15 : vector<1x256x64xbf16> to vector<256x64xbf16>
    %cst_15 = arith.constant dense<0.000000e+00> : vector<64x64xf32>
    %17 = tpu.matmul %8, %16, %cst_15 {dimension_numbers = #tpu.dot_dimension_numbers<[1], [0], [0], [1], [0, 0, 1, 1], [], []>} : vector<64x256xbf16>, vector<256x64xbf16>, vector<64x64xf32> -> vector<64x64xf32>
    %c3 = arith.constant 3 : index
    %c0_16 = arith.constant 0 : index
    %c0_17 = arith.constant 0 : index
    %18 = vector.load %arg3[%c3, %c0_16, %c0_17] : memref<4x256x64xbf16, #tpu.memory_space<vmem>>, vector<1x256x64xbf16>
    %19 = vector.shape_cast %18 : vector<1x256x64xbf16> to vector<256x64xbf16>
    %cst_18 = arith.constant dense<0.000000e+00> : vector<64x64xf32>
    %20 = tpu.matmul %8, %19, %cst_18 {dimension_numbers = #tpu.dot_dimension_numbers<[1], [0], [0], [1], [0, 0, 1, 1], [], []>} : vector<64x256xbf16>, vector<256x64xbf16>, vector<64x64xf32> -> vector<64x64xf32>
    %21 = arith.maximumf %11, %14 : vector<64x64xf32>
    %22 = arith.maximumf %17, %20 : vector<64x64xf32>
    %23 = arith.maximumf %21, %22 : vector<64x64xf32>
    %24 = arith.truncf %23 : vector<64x64xf32> to vector<64x64xbf16>
    %c0_19 = arith.constant 0 : index
    %c0_20 = arith.constant 0 : index
    %c0_21 = arith.constant 0 : index
    %25 = vector.load %arg4[%c0_19, %c0_20, %c0_21] : memref<9x64x64xbf16, #tpu.memory_space<vmem>>, vector<1x64x64xbf16>
    %26 = vector.shape_cast %25 : vector<1x64x64xbf16> to vector<64x64xbf16>
    %cst_22 = arith.constant dense<0.000000e+00> : vector<64x64xf32>
    %27 = tpu.matmul %24, %26, %cst_22 {dimension_numbers = #tpu.dot_dimension_numbers<[1], [0], [0], [1], [0, 0, 1, 1], [], []>} : vector<64x64xbf16>, vector<64x64xbf16>, vector<64x64xf32> -> vector<64x64xf32>
    %28 = arith.truncf %27 : vector<64x64xf32> to vector<64x64xbf16>
    %c0_23 = arith.constant 0 : index
    %c0_24 = arith.constant 0 : index
    %29 = vector.load %arg10[%c0_23, %c0_24] : memref<576x64xbf16, #tpu.memory_space<vmem>>, vector<64x64xbf16>
    tpu.vector_store %arg10[%c0_23, %c0_24], %28 {strides = array<i32>} : memref<576x64xbf16, #tpu.memory_space<vmem>>, vector<64x64xbf16>,
    %c1_25 = arith.constant 1 : index
    %c0_26 = arith.constant 0 : index
    %c0_27 = arith.constant 0 : index
    %30 = vector.load %arg4[%c1_25, %c0_26, %c0_27] : memref<9x64x64xbf16, #tpu.memory_space<vmem>>, vector<1x64x64xbf16>
    %31 = vector.shape_cast %30 : vector<1x64x64xbf16> to vector<64x64xbf16>
    %cst_28 = arith.constant dense<0.000000e+00> : vector<64x64xf32>
    %32 = tpu.matmul %24, %31, %cst_28 {dimension_numbers = #tpu.dot_dimension_numbers<[1], [0], [0], [1], [0, 0, 1, 1], [], []>} : vector<64x64xbf16>, vector<64x64xbf16>, vector<64x64xf32> -> vector<64x64xf32>
    %33 = arith.truncf %32 : vector<64x64xf32> to vector<64x64xbf16>
    %c64 = arith.constant 64 : index
    %c0_29 = arith.constant 0 : index
    %34 = vector.load %arg10[%c64, %c0_29] : memref<576x64xbf16, #tpu.memory_space<vmem>>, vector<64x64xbf16>
    tpu.vector_store %arg10[%c64, %c0_29], %33 {strides = array<i32>} : memref<576x64xbf16, #tpu.memory_space<vmem>>, vector<64x64xbf16>,
    %c2_30 = arith.constant 2 : index
    %c0_31 = arith.constant 0 : index
    %c0_32 = arith.constant 0 : index
    %35 = vector.load %arg4[%c2_30, %c0_31, %c0_32] : memref<9x64x64xbf16, #tpu.memory_space<vmem>>, vector<1x64x64xbf16>
    %36 = vector.shape_cast %35 : vector<1x64x64xbf16> to vector<64x64xbf16>
    %cst_33 = arith.constant dense<0.000000e+00> : vector<64x64xf32>
    %37 = tpu.matmul %24, %36, %cst_33 {dimension_numbers = #tpu.dot_dimension_numbers<[1], [0], [0], [1], [0, 0, 1, 1], [], []>} : vector<64x64xbf16>, vector<64x64xbf16>, vector<64x64xf32> -> vector<64x64xf32>
    %38 = arith.truncf %37 : vector<64x64xf32> to vector<64x64xbf16>
    %c128 = arith.constant 128 : index
    %c0_34 = arith.constant 0 : index
    %39 = vector.load %arg10[%c128, %c0_34] : memref<576x64xbf16, #tpu.memory_space<vmem>>, vector<64x64xbf16>
    tpu.vector_store %arg10[%c128, %c0_34], %38 {strides = array<i32>} : memref<576x64xbf16, #tpu.memory_space<vmem>>, vector<64x64xbf16>,
    %c3_35 = arith.constant 3 : index
    %c0_36 = arith.constant 0 : index
    %c0_37 = arith.constant 0 : index
    %40 = vector.load %arg4[%c3_35, %c0_36, %c0_37] : memref<9x64x64xbf16, #tpu.memory_space<vmem>>, vector<1x64x64xbf16>
    %41 = vector.shape_cast %40 : vector<1x64x64xbf16> to vector<64x64xbf16>
    %cst_38 = arith.constant dense<0.000000e+00> : vector<64x64xf32>
    %42 = tpu.matmul %24, %41, %cst_38 {dimension_numbers = #tpu.dot_dimension_numbers<[1], [0], [0], [1], [0, 0, 1, 1], [], []>} : vector<64x64xbf16>, vector<64x64xbf16>, vector<64x64xf32> -> vector<64x64xf32>
    %43 = arith.truncf %42 : vector<64x64xf32> to vector<64x64xbf16>
    %c192 = arith.constant 192 : index
    %c0_39 = arith.constant 0 : index
    %44 = vector.load %arg10[%c192, %c0_39] : memref<576x64xbf16, #tpu.memory_space<vmem>>, vector<64x64xbf16>
    tpu.vector_store %arg10[%c192, %c0_39], %43 {strides = array<i32>} : memref<576x64xbf16, #tpu.memory_space<vmem>>, vector<64x64xbf16>,
    %c4 = arith.constant 4 : index
    %c0_40 = arith.constant 0 : index
    %c0_41 = arith.constant 0 : index
    %45 = vector.load %arg4[%c4, %c0_40, %c0_41] : memref<9x64x64xbf16, #tpu.memory_space<vmem>>, vector<1x64x64xbf16>
    %46 = vector.shape_cast %45 : vector<1x64x64xbf16> to vector<64x64xbf16>
    %cst_42 = arith.constant dense<0.000000e+00> : vector<64x64xf32>
    %47 = tpu.matmul %24, %46, %cst_42 {dimension_numbers = #tpu.dot_dimension_numbers<[1], [0], [0], [1], [0, 0, 1, 1], [], []>} : vector<64x64xbf16>, vector<64x64xbf16>, vector<64x64xf32> -> vector<64x64xf32>
    %48 = arith.truncf %47 : vector<64x64xf32> to vector<64x64xbf16>
    %c256 = arith.constant 256 : index
    %c0_43 = arith.constant 0 : index
    %49 = vector.load %arg10[%c256, %c0_43] : memref<576x64xbf16, #tpu.memory_space<vmem>>, vector<64x64xbf16>
    tpu.vector_store %arg10[%c256, %c0_43], %48 {strides = array<i32>} : memref<576x64xbf16, #tpu.memory_space<vmem>>, vector<64x64xbf16>,
    %c5 = arith.constant 5 : index
    %c0_44 = arith.constant 0 : index
    %c0_45 = arith.constant 0 : index
    %50 = vector.load %arg4[%c5, %c0_44, %c0_45] : memref<9x64x64xbf16, #tpu.memory_space<vmem>>, vector<1x64x64xbf16>
    %51 = vector.shape_cast %50 : vector<1x64x64xbf16> to vector<64x64xbf16>
    %cst_46 = arith.constant dense<0.000000e+00> : vector<64x64xf32>
    %52 = tpu.matmul %24, %51, %cst_46 {dimension_numbers = #tpu.dot_dimension_numbers<[1], [0], [0], [1], [0, 0, 1, 1], [], []>} : vector<64x64xbf16>, vector<64x64xbf16>, vector<64x64xf32> -> vector<64x64xf32>
    %53 = arith.truncf %52 : vector<64x64xf32> to vector<64x64xbf16>
    %c320 = arith.constant 320 : index
    %c0_47 = arith.constant 0 : index
    %54 = vector.load %arg10[%c320, %c0_47] : memref<576x64xbf16, #tpu.memory_space<vmem>>, vector<64x64xbf16>
    tpu.vector_store %arg10[%c320, %c0_47], %53 {strides = array<i32>} : memref<576x64xbf16, #tpu.memory_space<vmem>>, vector<64x64xbf16>,
    %c6 = arith.constant 6 : index
    %c0_48 = arith.constant 0 : index
    %c0_49 = arith.constant 0 : index
    %55 = vector.load %arg4[%c6, %c0_48, %c0_49] : memref<9x64x64xbf16, #tpu.memory_space<vmem>>, vector<1x64x64xbf16>
    %56 = vector.shape_cast %55 : vector<1x64x64xbf16> to vector<64x64xbf16>
    %cst_50 = arith.constant dense<0.000000e+00> : vector<64x64xf32>
    %57 = tpu.matmul %24, %56, %cst_50 {dimension_numbers = #tpu.dot_dimension_numbers<[1], [0], [0], [1], [0, 0, 1, 1], [], []>} : vector<64x64xbf16>, vector<64x64xbf16>, vector<64x64xf32> -> vector<64x64xf32>
    %58 = arith.truncf %57 : vector<64x64xf32> to vector<64x64xbf16>
    %c384 = arith.constant 384 : index
    %c0_51 = arith.constant 0 : index
    %59 = vector.load %arg10[%c384, %c0_51] : memref<576x64xbf16, #tpu.memory_space<vmem>>, vector<64x64xbf16>
    tpu.vector_store %arg10[%c384, %c0_51], %58 {strides = array<i32>} : memref<576x64xbf16, #tpu.memory_space<vmem>>, vector<64x64xbf16>,
    %c7 = arith.constant 7 : index
    %c0_52 = arith.constant 0 : index
    %c0_53 = arith.constant 0 : index
    %60 = vector.load %arg4[%c7, %c0_52, %c0_53] : memref<9x64x64xbf16, #tpu.memory_space<vmem>>, vector<1x64x64xbf16>
    %61 = vector.shape_cast %60 : vector<1x64x64xbf16> to vector<64x64xbf16>
    %cst_54 = arith.constant dense<0.000000e+00> : vector<64x64xf32>
    %62 = tpu.matmul %24, %61, %cst_54 {dimension_numbers = #tpu.dot_dimension_numbers<[1], [0], [0], [1], [0, 0, 1, 1], [], []>} : vector<64x64xbf16>, vector<64x64xbf16>, vector<64x64xf32> -> vector<64x64xf32>
    %63 = arith.truncf %62 : vector<64x64xf32> to vector<64x64xbf16>
    %c448 = arith.constant 448 : index
    %c0_55 = arith.constant 0 : index
    %64 = vector.load %arg10[%c448, %c0_55] : memref<576x64xbf16, #tpu.memory_space<vmem>>, vector<64x64xbf16>
    tpu.vector_store %arg10[%c448, %c0_55], %63 {strides = array<i32>} : memref<576x64xbf16, #tpu.memory_space<vmem>>, vector<64x64xbf16>,
    %c8 = arith.constant 8 : index
    %c0_56 = arith.constant 0 : index
    %c0_57 = arith.constant 0 : index
    %65 = vector.load %arg4[%c8, %c0_56, %c0_57] : memref<9x64x64xbf16, #tpu.memory_space<vmem>>, vector<1x64x64xbf16>
    %66 = vector.shape_cast %65 : vector<1x64x64xbf16> to vector<64x64xbf16>
    %cst_58 = arith.constant dense<0.000000e+00> : vector<64x64xf32>
    %67 = tpu.matmul %24, %66, %cst_58 {dimension_numbers = #tpu.dot_dimension_numbers<[1], [0], [0], [1], [0, 0, 1, 1], [], []>} : vector<64x64xbf16>, vector<64x64xbf16>, vector<64x64xf32> -> vector<64x64xf32>
    %68 = arith.truncf %67 : vector<64x64xf32> to vector<64x64xbf16>
    %c512 = arith.constant 512 : index
    %c0_59 = arith.constant 0 : index
    %69 = vector.load %arg10[%c512, %c0_59] : memref<576x64xbf16, #tpu.memory_space<vmem>>, vector<64x64xbf16>
    tpu.vector_store %arg10[%c512, %c0_59], %68 {strides = array<i32>} : memref<576x64xbf16, #tpu.memory_space<vmem>>, vector<64x64xbf16>,
    %c0_60 = arith.constant 0 : index
    %c0_61 = arith.constant 0 : index
    %70 = vector.load %arg5[%c0_60, %c0_61] : memref<128x576xbf16, #tpu.memory_space<vmem>>, vector<128x576xbf16>
    %c0_62 = arith.constant 0 : index
    %c0_63 = arith.constant 0 : index
    %71 = vector.load %arg10[%c0_62, %c0_63] : memref<576x64xbf16, #tpu.memory_space<vmem>>, vector<576x64xbf16>
    %cst_64 = arith.constant dense<0.000000e+00> : vector<128x64xf32>
    %72 = tpu.matmul %70, %71, %cst_64 {dimension_numbers = #tpu.dot_dimension_numbers<[1], [0], [0], [1], [0, 0, 1, 1], [], []>} : vector<128x576xbf16>, vector<576x64xbf16>, vector<128x64xf32> -> vector<128x64xf32>
    %c0_65 = arith.constant 0 : index
    %c0_66 = arith.constant 0 : index
    %73 = vector.load %arg6[%c0_65, %c0_66] : memref<128x1xf32, #tpu.memory_space<vmem>>, vector<128x1xf32>
    %74 = vector.broadcast %73 : vector<128x1xf32> to vector<128x64xf32>
    %75 = arith.addf %72, %74 : vector<128x64xf32>
    %cst_67 = arith.constant 0.000000e+00 : f32
    %76 = vector.broadcast %cst_67 : f32 to vector<128x64xf32>
    %77 = arith.maximumf %75, %76 : vector<128x64xf32>
    %78 = vector.extract_strided_slice %77 {offsets = [0, 0], sizes = [8, 64], strides = [1, 1]} : vector<128x64xf32> to vector<8x64xf32>
    %79 = arith.truncf %78 : vector<8x64xf32> to vector<8x64xbf16>
    %c0_68 = arith.constant 0 : index
    %c0_69 = arith.constant 0 : index
    %80 = vector.load %arg7[%c0_68, %c0_69] : memref<1024x32xbf16, #tpu.memory_space<vmem>>, vector<64x32xbf16>
    %cst_70 = arith.constant dense<0.000000e+00> : vector<8x32xf32>
    %81 = tpu.matmul %79, %80, %cst_70 {dimension_numbers = #tpu.dot_dimension_numbers<[1], [0], [0], [1], [0, 0, 1, 1], [], []>} : vector<8x64xbf16>, vector<64x32xbf16>, vector<8x32xf32> -> vector<8x32xf32>
    %82 = vector.extract_strided_slice %77 {offsets = [8, 0], sizes = [8, 64], strides = [1, 1]} : vector<128x64xf32> to vector<8x64xf32>
    %83 = arith.truncf %82 : vector<8x64xf32> to vector<8x64xbf16>
    %c64_71 = arith.constant 64 : index
    %c0_72 = arith.constant 0 : index
    %84 = vector.load %arg7[%c64_71, %c0_72] : memref<1024x32xbf16, #tpu.memory_space<vmem>>, vector<64x32xbf16>
    %cst_73 = arith.constant dense<0.000000e+00> : vector<8x32xf32>
    %85 = tpu.matmul %83, %84, %cst_73 {dimension_numbers = #tpu.dot_dimension_numbers<[1], [0], [0], [1], [0, 0, 1, 1], [], []>} : vector<8x64xbf16>, vector<64x32xbf16>, vector<8x32xf32> -> vector<8x32xf32>
    %86 = arith.addf %81, %85 : vector<8x32xf32>
    %87 = vector.extract_strided_slice %77 {offsets = [16, 0], sizes = [8, 64], strides = [1, 1]} : vector<128x64xf32> to vector<8x64xf32>
    %88 = arith.truncf %87 : vector<8x64xf32> to vector<8x64xbf16>
    %c128_74 = arith.constant 128 : index
    %c0_75 = arith.constant 0 : index
    %89 = vector.load %arg7[%c128_74, %c0_75] : memref<1024x32xbf16, #tpu.memory_space<vmem>>, vector<64x32xbf16>
    %cst_76 = arith.constant dense<0.000000e+00> : vector<8x32xf32>
    %90 = tpu.matmul %88, %89, %cst_76 {dimension_numbers = #tpu.dot_dimension_numbers<[1], [0], [0], [1], [0, 0, 1, 1], [], []>} : vector<8x64xbf16>, vector<64x32xbf16>, vector<8x32xf32> -> vector<8x32xf32>
    %91 = arith.addf %86, %90 : vector<8x32xf32>
    %92 = vector.extract_strided_slice %77 {offsets = [24, 0], sizes = [8, 64], strides = [1, 1]} : vector<128x64xf32> to vector<8x64xf32>
    %93 = arith.truncf %92 : vector<8x64xf32> to vector<8x64xbf16>
    %c192_77 = arith.constant 192 : index
    %c0_78 = arith.constant 0 : index
    %94 = vector.load %arg7[%c192_77, %c0_78] : memref<1024x32xbf16, #tpu.memory_space<vmem>>, vector<64x32xbf16>
    %cst_79 = arith.constant dense<0.000000e+00> : vector<8x32xf32>
    %95 = tpu.matmul %93, %94, %cst_79 {dimension_numbers = #tpu.dot_dimension_numbers<[1], [0], [0], [1], [0, 0, 1, 1], [], []>} : vector<8x64xbf16>, vector<64x32xbf16>, vector<8x32xf32> -> vector<8x32xf32>
    %96 = arith.addf %91, %95 : vector<8x32xf32>
    %97 = vector.extract_strided_slice %77 {offsets = [32, 0], sizes = [8, 64], strides = [1, 1]} : vector<128x64xf32> to vector<8x64xf32>
    %98 = arith.truncf %97 : vector<8x64xf32> to vector<8x64xbf16>
    %c256_80 = arith.constant 256 : index
    %c0_81 = arith.constant 0 : index
    %99 = vector.load %arg7[%c256_80, %c0_81] : memref<1024x32xbf16, #tpu.memory_space<vmem>>, vector<64x32xbf16>
    %cst_82 = arith.constant dense<0.000000e+00> : vector<8x32xf32>
    %100 = tpu.matmul %98, %99, %cst_82 {dimension_numbers = #tpu.dot_dimension_numbers<[1], [0], [0], [1], [0, 0, 1, 1], [], []>} : vector<8x64xbf16>, vector<64x32xbf16>, vector<8x32xf32> -> vector<8x32xf32>
    %101 = arith.addf %96, %100 : vector<8x32xf32>
    %102 = vector.extract_strided_slice %77 {offsets = [40, 0], sizes = [8, 64], strides = [1, 1]} : vector<128x64xf32> to vector<8x64xf32>
    %103 = arith.truncf %102 : vector<8x64xf32> to vector<8x64xbf16>
    %c320_83 = arith.constant 320 : index
    %c0_84 = arith.constant 0 : index
    %104 = vector.load %arg7[%c320_83, %c0_84] : memref<1024x32xbf16, #tpu.memory_space<vmem>>, vector<64x32xbf16>
    %cst_85 = arith.constant dense<0.000000e+00> : vector<8x32xf32>
    %105 = tpu.matmul %103, %104, %cst_85 {dimension_numbers = #tpu.dot_dimension_numbers<[1], [0], [0], [1], [0, 0, 1, 1], [], []>} : vector<8x64xbf16>, vector<64x32xbf16>, vector<8x32xf32> -> vector<8x32xf32>
    %106 = arith.addf %101, %105 : vector<8x32xf32>
    %107 = vector.extract_strided_slice %77 {offsets = [48, 0], sizes = [8, 64], strides = [1, 1]} : vector<128x64xf32> to vector<8x64xf32>
    %108 = arith.truncf %107 : vector<8x64xf32> to vector<8x64xbf16>
    %c384_86 = arith.constant 384 : index
    %c0_87 = arith.constant 0 : index
    %109 = vector.load %arg7[%c384_86, %c0_87] : memref<1024x32xbf16, #tpu.memory_space<vmem>>, vector<64x32xbf16>
    %cst_88 = arith.constant dense<0.000000e+00> : vector<8x32xf32>
    %110 = tpu.matmul %108, %109, %cst_88 {dimension_numbers = #tpu.dot_dimension_numbers<[1], [0], [0], [1], [0, 0, 1, 1], [], []>} : vector<8x64xbf16>, vector<64x32xbf16>, vector<8x32xf32> -> vector<8x32xf32>
    %111 = arith.addf %106, %110 : vector<8x32xf32>
    %112 = vector.extract_strided_slice %77 {offsets = [56, 0], sizes = [8, 64], strides = [1, 1]} : vector<128x64xf32> to vector<8x64xf32>
    %113 = arith.truncf %112 : vector<8x64xf32> to vector<8x64xbf16>
    %c448_89 = arith.constant 448 : index
    %c0_90 = arith.constant 0 : index
    %114 = vector.load %arg7[%c448_89, %c0_90] : memref<1024x32xbf16, #tpu.memory_space<vmem>>, vector<64x32xbf16>
    %cst_91 = arith.constant dense<0.000000e+00> : vector<8x32xf32>
    %115 = tpu.matmul %113, %114, %cst_91 {dimension_numbers = #tpu.dot_dimension_numbers<[1], [0], [0], [1], [0, 0, 1, 1], [], []>} : vector<8x64xbf16>, vector<64x32xbf16>, vector<8x32xf32> -> vector<8x32xf32>
    %116 = arith.addf %111, %115 : vector<8x32xf32>
    %117 = vector.extract_strided_slice %77 {offsets = [64, 0], sizes = [8, 64], strides = [1, 1]} : vector<128x64xf32> to vector<8x64xf32>
    %118 = arith.truncf %117 : vector<8x64xf32> to vector<8x64xbf16>
    %c512_92 = arith.constant 512 : index
    %c0_93 = arith.constant 0 : index
    %119 = vector.load %arg7[%c512_92, %c0_93] : memref<1024x32xbf16, #tpu.memory_space<vmem>>, vector<64x32xbf16>
    %cst_94 = arith.constant dense<0.000000e+00> : vector<8x32xf32>
    %120 = tpu.matmul %118, %119, %cst_94 {dimension_numbers = #tpu.dot_dimension_numbers<[1], [0], [0], [1], [0, 0, 1, 1], [], []>} : vector<8x64xbf16>, vector<64x32xbf16>, vector<8x32xf32> -> vector<8x32xf32>
    %121 = arith.addf %116, %120 : vector<8x32xf32>
    %122 = vector.extract_strided_slice %77 {offsets = [72, 0], sizes = [8, 64], strides = [1, 1]} : vector<128x64xf32> to vector<8x64xf32>
    %123 = arith.truncf %122 : vector<8x64xf32> to vector<8x64xbf16>
    %c576 = arith.constant 576 : index
    %c0_95 = arith.constant 0 : index
    %124 = vector.load %arg7[%c576, %c0_95] : memref<1024x32xbf16, #tpu.memory_space<vmem>>, vector<64x32xbf16>
    %cst_96 = arith.constant dense<0.000000e+00> : vector<8x32xf32>
    %125 = tpu.matmul %123, %124, %cst_96 {dimension_numbers = #tpu.dot_dimension_numbers<[1], [0], [0], [1], [0, 0, 1, 1], [], []>} : vector<8x64xbf16>, vector<64x32xbf16>, vector<8x32xf32> -> vector<8x32xf32>
    %126 = arith.addf %121, %125 : vector<8x32xf32>
    %127 = vector.extract_strided_slice %77 {offsets = [80, 0], sizes = [8, 64], strides = [1, 1]} : vector<128x64xf32> to vector<8x64xf32>
    %128 = arith.truncf %127 : vector<8x64xf32> to vector<8x64xbf16>
    %c640 = arith.constant 640 : index
    %c0_97 = arith.constant 0 : index
    %129 = vector.load %arg7[%c640, %c0_97] : memref<1024x32xbf16, #tpu.memory_space<vmem>>, vector<64x32xbf16>
    %cst_98 = arith.constant dense<0.000000e+00> : vector<8x32xf32>
    %130 = tpu.matmul %128, %129, %cst_98 {dimension_numbers = #tpu.dot_dimension_numbers<[1], [0], [0], [1], [0, 0, 1, 1], [], []>} : vector<8x64xbf16>, vector<64x32xbf16>, vector<8x32xf32> -> vector<8x32xf32>
    %131 = arith.addf %126, %130 : vector<8x32xf32>
    %132 = vector.extract_strided_slice %77 {offsets = [88, 0], sizes = [8, 64], strides = [1, 1]} : vector<128x64xf32> to vector<8x64xf32>
    %133 = arith.truncf %132 : vector<8x64xf32> to vector<8x64xbf16>
    %c704 = arith.constant 704 : index
    %c0_99 = arith.constant 0 : index
    %134 = vector.load %arg7[%c704, %c0_99] : memref<1024x32xbf16, #tpu.memory_space<vmem>>, vector<64x32xbf16>
    %cst_100 = arith.constant dense<0.000000e+00> : vector<8x32xf32>
    %135 = tpu.matmul %133, %134, %cst_100 {dimension_numbers = #tpu.dot_dimension_numbers<[1], [0], [0], [1], [0, 0, 1, 1], [], []>} : vector<8x64xbf16>, vector<64x32xbf16>, vector<8x32xf32> -> vector<8x32xf32>
    %136 = arith.addf %131, %135 : vector<8x32xf32>
    %137 = vector.extract_strided_slice %77 {offsets = [96, 0], sizes = [8, 64], strides = [1, 1]} : vector<128x64xf32> to vector<8x64xf32>
    %138 = arith.truncf %137 : vector<8x64xf32> to vector<8x64xbf16>
    %c768 = arith.constant 768 : index
    %c0_101 = arith.constant 0 : index
    %139 = vector.load %arg7[%c768, %c0_101] : memref<1024x32xbf16, #tpu.memory_space<vmem>>, vector<64x32xbf16>
    %cst_102 = arith.constant dense<0.000000e+00> : vector<8x32xf32>
    %140 = tpu.matmul %138, %139, %cst_102 {dimension_numbers = #tpu.dot_dimension_numbers<[1], [0], [0], [1], [0, 0, 1, 1], [], []>} : vector<8x64xbf16>, vector<64x32xbf16>, vector<8x32xf32> -> vector<8x32xf32>
    %141 = arith.addf %136, %140 : vector<8x32xf32>
    %142 = vector.extract_strided_slice %77 {offsets = [104, 0], sizes = [8, 64], strides = [1, 1]} : vector<128x64xf32> to vector<8x64xf32>
    %143 = arith.truncf %142 : vector<8x64xf32> to vector<8x64xbf16>
    %c832 = arith.constant 832 : index
    %c0_103 = arith.constant 0 : index
    %144 = vector.load %arg7[%c832, %c0_103] : memref<1024x32xbf16, #tpu.memory_space<vmem>>, vector<64x32xbf16>
    %cst_104 = arith.constant dense<0.000000e+00> : vector<8x32xf32>
    %145 = tpu.matmul %143, %144, %cst_104 {dimension_numbers = #tpu.dot_dimension_numbers<[1], [0], [0], [1], [0, 0, 1, 1], [], []>} : vector<8x64xbf16>, vector<64x32xbf16>, vector<8x32xf32> -> vector<8x32xf32>
    %146 = arith.addf %141, %145 : vector<8x32xf32>
    %147 = vector.extract_strided_slice %77 {offsets = [112, 0], sizes = [8, 64], strides = [1, 1]} : vector<128x64xf32> to vector<8x64xf32>
    %148 = arith.truncf %147 : vector<8x64xf32> to vector<8x64xbf16>
    %c896 = arith.constant 896 : index
    %c0_105 = arith.constant 0 : index
    %149 = vector.load %arg7[%c896, %c0_105] : memref<1024x32xbf16, #tpu.memory_space<vmem>>, vector<64x32xbf16>
    %cst_106 = arith.constant dense<0.000000e+00> : vector<8x32xf32>
    %150 = tpu.matmul %148, %149, %cst_106 {dimension_numbers = #tpu.dot_dimension_numbers<[1], [0], [0], [1], [0, 0, 1, 1], [], []>} : vector<8x64xbf16>, vector<64x32xbf16>, vector<8x32xf32> -> vector<8x32xf32>
    %151 = arith.addf %146, %150 : vector<8x32xf32>
    %152 = vector.extract_strided_slice %77 {offsets = [120, 0], sizes = [8, 64], strides = [1, 1]} : vector<128x64xf32> to vector<8x64xf32>
    %153 = arith.truncf %152 : vector<8x64xf32> to vector<8x64xbf16>
    %c960 = arith.constant 960 : index
    %c0_107 = arith.constant 0 : index
    %154 = vector.load %arg7[%c960, %c0_107] : memref<1024x32xbf16, #tpu.memory_space<vmem>>, vector<64x32xbf16>
    %cst_108 = arith.constant dense<0.000000e+00> : vector<8x32xf32>
    %155 = tpu.matmul %153, %154, %cst_108 {dimension_numbers = #tpu.dot_dimension_numbers<[1], [0], [0], [1], [0, 0, 1, 1], [], []>} : vector<8x64xbf16>, vector<64x32xbf16>, vector<8x32xf32> -> vector<8x32xf32>
    %156 = arith.addf %151, %155 : vector<8x32xf32>
    %c0_109 = arith.constant 0 : index
    %c0_110 = arith.constant 0 : index
    %157 = vector.load %arg8[%c0_109, %c0_110] : memref<1x32xf32, #tpu.memory_space<vmem>>, vector<1x32xf32>
    %158 = vector.broadcast %157 : vector<1x32xf32> to vector<8x32xf32>
    %159 = arith.addf %156, %158 : vector<8x32xf32>
    %cst_111 = arith.constant 0.000000e+00 : f32
    %160 = vector.broadcast %cst_111 : f32 to vector<8x32xf32>
    %161 = arith.maximumf %159, %160 : vector<8x32xf32>
    %c0_112 = arith.constant 0 : index
    %c0_113 = arith.constant 0 : index
    %162 = vector.load %arg9[%c0_112, %c0_113] : memref<8x32xf32, #tpu.memory_space<vmem>>, vector<8x32xf32>
    tpu.vector_store %arg9[%c0_112, %c0_113], %161 {strides = array<i32>} : memref<8x32xf32, #tpu.memory_space<vmem>>, vector<8x32xf32>,
    return
  }
}

</mosaic_0001>

<bundles_post_ra>
// kernel: _forward.1
= control target key start
LH: loop header
LB: loop body
LE: loop exit
PB: predicated region body
PF: predicated region fallthrough
CT: control target
= control target key end

     0   :  { %vm374_vm0 = vcmask 261120   ;;  %s7101_s0 = inlined_call_operand.vmem [shape: bf16[288,256], index: 0, kind: input, shape index: {}]   ;;  %s7102_s1 = inlined_call_operand.vmem [shape: bf16[64,288], index: 1, kind: input, shape index: {}]   ;;  %s7103_s2 = inlined_call_operand.vmem [shape: f32[64,1], index: 2, kind: input, shape index: {}]   ;;  %s7104_s3 = inlined_call_operand.vmem [shape: bf16[4,256,64], index: 3, kind: input, shape index: {}]   ;;  %s7105_s4 = inlined_call_operand.vmem [shape: bf16[9,64,64], index: 4, kind: input, shape index: {}]   ;;  %s7106_s5 = inlined_call_operand.vmem [shape: bf16[128,576], index: 5, kind: input, shape index: {}]   ;;  %s7107_s6 = inlined_call_operand.vmem [shape: f32[128,1], index: 6, kind: input, shape index: {}]   ;;  %s7108_s7 = inlined_call_operand.vmem [shape: bf16[1024,32], index: 7, kind: input, shape index: {}]   ;;  %s7109_s8 = inlined_call_operand.vmem [shape: f32[1,32], index: 8, kind: input, shape index: {}]   ;;  %s7110_s9 = inlined_call_operand.hbm [shape: f32[8,32], index: 9, kind: output, shape index: {}]  }
   0x1   :  { %v3919_v0 = vld [vmem:[%s7101_s0 + $0x70] sm:$0xf]  ;;  %v5220_v1 = vld [vmem:[%s7101_s0 + $0x74] sm:$0xf0]  ;;  %v3911_v9 = vld [vmem:[%s7101_s0 + $0x60] sm:$0xf] }
   0x2   :  { %v3999_v2 = vld [vmem:[%s7101_s0 + $0x110] sm:$0xf]  ;;  %v3920_v3 = vor.u32 %v5220_v1, %v3919_v0  ;;  %v5240_v4 = vld [vmem:[%s7101_s0 + $0x114] sm:$0xf0]  ;;  %v5218_v10 = vld [vmem:[%s7101_s0 + $0x64] sm:$0xf0] }
   0x3   :  { %v3983_v5 = vld [vmem:[%s7101_s0 + $0xf0] sm:$0xf]  ;;  %v5236_v6 = vld [vmem:[%s7101_s0 + $0xf4] sm:$0xf0]  ;;  %v4000_v7 = vor.u32 %v5240_v4, %v3999_v2  ;;  %v3991_v11 = vld [vmem:[%s7101_s0 + $0x100] sm:$0xf]  ;;  %v3912_v12 = vor.u32 %v5218_v10, %v3911_v9 }
   0x4   :  { %v3984_v8 = vor.u32 %v5236_v6, %v3983_v5  ;;  %387 = vmatpush.bf16.msra.mxu0 %v3920_v3  ;;  %v5238_v13 = vld [vmem:[%s7101_s0 + $0x104] sm:$0xf0]  ;;  %v3975_v14 = vld [vmem:[%s7101_s0 + $0xe0] sm:$0xf]  ;;  %v5219_v18 = vld [vmem:[%s7101_s0 + $0x74] sm:$0xf] }
   0x5   :  { %v5234_v15 = vld [vmem:[%s7101_s0 + $0xe4] sm:$0xf0]  ;;  %451 = vmatpush.bf16.msra.mxu2 %v4000_v7  ;;  %v3992_v16 = vor.u32 %v5238_v13, %v3991_v11  ;;  %v3921_v19 = vld [vmem:[%s7101_s0 + $0x78] sm:$0xf0]  ;;  %v5195_v22 = vld [vmem:[%s7102_s1 + $0x10] sm:$0xf0] }
   0x6   :  { %416 = vmatpush.bf16.msra.mxu1 %v3984_v8  ;;  %v3976_v17 = vor.u32 %v5234_v15, %v3975_v14  ;;  %v3823_v20 = vld [vmem:[%s7102_s1 + $0x8] sm:$0xf]  ;;  %v3924_v21 = vor.u32 %v5219_v18, %v3921_v19  ;;  %v3903_v23 = vld [vmem:[%s7101_s0 + $0x50] sm:$0xf]  ;;  %v5216_v24 = vld [vmem:[%s7101_s0 + $0x54] sm:$0xf0] }
   0x7   :  { %v3967_v25 = vld [vmem:[%s7101_s0 + $0xd0] sm:$0xf]  ;;  %v5232_v26 = vld [vmem:[%s7101_s0 + $0xd4] sm:$0xf0]  ;;  %v5625_v27 = vor.u32 %v5195_v22, %v3823_v20  ;;  %v3904_v28 = vor.u32 %v5216_v24, %v3903_v23  ;;  %v5217_v29 = vld [vmem:[%s7101_s0 + $0x64] sm:$0xf] }
   0x8   :  { %388 = vmatpush.bf16.msra.mxu0 %v3912_v12  ;;  %474 = vmatpush.bf16.msra.mxu3 %v3924_v21  ;;  %v3913_v30 = vld [vmem:[%s7101_s0 + $0x68] sm:$0xf0]  ;;  %v3968_v31 = vor.u32 %v5232_v26, %v3967_v25  ;;  %v3895_v33 = vld [vmem:[%s7101_s0 + $0x40] sm:$0xf]  ;;  %v5214_v34 = vld [vmem:[%s7101_s0 + $0x44] sm:$0xf0] }
   0x9   :  { %452 = vmatpush.bf16.msra.mxu2 %v3992_v16  ;;  %v3916_v32 = vor.u32 %v5217_v29, %v3913_v30  ;;  %v3959_v35 = vld [vmem:[%s7101_s0 + $0xc0] sm:$0xf]  ;;  %v5230_v36 = vld [vmem:[%s7101_s0 + $0xc4] sm:$0xf0]  ;;  %v5215_v37 = vld [vmem:[%s7101_s0 + $0x54] sm:$0xf]  ;;  %v3896_v39 = vor.u32 %v5214_v34, %v3895_v33 }
   0xa   :  { %417 = vmatpush.bf16.msra.mxu1 %v3976_v17  ;;  %v3905_v38 = vld [vmem:[%s7101_s0 + $0x58] sm:$0xf0]  ;;  %v3960_v40 = vor.u32 %v5230_v36, %v3959_v35  ;;  %v3887_v42 = vld [vmem:[%s7101_s0 + $0x30] sm:$0xf]  ;;  %v5212_v43 = vld [vmem:[%s7101_s0 + $0x34] sm:$0xf0] }
   0xb   :  { %v3908_v41 = vor.u32 %v5215_v37, %v3905_v38  ;;  %v3951_v44 = vld [vmem:[%s7101_s0 + $0xb0] sm:$0xf]  ;;  %v5228_v45 = vld [vmem:[%s7101_s0 + $0xb4] sm:$0xf0]  ;;  %v5213_v46 = vld [vmem:[%s7101_s0 + $0x44] sm:$0xf]  ;;  %v3888_v48 = vor.u32 %v5212_v43, %v3887_v42 }
   0xc   :  { %4005 = vmatmul.msk.bf16.vlgmr.msra.gmra.mxu2 %vm374_vm0, %v5625_v27  ;;  %389 = vmatpush.bf16.msra.mxu0 %v3904_v28  ;;  %v3897_v47 = vld [vmem:[%s7101_s0 + $0x48] sm:$0xf0]  ;;  %v3952_v49 = vor.u32 %v5228_v45, %v3951_v44  ;;  %v3879_v51 = vld [vmem:[%s7101_s0 + $0x20] sm:$0xf]  ;;  %v5210_v52 = vld [vmem:[%s7101_s0 + $0x24] sm:$0xf0] }
   0xd   :  { %475 = vmatpush.bf16.msra.mxu3 %v3916_v32  ;;  %v3900_v50 = vor.u32 %v5213_v46, %v3897_v47  ;;  %v3943_v53 = vld [vmem:[%s7101_s0 + $0xa0] sm:$0xf]  ;;  %v5226_v54 = vld [vmem:[%s7101_s0 + $0xa4] sm:$0xf0]  ;;  %v5211_v55 = vld [vmem:[%s7101_s0 + $0x34] sm:$0xf]  ;;  %v3880_v59 = vor.u32 %v5210_v52, %v3879_v51 }
   0xe   :  { %418 = vmatpush.bf16.msra.mxu1 %v3968_v31  ;;  %v3889_v56 = vld [vmem:[%s7101_s0 + $0x38] sm:$0xf0]  ;;  %v3835_v57 = vld [vmem:[%s7102_s1 + $0x20] sm:$0xf]  ;;  %v5198_v58 = vld [vmem:[%s7102_s1 + $0x28] sm:$0xf0]  ;;  %v3944_v63 = vor.u32 %v5226_v54, %v3943_v53 }
   0xf   :  { %v3871_v60 = vld [vmem:[%s7101_s0 + $0x10] sm:$0xf]  ;;  %v5208_v61 = vld [vmem:[%s7101_s0 + $0x14] sm:$0xf0]  ;;  %v3892_v0 = vor.u32 %v5211_v55, %v3889_v56  ;;  %v5209_v2 = vld [vmem:[%s7101_s0 + $0x24] sm:$0xf]  ;;  %v5728_v11 = vor.u32 %v5198_v58, %v3835_v57 }
  0x10   :  { %390 = vmatpush.bf16.msra.mxu0 %v3896_v39  ;;  %v3935_v62 = vld [vmem:[%s7101_s0 + $0x90] sm:$0xf]  ;;  %v5224_v1 = vld [vmem:[%s7101_s0 + $0x94] sm:$0xf0]  ;;  %v3881_v3 = vld [vmem:[%s7101_s0 + $0x28] sm:$0xf0]  ;;  %v3872_v12 = vor.u32 %v5208_v61, %v3871_v60 }
  0x11   :  { %476 = vmatpush.bf16.msra.mxu3 %v3908_v41  ;;  %v5235_v4 = vld [vmem:[%s7101_s0 + $0xf4] sm:$0xf]  ;;  %v3985_v5 = vld [vmem:[%s7101_s0 + $0xf8] sm:$0xf0]  ;;  %v86_v6 = vld [vmem:[%s7103_s2] sm:$0xff]  ;;  %v5513_v8 = vmov 0   ;;  %v3936_v13 = vor.u32 %v5224_v1, %v3935_v62  ;;  %v3884_v14 = vor.u32 %v5209_v2, %v3881_v3 }
  0x12   :  { %419 = vmatpush.bf16.msra.mxu1 %v3960_v40  ;;  %v3988_v7 = vor.u32 %v5235_v4, %v3985_v5  ;;  %5483 = vset.pattern.permute.xlu0 %v5513_v8  ;;  %v5233_v9 = vld [vmem:[%s7101_s0 + $0xe4] sm:$0xf]  ;;  %v3977_v10 = vld [vmem:[%s7101_s0 + $0xe8] sm:$0xf0]  ;;  %v3863_v15 = vld [vmem:[%s7101_s0] sm:$0xf] }
  0x13   :  { %5484 = vset.pattern.permute.xlu1 %v5513_v8  ;;  %96 = vperm.xlu0 %5483, %v86_v6   ;;  %v5206_v16 = vld [vmem:[%s7101_s0 + $0x4] sm:$0xf0]  ;;  %v3927_v17 = vld [vmem:[%s7101_s0 + $0x80] sm:$0xf]  ;;  %v5207_v19 = vld [vmem:[%s7101_s0 + $0x14] sm:$0xf]  ;;  %v3980_v21 = vor.u32 %v5233_v9, %v3977_v10 }
  0x14   :  { %391 = vmatpush.bf16.msra.mxu0 %v3888_v48  ;;  %v5222_v18 = vld [vmem:[%s7101_s0 + $0x84] sm:$0xf0]  ;;  %v3873_v20 = vld [vmem:[%s7101_s0 + $0x18] sm:$0xf0]  ;;  %503 = vmatpush.bf16.msrb.mxu2 %v3988_v7  ;;  %v3815_v22 = vld [vmem:[%s7102_s1] sm:$0xf]  ;;  %v3864_v25 = vor.u32 %v5206_v16, %v3863_v15 }
  0x15   :  { %477 = vmatpush.bf16.msra.mxu3 %v3900_v50  ;;  %5485 = vset.pattern.permute.xlu2 %v5513_v8  ;;  %v5231_v23 = vld [vmem:[%s7101_s0 + $0xd4] sm:$0xf]  ;;  %v3969_v24 = vld [vmem:[%s7101_s0 + $0xd8] sm:$0xf0]  ;;  %v5194_v26 = vld [vmem:[%s7102_s1 + $0x8] sm:$0xf0]  ;;  %v3928_v30 = vor.u32 %v5222_v18, %v3927_v17  ;;  %v3876_v31 = vor.u32 %v5207_v19, %v3873_v20 }
  0x16   :  { %420 = vmatpush.bf16.msra.mxu1 %v3952_v49  ;;  %v5193_v28 = vld [vmem:[%s7102_s1 + $0x4] sm:$0xf]  ;;  %v88_v29 = vld [vmem:[%s7103_s2 + $0x10] sm:$0xff]  ;;  %v87_v34 = vld [vmem:[%s7103_s2 + $0x8] sm:$0xff]  ;;  %v3972_v36 = vor.u32 %v5231_v23, %v3969_v24 }
  0x17   :  { %v3817_v32 = vld [vmem:[%s7102_s1 + $0xc] sm:$0xf0]  ;;  %v5205_v33 = vld [vmem:[%s7101_s0 + $0x4] sm:$0xf]  ;;  %v3865_v35 = vld [vmem:[%s7101_s0 + $0x8] sm:$0xf0]  ;;  %106 = vperm.xlu1 %5484, %v88_v29  }
  0x18   :  { %392 = vmatpush.bf16.msra.mxu0 %v3880_v59  ;;  %504 = vmatpush.bf16.msrb.mxu2 %v3980_v21 }
  0x19   :  { %478 = vmatpush.bf16.msra.mxu3 %v3892_v0 }
  0x1a   :  { %421 = vmatpush.bf16.msra.mxu1 %v3944_v63 }
  0x1c   :  { %4006 = vmatmul.msk.bf16.gmra.mxu2 %vm374_vm0, %v5728_v11  ;;  %393 = vmatpush.bf16.msra.mxu0 %v3872_v12 }
  0x1d   :  { %479 = vmatpush.bf16.msra.mxu3 %v3884_v14 }
  0x1e   :  { %422 = vmatpush.bf16.msra.mxu1 %v3936_v13 }
  0x1f   :  { %14 = vsyncpa [#allocation4], 0  ;;  %v3816_v37 = vor.u32 %v5194_v26, %v3815_v22  ;;  %v5229_v38 = vld [vmem:[%s7101_s0 + $0xc4] sm:$0xf]  ;;  %v3961_v39 = vld [vmem:[%s7101_s0 + $0xc8] sm:$0xf0]  ;;  %v5786_v40 = vor.u32 %v5193_v28, %v3817_v32  ;;  %101 = vperm.xlu0 %5483, %v87_v34   ;;  %v3868_v41 = vor.u32 %v5205_v33, %v3865_v35  ;;  %505 = vmatpush.bf16.msrb.mxu2 %v3972_v36 }
  0x20   :  { %394 = vmatpush.bf16.msra.mxu0 %v3864_v25  ;;  %v3964_v42 = vor.u32 %v5229_v38, %v3961_v39  ;;  %v5227_v43 = vld [vmem:[%s7101_s0 + $0xb4] sm:$0xf]  ;;  %v3953_v44 = vld [vmem:[%s7101_s0 + $0xb8] sm:$0xf0]  ;;  %v3847_v46 = vld [vmem:[%s7102_s1 + $0x38] sm:$0xf] }
  0x21   :  { %480 = vmatpush.bf16.msra.mxu3 %v3876_v31  ;;  %v89_v45 = vld [vmem:[%s7103_s2 + $0x18] sm:$0xff]  ;;  %v5201_v47 = vld [vmem:[%s7102_s1 + $0x40] sm:$0xf0]  ;;  %v92_v48 = vld [vmem:[%s7103_s2 + $0x30] sm:$0xff]  ;;  %v3956_v49 = vor.u32 %v5227_v43, %v3953_v44  ;;  %vm1392_vm1 = vcmask 523264   ;;  %vm1442_vm2 = vcmask 519168  }
  0x22   :  { %423 = vmatpush.bf16.msra.mxu1 %v3928_v30  ;;  %111 = vperm.xlu1 %5484, %v89_v45   ;;  %v5225_v50 = vld [vmem:[%s7101_s0 + $0xa4] sm:$0xf]  ;;  %v3945_v51 = vld [vmem:[%s7101_s0 + $0xa8] sm:$0xf0]  ;;  %v5813_v52 = vor.u32 %v5201_v47, %v3847_v46  ;;  %v5223_v54 = vld [vmem:[%s7101_s0 + $0x94] sm:$0xf] }
  0x23   :  { %395 = vmatmul.bf16.vlgmr.msra.gmra.mxu0 %v3816_v37  ;;  %506 = vmatpush.bf16.msrb.mxu2 %v3964_v42  ;;  %v3948_v53 = vor.u32 %v5225_v50, %v3945_v51  ;;  %v3937_v55 = vld [vmem:[%s7101_s0 + $0x98] sm:$0xf0]  ;;  %v3827_v56 = vld [vmem:[%s7102_s1 + $0x18] sm:$0xf]  ;;  %v5197_v57 = vld [vmem:[%s7102_s1 + $0x20] sm:$0xf0] }
  0x24   :  { %v93_v58 = vld [vmem:[%s7103_s2 + $0x38] sm:$0xff]  ;;  %v3829_v60 = vld [vmem:[%s7102_s1 + $0x24] sm:$0xf0]  ;;  %v2195_v61 = vld [vmem:[%s7107_s6] sm:$0xff]  ;;  %v3940_v62 = vor.u32 %v5223_v54, %v3937_v55  ;;  %v3828_v63 = vor.u32 %v5197_v57, %v3827_v56  ;;  %s5514_s23 = smov [#allocation3]   ;;  %s3804_s25 = sshll.u32 %s7110_s9, 4  ;;  %s3805_s25 = int_to_ptr.hbm [resolvable:$true] %s3804_s25 }
  0x25   :  { %424 = vmatmul.bf16.vlgmr.msra.gmra.mxu1 %v5786_v40  ;;  %481 = vmatpush.bf16.msra.mxu3 %v3868_v41  ;;  %v5196_v59 = vld [vmem:[%s7102_s1 + $0x1c] sm:$0xf]  ;;  %v5221_v0 = vld [vmem:[%s7101_s0 + $0x84] sm:$0xf]  ;;  %v3929_v1 = vld [vmem:[%s7101_s0 + $0x88] sm:$0xf0] }
  0x26   :  { %v3832_v2 = vor.u32 %v5196_v59, %v3829_v60  ;;  %v3932_v3 = vor.u32 %v5221_v0, %v3929_v1  ;;  %v3859_v4 = vld [vmem:[%s7102_s1 + $0x50] sm:$0xf]  ;;  %v5204_v5 = vld [vmem:[%s7102_s1 + $0x58] sm:$0xf0]  ;;  %v2199_v6 = vld [vmem:[%s7107_s6 + $0x20] sm:$0xff] }
  0x27   :  { %126 = vperm.xlu0 %5483, %v92_v48   ;;  %507 = vmatpush.bf16.msrb.mxu2 %v3956_v49  ;;  %v5856_v7 = vor.u32 %v5204_v5, %v3859_v4  ;;  %v2197_v8 = vld [vmem:[%s7107_s6 + $0x10] sm:$0xff]  ;;  %v4001_v10 = vld [vmem:[%s7101_s0 + $0x118] sm:$0xf0]  ;;  %v5237_v15 = vld [vmem:[%s7101_s0 + $0x104] sm:$0xf] }
  0x28   :  { %482 = vmatmul.bf16.vlgmr.msra.gmra.mxu3 %v3816_v37  ;;  %v5239_v9 = vld [vmem:[%s7101_s0 + $0x114] sm:$0xf]  ;;  %v3839_v12 = vld [vmem:[%s7102_s1 + $0x30] sm:$0xf]  ;;  %v5200_v14 = vld [vmem:[%s7102_s1 + $0x38] sm:$0xf0] }
  0x29   :  { %v4004_v13 = vor.u32 %v5239_v9, %v4001_v10  ;;  %v3993_v16 = vld [vmem:[%s7101_s0 + $0x108] sm:$0xf0]  ;;  %v5199_v17 = vld [vmem:[%s7102_s1 + $0x34] sm:$0xf]  ;;  %v3841_v18 = vld [vmem:[%s7102_s1 + $0x3c] sm:$0xf0]  ;;  %v3840_v22 = vor.u32 %v5200_v14, %v3839_v12 }
  0x2a   :  { %131 = vperm.xlu1 %5484, %v93_v58   ;;  %v2202_v19 = vld [vmem:[%s7107_s6 + $0x38] sm:$0xff]  ;;  %v3996_v20 = vor.u32 %v5237_v15, %v3993_v16  ;;  %v2200_v21 = vld [vmem:[%s7107_s6 + $0x28] sm:$0xff]  ;;  %v3844_v23 = vor.u32 %v5199_v17, %v3841_v18  ;;  %v90_v24 = vld [vmem:[%s7103_s2 + $0x20] sm:$0xff] }
  0x2b   :  { %508 = vmatpush.bf16.msrb.mxu2 %v3948_v53  ;;  %538 = vmatpush.bf16.msrb.mxu0 %v4004_v13  ;;  %v2205_v25 = vld [vmem:[%s7107_s6 + $0x50] sm:$0xff]  ;;  %v2203_v26 = vld [vmem:[%s7107_s6 + $0x40] sm:$0xff]  ;;  %v3851_v28 = vld [vmem:[%s7102_s1 + $0x48] sm:$0xf] }
  0x2c   :  { %4007 = vmatmul.msk.bf16.gmra.mxu2 %vm374_vm0, %v5813_v52  ;;  %116 = vperm.xlu2 %5485, %v90_v24   ;;  %v5203_v29 = vld [vmem:[%s7102_s1 + $0x50] sm:$0xf0]  ;;  %v91_v30 = vld [vmem:[%s7103_s2 + $0x28] sm:$0xff]  ;;  %v3853_v32 = vld [vmem:[%s7102_s1 + $0x54] sm:$0xf0]  ;;  %s3802_s2 = sshll.u32 %s5514_s23, 4  ;;  %s3803_s2 = int_to_ptr.vmem [resolvable:$true] %s3802_s2 }
  0x2d   :  { %v5202_v31 = vld [vmem:[%s7102_s1 + $0x4c] sm:$0xf]  ;;  %v2206_v34 = vld [vmem:[%s7107_s6 + $0x58] sm:$0xff]  ;;  %v3852_v35 = vor.u32 %v5203_v29, %v3851_v28  ;;  %v2209_v38 = vld [vmem:[%s7107_s6 + $0x70] sm:$0xff] }
  0x2e   :  { %v2208_v33 = vld [vmem:[%s7107_s6 + $0x68] sm:$0xff]  ;;  %v3856_v36 = vor.u32 %v5202_v31, %v3853_v32  ;;  %v2198_v39 = vld [vmem:[%s7107_s6 + $0x18] sm:$0xff]  ;;  %v5247_v43 = vld [vmem:[%s7104_s3 + $0x30] sm:$0xff] }
  0x2f   :  { %2213 = vperm.xlu0 %5483, %v2195_v61   ;;  %509 = vmatpush.bf16.msrb.mxu2 %v3940_v62  ;;  %v2196_v37 = vld [vmem:[%s7107_s6 + $0x8] sm:$0xff]  ;;  %v5248_v42 = vld [vmem:[%s7104_s3 + $0x38] sm:$0xff]  ;;  %v5263_v44 = vld [vmem:[%s7104_s3 + $0xb0] sm:$0xff] }
  0x30   :  { %539 = vmatpush.bf16.msrb.mxu0 %v3996_v20  ;;  %v2204_v41 = vld [vmem:[%s7107_s6 + $0x48] sm:$0xff]  ;;  %713 = vmatpush.bf16.msrb.mxu1 %v5248_v42  ;;  %v5245_v47 = vld [vmem:[%s7104_s3 + $0x20] sm:$0xff]  ;;  %v2210_v49 = vld [vmem:[%s7107_s6 + $0x78] sm:$0xff] }
  0x31   :  { %v5246_v45 = vld [vmem:[%s7104_s3 + $0x28] sm:$0xff]  ;;  %v5261_v48 = vld [vmem:[%s7104_s3 + $0xa0] sm:$0xff]  ;;  %v5244_v50 = vld [vmem:[%s7104_s3 + $0x18] sm:$0xff] }
  0x32   :  { %2223 = vperm.xlu1 %5484, %v2197_v8   ;;  %v5262_v46 = vld [vmem:[%s7104_s3 + $0xa8] sm:$0xff]  ;;  %v5260_v51 = vld [vmem:[%s7104_s3 + $0x98] sm:$0xff]  ;;  %v5243_v53 = vld [vmem:[%s7104_s3 + $0x10] sm:$0xff] }
  0x33   :  { %400 = vmatmul.bf16.gmra.mxu0 %v3828_v63  ;;  %510 = vmatpush.bf16.msrb.mxu2 %v3932_v3  ;;  %v5259_v54 = vld [vmem:[%s7104_s3 + $0x90] sm:$0xff]  ;;  %v5258_v55 = vld [vmem:[%s7104_s3 + $0x88] sm:$0xff]  ;;  %v5241_v57 = vld [vmem:[%s7104_s3] sm:$0xff] }
  0x34   :  { %121 = vperm.xlu2 %5485, %v91_v30   ;;  %714 = vmatpush.bf16.msrb.mxu1 %v5247_v43  ;;  %v5257_v58 = vld [vmem:[%s7104_s3 + $0x80] sm:$0xff]  ;;  %v5256_v15 = vld [vmem:[%s7104_s3 + $0x78] sm:$0xff]  ;;  %v5254_v29 = vld [vmem:[%s7104_s3 + $0x68] sm:$0xff] }
  0x35   :  { %429 = vmatmul.bf16.gmra.mxu1 %v3832_v2  ;;  %v5272_v16 = vld [vmem:[%s7104_s3 + $0xf8] sm:$0xff]  ;;  %742 = vmatpush.bf16.msrb.mxu3 %v5256_v15  ;;  %v5270_v30 = vld [vmem:[%s7104_s3 + $0xe8] sm:$0xff]  ;;  %v5279_v31 = vld [vmem:[%s7104_s3 + $0x130] sm:$0xff] }
  0x36   :  { %929 = vmatpush.bf16.msra.mxu0 %v5272_v16  ;;  %v5296_v24 = vld [vmem:[%s7104_s3 + $0x1b8] sm:$0xff]  ;;  %v5294_v42 = vld [vmem:[%s7104_s3 + $0x1a8] sm:$0xff] }
  0x37   :  { %2233 = vperm.xlu0 %5483, %v2199_v6  }
  0x38   :  { %487 = vmatmul.bf16.gmra.mxu3 %v3828_v63  ;;  %715 = vmatpush.bf16.msrb.mxu1 %v5246_v45  ;;  %v5252_v45 = vld [vmem:[%s7104_s3 + $0x58] sm:$0xff] }
  0x3a   :  { %2238 = vperm.xlu1 %5484, %v2200_v21   ;;  %v5255_v21 = vld [vmem:[%s7104_s3 + $0x70] sm:$0xff] }
  0x3b   :  { %743 = vmatpush.bf16.msrb.mxu3 %v5255_v21 }
  0x3c   :  { %4008 = vmatmul.msk.bf16.gmra.mxu2 %vm374_vm0, %v5856_v7  ;;  %2218 = vperm.xlu2 %5485, %v2196_v37  }
  0x3d   :  { %716 = vmatpush.bf16.msrb.mxu1 %v5245_v47  ;;  %v5277_v47 = vld [vmem:[%s7104_s3 + $0x120] sm:$0xff] }
  0x3f   :  { %2248 = vperm.xlu0 %5483, %v2202_v19   ;;  %744 = vmatpush.bf16.msrb.mxu3 %v5254_v29 }
  0x41   :  { %717 = vmatpush.bf16.msrb.mxu1 %v5244_v50 }
  0x42   :  { %2253 = vperm.xlu1 %5484, %v2203_v26  }
  0x43   :  { %405 = vmatmul.bf16.gmra.mxu0 %v3840_v22 }
  0x44   :  { %2228 = vperm.xlu2 %5485, %v2198_v39   ;;  %v5269_v39 = vld [vmem:[%s7104_s3 + $0xe0] sm:$0xff] }
  0x45   :  { %434 = vmatmul.bf16.gmra.mxu1 %v3844_v23 }
  0x46   :  { %718 = vmatpush.bf16.msrb.mxu1 %v5243_v53 }
  0x47   :  { %2263 = vperm.xlu0 %5483, %v2205_v25  }
  0x48   :  { %492 = vmatmul.bf16.gmra.mxu3 %v3840_v22  ;;  %v5271_v22 = vld [vmem:[%s7104_s3 + $0xf0] sm:$0xff] }
  0x49   :  { %930 = vmatpush.bf16.msra.mxu0 %v5271_v22 }
  0x4a   :  { %2268 = vperm.xlu1 %5484, %v2206_v34  }
  0x4c   :  { %511 = vmatmul.bf16.vlgmr.msrb.gmra.mxu2 %v5786_v40  ;;  %v2201_v40 = vld [vmem:[%s7107_s6 + $0x30] sm:$0xff] }
  0x4d   :  { %2243 = vperm.xlu2 %5485, %v2201_v40   ;;  %931 = vmatpush.bf16.msra.mxu0 %v5270_v30  ;;  %v5278_v40 = vld [vmem:[%s7104_s3 + $0x128] sm:$0xff] }
  0x4f   :  { %2278 = vperm.xlu0 %5483, %v2208_v33   ;;  %v5295_v33 = vld [vmem:[%s7104_s3 + $0x1b0] sm:$0xff] }
  0x51   :  { %932 = vmatpush.bf16.msra.mxu0 %v5269_v39 }
  0x52   :  { %2283 = vperm.xlu1 %5484, %v2209_v38   ;;  %v5253_v38 = vld [vmem:[%s7104_s3 + $0x60] sm:$0xff] }
  0x53   :  { %410 = vmatmul.bf16.gmra.mxu0 %v3852_v35  ;;  %745 = vmatpush.bf16.msrb.mxu3 %v5253_v38 }
  0x55   :  { %439 = vmatmul.bf16.gmra.mxu1 %v3856_v36  ;;  %2258 = vperm.xlu2 %5485, %v2204_v41  }
  0x57   :  { %746 = vmatpush.bf16.msrb.mxu3 %v5252_v45 }
  0x58   :  { %497 = vmatmul.bf16.gmra.mxu3 %v3852_v35 }
  0x5c   :  { %516 = vmatmul.bf16.gmra.mxu2 %v3832_v2 }
  0x63   :  { %4009 = vmatmul.msk.bf16.vlgmr.msrb.gmra.mxu0 %vm374_vm0, %v5625_v27  ;;  %v5264_v27 = vld [vmem:[%s7104_s3 + $0xb8] sm:$0xff] }
  0x64   :  { %900 = vmatpush.bf16.msra.mxu2 %v5264_v27 }
  0x68   :  { %901 = vmatpush.bf16.msra.mxu2 %v5263_v44 }
  0x6c   :  { %521 = vmatmul.bf16.gmra.mxu2 %v3844_v23  ;;  %v5280_v23 = vld [vmem:[%s7104_s3 + $0x138] sm:$0xff] }
  0x6d   :  { %902 = vmatpush.bf16.msra.mxu2 %v5262_v46  ;;  %v5268_v46 = vld [vmem:[%s7104_s3 + $0xd8] sm:$0xff] }
  0x6e   :  { %933 = vmatpush.bf16.msra.mxu0 %v5268_v46 }
  0x71   :  { %903 = vmatpush.bf16.msra.mxu2 %v5261_v48 }
  0x73   :  { %4010 = vmatmul.msk.bf16.gmra.mxu0 %vm374_vm0, %v5728_v11  ;;  %v2207_v11 = vld [vmem:[%s7107_s6 + $0x60] sm:$0xff] }
  0x74   :  { %2273 = vperm.xlu2 %5485, %v2207_v11  }
  0x75   :  { %904 = vmatpush.bf16.msra.mxu2 %v5260_v51 }
  0x79   :  { %905 = vmatpush.bf16.msra.mxu2 %v5259_v54  ;;  %v5251_v54 = vld [vmem:[%s7104_s3 + $0x50] sm:$0xff] }
  0x7a   :  { %747 = vmatpush.bf16.msrb.mxu3 %v5251_v54 }
  0x7c   :  { %526 = vmatmul.bf16.gmra.mxu2 %v3856_v36  ;;  %2288 = vperm.xlu2 %5485, %v2210_v49   ;;  %v5293_v49 = vld [vmem:[%s7104_s3 + $0x1a0] sm:$0xff] }
  0x7d   :  { %906 = vmatpush.bf16.msra.mxu2 %v5258_v55  ;;  %v5276_v55 = vld [vmem:[%s7104_s3 + $0x118] sm:$0xff] }
  0x81   :  { %907 = vmatpush.bf16.msra.mxu2 %v5257_v58 }
  0x83   :  { %4011 = vmatmul.msk.bf16.gmra.mxu0 %vm374_vm0, %v5813_v52  ;;  %v5242_v52 = vld [vmem:[%s7104_s3 + $0x8] sm:$0xff] }
  0x84   :  { %719 = vmatpush.bf16.msrb.mxu1 %v5242_v52  ;;  %v5267_v52 = vld [vmem:[%s7104_s3 + $0xd0] sm:$0xff] }
  0x85   :  { %v6001_v60 = vpop.permute.xlu0 %96  ;;  %1274 = vmatpush.bf16.msrb.mxu2 %v5296_v24  ;;  %934 = vmatpush.bf16.msra.mxu0 %v5267_v52 }
  0x86   :  { %v6060_v41 = vpop.permute.xlu2 %116 }
  0x88   :  { %720 = vmatpush.bf16.msrb.mxu1 %v5241_v57 }
  0x89   :  { %v6007_v10 = vpop.permute.xlu1 %106  ;;  %1275 = vmatpush.bf16.msrb.mxu2 %v5295_v33 }
  0x8c   :  { %1087 = vmatpush.bf16.msra.mxu1 %v5280_v23 }
  0x8d   :  { %1276 = vmatpush.bf16.msrb.mxu2 %v5294_v42 }
  0x8e   :  { %v6096_v57 = vpop.permute.xlu2 %121 }
  0x8f   :  { %v454_v56 = vpop.f32.mrf.mxu2 }
  0x90   :  { %1088 = vmatpush.bf16.msra.mxu1 %v5279_v31 }
  0x91   :  { %v6004_v1 = vpop.permute.xlu0 %101  ;;  %1277 = vmatpush.bf16.msrb.mxu2 %v5293_v49 }
  0x93   :  { %4012 = vmatmul.msk.bf16.gmra.mxu0 %vm374_vm0, %v5856_v7 }
  0x94   :  { %v6034_v25 = vpop.permute.xlu1 %111  ;;  %1089 = vmatpush.bf16.msra.mxu1 %v5278_v40 }
  0x97   :  { %v456_v59 = vpop.f32.mrf.mxu2 }
  0x98   :  { %1090 = vmatpush.bf16.msra.mxu1 %v5277_v47 }
  0x99   :  { %v6133_v24 = vpop.permute.xlu0 %126 }
  0x9c   :  { %1091 = vmatpush.bf16.msra.mxu1 %v5276_v55  ;;  %v6138_v29 = vpop.permute.xlu1 %131 }
  0x9f   :  { %v459_v61 = vpop.f32.mrf.mxu2 }
  0xa0   :  { %v396_v62 = vpop.f32.mrf.mxu0 }
  0xa1   :  { %v397_v0 = vadd.f32 %v396_v62, %v6001_v60  ;;  %v5266_v62 = vld [vmem:[%s7104_s3 + $0xc8] sm:$0xff] }
  0xa2   :  { %v425_v63 = vpop.f32.mrf.mxu1  ;;  %935 = vmatpush.bf16.msra.mxu0 %v5266_v62  ;;  %v5303_v62 = vld [vmem:[%s7104_s3 + $0x1f0] sm:$0xff] }
  0xa3   :  { %v426_v2 = vadd.f32 %v425_v63, %v397_v0  ;;  %v5275_v63 = vld [vmem:[%s7104_s3 + $0x110] sm:$0xff] }
  0xa4   :  { %1092 = vmatpush.bf16.msra.mxu1 %v5275_v63 }
  0xa5   :  { %v455_v8 = vadd.f32 %v454_v56, %v426_v2  ;;  %v5292_v56 = vld [vmem:[%s7104_s3 + $0x198] sm:$0xff]  ;;  %v5291_v2 = vld [vmem:[%s7104_s3 + $0x190] sm:$0xff] }
  0xa6   :  { %1278 = vmatpush.bf16.msrb.mxu2 %v5292_v56  ;;  %v5304_v56 = vld [vmem:[%s7104_s3 + $0x1f8] sm:$0xff] }
  0xa7   :  { %v461_v3 = vpop.f32.mrf.mxu2  ;;  %v561_v12 = vmax.f32 %v455_v8, 0.0  ;;  %v5249_v8 = vld [vmem:[%s7104_s3 + $0x40] sm:$0xff] }
  0xa8   :  { %v398_v4 = vpop.f32.mrf.mxu0 }
  0xa9   :  { %v399_v5 = vadd.f32 %v398_v4, %v6004_v1 }
  0xaa   :  { %v427_v6 = vpop.f32.mrf.mxu1  ;;  %1279 = vmatpush.bf16.msrb.mxu2 %v5291_v2 }
  0xab   :  { %v428_v9 = vadd.f32 %v427_v6, %v399_v5 }
  0xad   :  { %v457_v7 = vadd.f32 %v456_v59, %v428_v9  ;;  %v5265_v9 = vld [vmem:[%s7104_s3 + $0xc0] sm:$0xff] }
  0xae   :  { %936 = vmatpush.bf16.msra.mxu0 %v5265_v9  ;;  %v5285_v9 = vld [vmem:[%s7104_s3 + $0x160] sm:$0xff] }
  0xaf   :  { %v563_v13 = vmax.f32 %v457_v7, 0.0  ;;  %v6009_v14 = vpop.f32.mrf.mxu2  ;;  %v5274_v7 = vld [vmem:[%s7104_s3 + $0x108] sm:$0xff] }
  0xb0   :  { %v401_v17 = vpop.f32.mrf.mxu0  ;;  %1093 = vmatpush.bf16.msra.mxu1 %v5274_v7  ;;  %v5301_v7 = vld [vmem:[%s7104_s3 + $0x1e0] sm:$0xff] }
  0xb1   :  { %v6017_v18 = vpack.c.bf16 %v563_v13, %v561_v12  ;;  %v402_v20 = vadd.f32 %v401_v17, %v6007_v10  ;;  %v5290_v12 = vld [vmem:[%s7104_s3 + $0x188] sm:$0xff]  ;;  %v483_v13 = vpop.f32.mrf.mxu3 }
  0xb2   :  { %v430_v19 = vpop.f32.mrf.mxu1  ;;  %1280 = vmatpush.bf16.msrb.mxu2 %v5290_v12  ;;  %v484_v38 = vadd.f32 %v483_v13, %v6001_v60  ;;  %1303 = vmatpush.bf16.msrb.mxu0 %v5304_v56 }
  0xb3   :  { %721 = vmatmul.bf16.vlgmr.msrb.gmra.mxu1 %v6017_v18  ;;  %908 = vmatmul.bf16.vlgmr.msra.gmra.mxu2 %v6017_v18  ;;  %v431_v26 = vadd.f32 %v430_v19, %v402_v20  ;;  %v5273_v19 = vld [vmem:[%s7104_s3 + $0x100] sm:$0xff] }
  0xb4   :  { %v5289_v20 = vld [vmem:[%s7104_s3 + $0x180] sm:$0xff]  ;;  %1094 = vmatpush.bf16.msra.mxu1 %v5273_v19 }
  0xb5   :  { %v460_v36 = vadd.f32 %v459_v61, %v431_v26  ;;  %v5250_v61 = vld [vmem:[%s7104_s3 + $0x48] sm:$0xff] }
  0xb6   :  { %748 = vmatpush.bf16.msrb.mxu3 %v5250_v61  ;;  %1281 = vmatpush.bf16.msrb.mxu2 %v5289_v20 }
  0xb7   :  { %v6036_v28 = vpop.f32.mrf.mxu2  ;;  %v565_v43 = vmax.f32 %v460_v36, 0.0  ;;  %1304 = vmatpush.bf16.msrb.mxu0 %v5303_v62 }
  0xb8   :  { %v403_v32 = vpop.f32.mrf.mxu0 }
  0xb9   :  { %v404_v34 = vadd.f32 %v403_v32, %v6034_v25 }
  0xba   :  { %v432_v35 = vpop.f32.mrf.mxu1  ;;  %749 = vmatpush.bf16.msrb.mxu3 %v5249_v8 }
  0xbb   :  { %v433_v37 = vadd.f32 %v432_v35, %v404_v34 }
  0xbd   :  { %v462_v27 = vadd.f32 %v461_v3, %v433_v37 }
  0xbf   :  { %v567_v44 = vmax.f32 %v462_v27, 0.0  ;;  %v6065_v11 = vpop.f32.mrf.mxu2 }
  0xc0   :  { %v406_v48 = vpop.f32.mrf.mxu0 }
  0xc1   :  { %v6079_v50 = vpack.c.bf16 %v567_v44, %v565_v43  ;;  %v407_v53 = vadd.f32 %v406_v48, %v6060_v41 }
  0xc2   :  { %v435_v51 = vpop.f32.mrf.mxu1 }
  0xc3   :  { %726 = vmatmul.bf16.gmra.mxu1 %v6079_v50  ;;  %913 = vmatmul.bf16.gmra.mxu2 %v6079_v50  ;;  %v436_v58 = vadd.f32 %v435_v51, %v407_v53 }
  0xc5   :  { %v465_v5 = vadd.f32 %v6009_v14, %v436_v58 }
  0xc7   :  { %v471_v59 = vpop.f32.mrf.mxu2  ;;  %v569_v15 = vmax.f32 %v465_v5, 0.0 }
  0xc8   :  { %v408_v0 = vpop.f32.mrf.mxu0 }
  0xc9   :  { %v409_v3 = vadd.f32 %v408_v0, %v6096_v57 }
  0xca   :  { %v437_v4 = vpop.f32.mrf.mxu1 }
  0xcb   :  { %v438_v6 = vadd.f32 %v437_v4, %v409_v3 }
  0xcd   :  { %v467_v14 = vadd.f32 %v6036_v28, %v438_v6  ;;  %v485_v28 = vpop.f32.mrf.mxu3 }
  0xce   :  { %v486_v45 = vadd.f32 %v485_v28, %v6004_v1  ;;  %v5288_v1 = vld [vmem:[%s7104_s3 + $0x178] sm:$0xff] }
  0xcf   :  { %v571_v16 = vmax.f32 %v467_v14, 0.0  ;;  %v512_v17 = vpop.f32.mrf.mxu2  ;;  %1116 = vmatpush.bf16.msra.mxu3 %v5288_v1 }
  0xd0   :  { %v411_v21 = vpop.f32.mrf.mxu0  ;;  %v513_v46 = vadd.f32 %v512_v17, %v484_v38 }
  0xd1   :  { %v6131_v22 = vpack.c.bf16 %v571_v16, %v569_v15  ;;  %v412_v26 = vadd.f32 %v411_v21, %v6133_v24  ;;  %v5284_v15 = vld [vmem:[%s7104_s3 + $0x158] sm:$0xff] }
  0xd2   :  { %v440_v23 = vpop.f32.mrf.mxu1  ;;  %v5300_v16 = vld [vmem:[%s7104_s3 + $0x1d8] sm:$0xff] }
  0xd3   :  { %731 = vmatmul.bf16.gmra.mxu1 %v6131_v22  ;;  %918 = vmatmul.bf16.gmra.mxu2 %v6131_v22  ;;  %v441_v30 = vadd.f32 %v440_v23, %v412_v26  ;;  %v5299_v23 = vld [vmem:[%s7104_s3 + $0x1d0] sm:$0xff]  ;;  %v5282_v26 = vld [vmem:[%s7104_s3 + $0x148] sm:$0xff] }
  0xd5   :  { %v470_v35 = vadd.f32 %v6065_v11, %v441_v30  ;;  %v488_v27 = vpop.f32.mrf.mxu3 }
  0xd6   :  { %v489_v55 = vadd.f32 %v488_v27, %v6007_v10  ;;  %v5287_v10 = vld [vmem:[%s7104_s3 + $0x170] sm:$0xff] }
  0xd7   :  { %v514_v31 = vpop.f32.mrf.mxu2  ;;  %v573_v39 = vmax.f32 %v470_v35, 0.0  ;;  %1117 = vmatpush.bf16.msra.mxu3 %v5287_v10 }
  0xd8   :  { %v413_v32 = vpop.f32.mrf.mxu0  ;;  %v515_v47 = vadd.f32 %v514_v31, %v486_v45 }
  0xd9   :  { %v414_v33 = vadd.f32 %v413_v32, %v6138_v29  ;;  %v5281_v32 = vld [vmem:[%s7104_s3 + $0x140] sm:$0xff] }
  0xda   :  { %v442_v34 = vpop.f32.mrf.mxu1 }
  0xdb   :  { %v443_v36 = vadd.f32 %v442_v34, %v414_v33  ;;  %v5297_v33 = vld [vmem:[%s7104_s3 + $0x1c0] sm:$0xff] }
  0xdd   :  { %v472_v37 = vadd.f32 %v471_v59, %v443_v36  ;;  %v490_v51 = vpop.f32.mrf.mxu3 }
  0xde   :  { %v491_v59 = vadd.f32 %v490_v51, %v6034_v25  ;;  %v5286_v25 = vld [vmem:[%s7104_s3 + $0x168] sm:$0xff] }
  0xdf   :  { %v575_v40 = vmax.f32 %v472_v37, 0.0  ;;  %v517_v44 = vpop.f32.mrf.mxu2  ;;  %1118 = vmatpush.bf16.msra.mxu3 %v5286_v25 }
  0xe0   :  { %v541_v42 = vpop.f32.mrf.mxu0  ;;  %v518_v61 = vadd.f32 %v517_v44, %v489_v55 }
  0xe1   :  { %v6143_v43 = vpack.c.bf16 %v575_v40, %v573_v39  ;;  %v542_v11 = vadd.f32 %v541_v42, %v513_v46 }
  0xe3   :  { %736 = vmatmul.bf16.gmra.mxu1 %v6143_v43  ;;  %923 = vmatmul.bf16.gmra.mxu2 %v6143_v43  ;;  %v562_v60 = vmax.f32 %v542_v11, 0.0 }
  0xe4   :  { %1119 = vmatpush.bf16.msra.mxu3 %v5285_v9 }
  0xe5   :  { %v493_v63 = vpop.f32.mrf.mxu3 }
  0xe6   :  { %v494_v13 = vadd.f32 %v493_v63, %v6060_v41  ;;  %v5283_v41 = vld [vmem:[%s7104_s3 + $0x150] sm:$0xff] }
  0xe7   :  { %v519_v54 = vpop.f32.mrf.mxu2 }
  0xe8   :  { %v543_v48 = vpop.f32.mrf.mxu0  ;;  %v520_v2 = vadd.f32 %v519_v54, %v491_v59  ;;  %1120 = vmatpush.bf16.msra.mxu3 %v5284_v15 }
  0xe9   :  { %v544_v49 = vadd.f32 %v543_v48, %v515_v47 }
  0xeb   :  { %v564_v53 = vmax.f32 %v544_v49, 0.0 }
  0xec   :  { %1121 = vmatpush.bf16.msra.mxu3 %v5283_v41  ;;  %v5320_v41 = vld [vmem:[%s7105_s4 + $0x78] sm:$0xff] }
  0xed   :  { %v6148_v52 = vpack.c.bf16 %v564_v53, %v562_v60  ;;  %v495_v14 = vpop.f32.mrf.mxu3 }
  0xee   :  { %v496_v20 = vadd.f32 %v495_v14, %v6096_v57  ;;  %v5298_v57 = vld [vmem:[%s7104_s3 + $0x1c8] sm:$0xff] }
  0xef   :  { %750 = vmatmul.bf16.vlgmr.msrb.gmra.mxu3 %v6148_v52  ;;  %937 = vmatmul.bf16.vlgmr.msra.gmra.mxu0 %v6148_v52  ;;  %v522_v0 = vpop.f32.mrf.mxu2 }
  0xf0   :  { %v546_v58 = vpop.f32.mrf.mxu0  ;;  %v523_v21 = vadd.f32 %v522_v0, %v494_v13  ;;  %1122 = vmatpush.bf16.msra.mxu3 %v5282_v26  ;;  %v5307_v26 = vld [vmem:[%s7105_s4 + $0x10] sm:$0xff] }
  0xf1   :  { %v547_v3 = vadd.f32 %v546_v58, %v518_v61 }
  0xf3   :  { %1095 = vmatmul.bf16.vlgmr.msra.gmra.mxu1 %v6017_v18  ;;  %1282 = vmatmul.bf16.vlgmr.msrb.gmra.mxu2 %v6017_v18  ;;  %v5302_v18 = vld [vmem:[%s7104_s3 + $0x1e8] sm:$0xff]  ;;  %v566_v6 = vmax.f32 %v547_v3, 0.0 }
  0xf4   :  { %1305 = vmatpush.bf16.msrb.mxu0 %v5302_v18  ;;  %1123 = vmatpush.bf16.msra.mxu3 %v5281_v32 }
  0xf5   :  { %v498_v34 = vpop.f32.mrf.mxu3 }
  0xf6   :  { %v499_v42 = vadd.f32 %v498_v34, %v6133_v24  ;;  %v5310_v34 = vld [vmem:[%s7105_s4 + $0x28] sm:$0xff] }
  0xf7   :  { %v524_v17 = vpop.f32.mrf.mxu2 }
  0xf8   :  { %v548_v4 = vpop.f32.mrf.mxu0  ;;  %1306 = vmatpush.bf16.msrb.mxu0 %v5301_v7  ;;  %v525_v28 = vadd.f32 %v524_v17, %v496_v20  ;;  %v5308_v17 = vld [vmem:[%s7105_s4 + $0x18] sm:$0xff] }
  0xf9   :  { %v549_v5 = vadd.f32 %v548_v4, %v520_v2  ;;  %v5316_v20 = vld [vmem:[%s7105_s4 + $0x58] sm:$0xff]  ;;  %1409 = vmatpush.bf16.msrb.mxu1 %v5308_v17 }
  0xfa   :  { %1566 = vmatpush.bf16.msra.mxu2 %v5316_v20 }
  0xfb   :  { %v568_v8 = vmax.f32 %v549_v5, 0.0 }
  0xfc   :  { %1307 = vmatpush.bf16.msrb.mxu0 %v5300_v16 }
  0xfd   :  { %v580_v12 = vpack.c.bf16 %v568_v8, %v566_v6  ;;  %v500_v40 = vpop.f32.mrf.mxu3  ;;  %1410 = vmatpush.bf16.msrb.mxu1 %v5307_v26 }
  0xfe   :  { %v501_v44 = vadd.f32 %v500_v40, %v6138_v29  ;;  %v5309_v40 = vld [vmem:[%s7105_s4 + $0x20] sm:$0xff] }
  0xff   :  { %755 = vmatmul.bf16.gmra.mxu3 %v580_v12  ;;  %942 = vmatmul.bf16.gmra.mxu0 %v580_v12  ;;  %v527_v35 = vpop.f32.mrf.mxu2 }
 0x100   :  { %v551_v19 = vpop.f32.mrf.mxu0  ;;  %1308 = vmatpush.bf16.msrb.mxu0 %v5299_v23  ;;  %v528_v45 = vadd.f32 %v527_v35, %v499_v42  ;;  %v5314_v35 = vld [vmem:[%s7105_s4 + $0x48] sm:$0xff]  ;;  %v5313_v42 = vld [vmem:[%s7105_s4 + $0x40] sm:$0xff] }
 0x103   :  { %1100 = vmatmul.bf16.gmra.mxu1 %v6079_v50  ;;  %1287 = vmatmul.bf16.gmra.mxu2 %v6079_v50  ;;  %v552_v50 = vadd.f32 %v551_v19, %v523_v21  ;;  %v5312_v19 = vld [vmem:[%s7105_s4 + $0x38] sm:$0xff] }
 0x104   :  { %1309 = vmatpush.bf16.msrb.mxu0 %v5298_v57  ;;  %1488 = vmatpush.bf16.msrb.mxu3 %v5312_v19  ;;  %v5311_v57 = vld [vmem:[%s7105_s4 + $0x30] sm:$0xff] }
 0x105   :  { %v570_v36 = vmax.f32 %v552_v50, 0.0  ;;  %v5319_v50 = vld [vmem:[%s7105_s4 + $0x70] sm:$0xff] }
 0x107   :  { %v529_v27 = vpop.f32.mrf.mxu2 }
 0x108   :  { %v553_v30 = vpop.f32.mrf.mxu0  ;;  %1310 = vmatpush.bf16.msrb.mxu0 %v5297_v33  ;;  %v530_v46 = vadd.f32 %v529_v27, %v501_v44  ;;  %1489 = vmatpush.bf16.msrb.mxu3 %v5311_v57  ;;  %v5306_v33 = vld [vmem:[%s7105_s4 + $0x8] sm:$0xff]  ;;  %v5317_v27 = vld [vmem:[%s7105_s4 + $0x60] sm:$0xff] }
 0x109   :  { %v554_v31 = vadd.f32 %v553_v30, %v525_v28  ;;  %v5315_v28 = vld [vmem:[%s7105_s4 + $0x50] sm:$0xff]  ;;  %1411 = vmatpush.bf16.msrb.mxu1 %v5306_v33 }
 0x10a   :  { %1567 = vmatpush.bf16.msra.mxu2 %v5315_v28 }
 0x10b   :  { %v572_v37 = vmax.f32 %v554_v31, 0.0 }
 0x10c   :  { %1644 = vmatpush.bf16.msra.mxu0 %v5320_v41  ;;  %1490 = vmatpush.bf16.msrb.mxu3 %v5310_v34 }
 0x10d   :  { %v582_v38 = vpack.c.bf16 %v572_v37, %v570_v36  ;;  %v5318_v37 = vld [vmem:[%s7105_s4 + $0x68] sm:$0xff] }
 0x10e   :  { %1568 = vmatpush.bf16.msra.mxu2 %v5314_v35 }
 0x10f   :  { %760 = vmatmul.bf16.gmra.mxu3 %v582_v38  ;;  %947 = vmatmul.bf16.gmra.mxu0 %v582_v38 }
 0x110   :  { %v556_v39 = vpop.f32.mrf.mxu0  ;;  %1645 = vmatpush.bf16.msra.mxu0 %v5319_v50  ;;  %1491 = vmatpush.bf16.msrb.mxu3 %v5309_v40 }
 0x111   :  { %v557_v47 = vadd.f32 %v556_v39, %v528_v45  ;;  %v5305_v39 = vld [vmem:[%s7105_s4] sm:$0xff] }
 0x112   :  { %1412 = vmatpush.bf16.msrb.mxu1 %v5305_v39  ;;  %1569 = vmatpush.bf16.msra.mxu2 %v5313_v42 }
 0x113   :  { %1105 = vmatmul.bf16.gmra.mxu1 %v6131_v22  ;;  %1292 = vmatmul.bf16.gmra.mxu2 %v6131_v22  ;;  %v574_v49 = vmax.f32 %v557_v47, 0.0 }
 0x114   :  { %1646 = vmatpush.bf16.msra.mxu0 %v5318_v37 }
 0x118   :  { %v558_v11 = vpop.f32.mrf.mxu0  ;;  %1647 = vmatpush.bf16.msra.mxu0 %v5317_v27 }
 0x119   :  { %v559_v48 = vadd.f32 %v558_v11, %v530_v46 }
 0x11b   :  { %v576_v51 = vmax.f32 %v559_v48, 0.0 }
 0x11d   :  { %v584_v60 = vpack.c.bf16 %v576_v51, %v574_v49 }
 0x11f   :  { %765 = vmatmul.bf16.gmra.mxu3 %v584_v60  ;;  %952 = vmatmul.bf16.gmra.mxu0 %v584_v60 }
 0x123   :  { %1110 = vmatmul.bf16.gmra.mxu1 %v6143_v43  ;;  %1297 = vmatmul.bf16.gmra.mxu2 %v6143_v43 }
 0x12f   :  { %1124 = vmatmul.bf16.vlgmr.msra.gmra.mxu3 %v6148_v52  ;;  %1311 = vmatmul.bf16.vlgmr.msrb.gmra.mxu0 %v6148_v52 }
 0x130   :  { %v722_v22 = vpop.f32.mrf.mxu1 }
 0x136   :  { %v909_v24 = vpop.f32.mrf.mxu2 }
 0x138   :  { %v6216_v29 = vpop.f32.mrf.mxu1 }
 0x13e   :  { %v6218_v53 = vpop.f32.mrf.mxu2 }
 0x13f   :  { %1129 = vmatmul.bf16.gmra.mxu3 %v580_v12  ;;  %1316 = vmatmul.bf16.gmra.mxu0 %v580_v12 }
 0x140   :  { %v727_v54 = vpop.f32.mrf.mxu1 }
 0x146   :  { %v914_v55 = vpop.f32.mrf.mxu2 }
 0x148   :  { %v6222_v56 = vpop.f32.mrf.mxu1 }
 0x14e   :  { %v6224_v52 = vpop.f32.mrf.mxu2 }
 0x14f   :  { %1134 = vmatmul.bf16.gmra.mxu3 %v582_v38  ;;  %1321 = vmatmul.bf16.gmra.mxu0 %v582_v38 }
 0x150   :  { %v732_v63 = vpop.f32.mrf.mxu1 }
 0x156   :  { %v919_v0 = vpop.f32.mrf.mxu2 }
 0x158   :  { %v6240_v5 = vpop.f32.mrf.mxu1 }
 0x15e   :  { %v6244_v8 = vpop.f32.mrf.mxu2 }
 0x15f   :  { %1139 = vmatmul.bf16.gmra.mxu3 %v584_v60  ;;  %1326 = vmatmul.bf16.gmra.mxu0 %v584_v60 }
 0x160   :  { %v737_v13 = vpop.f32.mrf.mxu1 }
 0x166   :  { %v924_v14 = vpop.f32.mrf.mxu2 }
 0x168   :  { %v6280_v30 = vpop.f32.mrf.mxu1 }
 0x16c   :  { %v938_v1 = vpop.f32.mrf.mxu0 }
 0x16d   :  { %v6220_v43 = vadd.f32 %v938_v1, %v909_v24 }
 0x16e   :  { %v6282_v31 = vpop.f32.mrf.mxu2 }
 0x170   :  { %v1096_v45 = vpop.f32.mrf.mxu1 }
 0x172   :  { %v751_v58 = vpop.f32.mrf.mxu3 }
 0x173   :  { %v6226_v59 = vadd.f32 %v751_v58, %v722_v22 }
 0x174   :  { %v6228_v61 = vpop.f32.mrf.mxu0 }
 0x175   :  { %v1332_v10 = vmax.f32 %v6226_v59, %v6220_v43 }
 0x176   :  { %v1283_v47 = vpop.f32.mrf.mxu2 }
 0x178   :  { %v1098_v60 = vpop.f32.mrf.mxu1 }
 0x17a   :  { %v6232_v62 = vpop.f32.mrf.mxu3 }
 0x17c   :  { %v943_v2 = vpop.f32.mrf.mxu0 }
 0x17d   :  { %v6234_v3 = vadd.f32 %v943_v2, %v914_v55 }
 0x17e   :  { %v1285_v22 = vpop.f32.mrf.mxu2 }
 0x180   :  { %v1101_v55 = vpop.f32.mrf.mxu1 }
 0x182   :  { %v756_v25 = vpop.f32.mrf.mxu3 }
 0x183   :  { %v6236_v18 = vadd.f32 %v756_v25, %v727_v54  ;;  %v941_v25 = vadd.f32 %v6228_v61, %v6218_v53 }
 0x184   :  { %v6238_v4 = vpop.f32.mrf.mxu0 }
 0x185   :  { %v1334_v6 = vmax.f32 %v6236_v18, %v6234_v3  ;;  %v946_v28 = vadd.f32 %v6238_v4, %v6224_v52  ;;  %v5324_v52 = vld [vmem:[%s7105_s4 + $0x98] sm:$0xff] }
 0x186   :  { %v1288_v58 = vpop.f32.mrf.mxu2  ;;  %v5328_v4 = vld [vmem:[%s7105_s4 + $0xb8] sm:$0xff]  ;;  %1722 = vmatpush.bf16.msra.mxu1 %v5324_v52 }
 0x187   :  { %v5332_v3 = vld [vmem:[%s7105_s4 + $0xd8] sm:$0xff]  ;;  %1800 = vmatpush.bf16.msra.mxu3 %v5328_v4 }
 0x188   :  { %v1103_v26 = vpop.f32.mrf.mxu1  ;;  %1878 = vmatpush.bf16.msrb.mxu2 %v5332_v3 }
 0x18a   :  { %v6246_v9 = vpop.f32.mrf.mxu3 }
 0x18b   :  { %v759_v59 = vadd.f32 %v6246_v9, %v6222_v56 }
 0x18c   :  { %v948_v7 = vpop.f32.mrf.mxu0 }
 0x18d   :  { %v6248_v12 = vadd.f32 %v948_v7, %v919_v0  ;;  %v1335_v39 = vmax.f32 %v759_v59, %v946_v28 }
 0x190   :  { %v1106_v50 = vpop.f32.mrf.mxu1 }
 0x192   :  { %v761_v15 = vpop.f32.mrf.mxu3 }
 0x193   :  { %v6250_v16 = vadd.f32 %v761_v15, %v732_v63  ;;  %v754_v63 = vadd.f32 %v6232_v62, %v6216_v29  ;;  %v1290_v29 = vpop.f32.mrf.mxu2 }
 0x194   :  { %v6261_v21 = vpop.f32.mrf.mxu0 }
 0x195   :  { %v1336_v23 = vmax.f32 %v6250_v16, %v6248_v12  ;;  %v1333_v17 = vmax.f32 %v754_v63, %v941_v25 }
 0x198   :  { %v1108_v9 = vpop.f32.mrf.mxu1 }
 0x19a   :  { %v6284_v32 = vpop.f32.mrf.mxu3 }
 0x19c   :  { %v953_v36 = vpop.f32.mrf.mxu0 }
 0x19d   :  { %v6298_v38 = vadd.f32 %v953_v36, %v924_v14  ;;  %v1293_v36 = vpop.f32.mrf.mxu2 }
 0x1a2   :  { %v766_v44 = vpop.f32.mrf.mxu3 }
 0x1a3   :  { %v6312_v46 = vadd.f32 %v766_v44, %v737_v13 }
 0x1a4   :  { %v6314_v11 = vpop.f32.mrf.mxu0 }
 0x1a5   :  { %v1338_v48 = vmax.f32 %v6312_v46, %v6298_v38  ;;  %v956_v28 = vadd.f32 %v6314_v11, %v6282_v31  ;;  %v5339_v31 = vld [vmem:[%s7105_s4 + $0x110] sm:$0xff]  ;;  %v5338_v38 = vld [vmem:[%s7105_s4 + $0x108] sm:$0xff]  ;;  %v5337_v46 = vld [vmem:[%s7105_s4 + $0x100] sm:$0xff] }
 0x1aa   :  { %v6318_v49 = vpop.f32.mrf.mxu3 }
 0x1ac   :  { %v1312_v51 = vpop.f32.mrf.mxu0 }
 0x1ad   :  { %v1313_v0 = vadd.f32 %v1312_v51, %v1283_v47  ;;  %v5327_v47 = vld [vmem:[%s7105_s4 + $0xb0] sm:$0xff]  ;;  %v1295_v51 = vpop.f32.mrf.mxu2 }
 0x1ae   :  { %1801 = vmatpush.bf16.msra.mxu3 %v5327_v47 }
 0x1b2   :  { %v1125_v24 = vpop.f32.mrf.mxu3 }
 0x1b3   :  { %v1126_v1 = vadd.f32 %v1125_v24, %v1096_v45  ;;  %v5323_v45 = vld [vmem:[%s7105_s4 + $0x90] sm:$0xff] }
 0x1b4   :  { %v1314_v54 = vpop.f32.mrf.mxu0  ;;  %1723 = vmatpush.bf16.msra.mxu1 %v5323_v45 }
 0x1b5   :  { %v1340_v7 = vmax.f32 %v1126_v1, %v1313_v0  ;;  %v1315_v13 = vadd.f32 %v1314_v54, %v1285_v22  ;;  %v5335_v22 = vld [vmem:[%s7105_s4 + $0xf0] sm:$0xff]  ;;  %v764_v54 = vadd.f32 %v6284_v32, %v6240_v5  ;;  %v5322_v1 = vld [vmem:[%s7105_s4 + $0x88] sm:$0xff]  ;;  %v951_v32 = vadd.f32 %v6261_v21, %v6244_v8  ;;  %v5329_v8 = vld [vmem:[%s7105_s4 + $0xc0] sm:$0xff] }
 0x1b6   :  { %v5330_v0 = vld [vmem:[%s7105_s4 + $0xc8] sm:$0xff]  ;;  %v5333_v21 = vld [vmem:[%s7105_s4 + $0xe0] sm:$0xff] }
 0x1b7   :  { %v1348_v20 = vmax.f32 %v1332_v10, %v1340_v7  ;;  %v5334_v5 = vld [vmem:[%s7105_s4 + $0xe8] sm:$0xff] }
 0x1b8   :  { %1724 = vmatpush.bf16.msra.mxu1 %v5322_v1 }
 0x1ba   :  { %v1127_v2 = vpop.f32.mrf.mxu3 }
 0x1bb   :  { %v1128_v14 = vadd.f32 %v1127_v2, %v1098_v60  ;;  %v5331_v60 = vld [vmem:[%s7105_s4 + $0xd0] sm:$0xff] }
 0x1bc   :  { %v1317_v15 = vpop.f32.mrf.mxu0  ;;  %1879 = vmatpush.bf16.msrb.mxu2 %v5331_v60 }
 0x1bd   :  { %v1341_v19 = vmax.f32 %v1128_v14, %v1315_v13  ;;  %v1318_v61 = vadd.f32 %v1317_v15, %v1288_v58  ;;  %v5326_v58 = vld [vmem:[%s7105_s4 + $0xa8] sm:$0xff]  ;;  %v1337_v13 = vmax.f32 %v764_v54, %v951_v32  ;;  %v5321_v15 = vld [vmem:[%s7105_s4 + $0x80] sm:$0xff] }
 0x1be   :  { %1802 = vmatpush.bf16.msra.mxu3 %v5326_v58  ;;  %1725 = vmatpush.bf16.msra.mxu1 %v5321_v15 }
 0x1bf   :  { %v1349_v41 = vmax.f32 %v1333_v17, %v1341_v19  ;;  %v5325_v17 = vld [vmem:[%s7105_s4 + $0xa0] sm:$0xff] }
 0x1c0   :  { %1880 = vmatpush.bf16.msrb.mxu2 %v5330_v0 }
 0x1c1   :  { %v6327_v57 = vpack.c.bf16 %v1349_v41, %v1348_v20  ;;  %v1111_v20 = vpop.f32.mrf.mxu1 }
 0x1c2   :  { %v1130_v62 = vpop.f32.mrf.mxu3  ;;  %1803 = vmatpush.bf16.msra.mxu3 %v5325_v17 }
 0x1c3   :  { %4381 = vmatmul.msk.bf16.vlgmr.msrb.gmra.mxu1 %vm1392_vm1, %v6327_v57  ;;  %4409 = vmatmul.msk.bf16.vlgmr.msrb.gmra.mxu3 %vm1392_vm1, %v6327_v57  ;;  %v1131_v43 = vadd.f32 %v1130_v62, %v1101_v55 }
 0x1c4   :  { %4437 = vmatmul.msk.bf16.vlgmr.msra.gmra.mxu2 %vm1392_vm1, %v6327_v57  ;;  %4465 = vmatmul.msk.bf16.vlgmr.msra.gmra.mxu0 %vm1392_vm1, %v6327_v57  ;;  %v1319_v53 = vpop.f32.mrf.mxu0 }
 0x1c5   :  { %v1342_v33 = vmax.f32 %v1131_v43, %v1318_v61  ;;  %v1320_v34 = vadd.f32 %v1319_v53, %v1290_v29  ;;  %v1298_v29 = vpop.f32.mrf.mxu2  ;;  %1881 = vmatpush.bf16.msrb.mxu2 %v5329_v8  ;;  %v769_v43 = vadd.f32 %v6318_v49, %v6280_v30  ;;  %v5340_v30 = vld [vmem:[%s7105_s4 + $0x118] sm:$0xff] }
 0x1c6   :  { %2034 = vmatpush.bf16.msrb.mxu1 %v5340_v30 }
 0x1c7   :  { %v1350_v42 = vmax.f32 %v1334_v6, %v1342_v33  ;;  %v5336_v6 = vld [vmem:[%s7105_s4 + $0xf8] sm:$0xff] }
 0x1c8   :  { %1956 = vmatpush.bf16.msrb.mxu0 %v5336_v6 }
 0x1ca   :  { %v1132_v10 = vpop.f32.mrf.mxu3  ;;  %2035 = vmatpush.bf16.msrb.mxu1 %v5339_v31 }
 0x1cb   :  { %v1133_v35 = vadd.f32 %v1132_v10, %v1103_v26 }
 0x1cc   :  { %v1322_v37 = vpop.f32.mrf.mxu0  ;;  %1957 = vmatpush.bf16.msrb.mxu0 %v5335_v22 }
 0x1cd   :  { %v1343_v40 = vmax.f32 %v1133_v35, %v1320_v34  ;;  %v1323_v55 = vadd.f32 %v1322_v37, %v1293_v36  ;;  %v1300_v61 = vpop.f32.mrf.mxu2  ;;  %v1339_v35 = vmax.f32 %v769_v43, %v956_v28 }
 0x1ce   :  { %2036 = vmatpush.bf16.msrb.mxu1 %v5338_v38 }
 0x1cf   :  { %v1351_v27 = vmax.f32 %v1335_v39, %v1343_v40 }
 0x1d0   :  { %1958 = vmatpush.bf16.msrb.mxu0 %v5334_v5 }
 0x1d1   :  { %v6344_v44 = vpack.c.bf16 %v1351_v27, %v1350_v42 }
 0x1d2   :  { %v1135_v56 = vpop.f32.mrf.mxu3  ;;  %2037 = vmatpush.bf16.msrb.mxu1 %v5337_v46 }
 0x1d3   :  { %4382 = vmatmul.msk.bf16.gmra.mxu1 %vm1392_vm1, %v6344_v44  ;;  %4410 = vmatmul.msk.bf16.gmra.mxu3 %vm1392_vm1, %v6344_v44  ;;  %v1136_v24 = vadd.f32 %v1135_v56, %v1106_v50 }
 0x1d4   :  { %4438 = vmatmul.msk.bf16.gmra.mxu2 %vm1392_vm1, %v6344_v44  ;;  %4466 = vmatmul.msk.bf16.gmra.mxu0 %vm1392_vm1, %v6344_v44  ;;  %v1324_v18 = vpop.f32.mrf.mxu0 }
 0x1d5   :  { %v1344_v2 = vmax.f32 %v1136_v24, %v1323_v55  ;;  %v1325_v25 = vadd.f32 %v1324_v18, %v1295_v51  ;;  %1959 = vmatpush.bf16.msrb.mxu0 %v5333_v21 }
 0x1d7   :  { %v1352_v41 = vmax.f32 %v1336_v23, %v1344_v2  ;;  %v1113_v23 = vpop.f32.mrf.mxu1 }
 0x1da   :  { %v1137_v63 = vpop.f32.mrf.mxu3 }
 0x1db   :  { %v1138_v7 = vadd.f32 %v1137_v63, %v1108_v9 }
 0x1dc   :  { %v1327_v19 = vpop.f32.mrf.mxu0 }
 0x1dd   :  { %v1345_v14 = vmax.f32 %v1138_v7, %v1325_v25  ;;  %v1328_v59 = vadd.f32 %v1327_v19, %v1298_v29 }
 0x1df   :  { %v1353_v26 = vmax.f32 %v1337_v13, %v1345_v14 }
 0x1e1   :  { %v6409_v62 = vpack.c.bf16 %v1353_v26, %v1352_v41 }
 0x1e2   :  { %v1140_v53 = vpop.f32.mrf.mxu3 }
 0x1e3   :  { %4383 = vmatmul.msk.bf16.gmra.mxu1 %vm1392_vm1, %v6409_v62  ;;  %4411 = vmatmul.msk.bf16.gmra.mxu3 %vm1392_vm1, %v6409_v62  ;;  %v1141_v12 = vadd.f32 %v1140_v53, %v1111_v20 }
 0x1e4   :  { %4439 = vmatmul.msk.bf16.gmra.mxu2 %vm1392_vm1, %v6409_v62  ;;  %4467 = vmatmul.msk.bf16.gmra.mxu0 %vm1392_vm1, %v6409_v62  ;;  %v1329_v16 = vpop.f32.mrf.mxu0 }
 0x1e5   :  { %v1346_v50 = vmax.f32 %v1141_v12, %v1328_v59  ;;  %v1330_v33 = vadd.f32 %v1329_v16, %v1300_v61 }
 0x1e7   :  { %v1354_v37 = vmax.f32 %v1338_v48, %v1346_v50 }
 0x1ea   :  { %v1142_v10 = vpop.f32.mrf.mxu3 }
 0x1eb   :  { %v1143_v34 = vadd.f32 %v1142_v10, %v1113_v23 }
 0x1ed   :  { %v1347_v36 = vmax.f32 %v1143_v34, %v1330_v33 }
 0x1ef   :  { %v1355_v39 = vmax.f32 %v1339_v35, %v1347_v36 }
 0x1f1   :  { %v6426_v40 = vpack.c.bf16 %v1355_v39, %v1354_v37 }
 0x1f3   :  { %4384 = vmatmul.msk.bf16.gmra.mxu1 %vm1392_vm1, %v6426_v40  ;;  %4412 = vmatmul.msk.bf16.gmra.mxu3 %vm1392_vm1, %v6426_v40 }
 0x1f4   :  { %4440 = vmatmul.msk.bf16.gmra.mxu2 %vm1392_vm1, %v6426_v40  ;;  %4468 = vmatmul.msk.bf16.gmra.mxu0 %vm1392_vm1, %v6426_v40 }
 0x203   :  { %4493 = vmatmul.msk.bf16.vlgmr.msra.gmra.mxu1 %vm1392_vm1, %v6327_v57  ;;  %4521 = vmatmul.msk.bf16.vlgmr.msra.gmra.mxu3 %vm1392_vm1, %v6327_v57 }
 0x204   :  { %4549 = vmatmul.msk.bf16.vlgmr.msrb.gmra.mxu2 %vm1392_vm1, %v6327_v57  ;;  %4577 = vmatmul.msk.bf16.vlgmr.msrb.gmra.mxu0 %vm1392_vm1, %v6327_v57 }
 0x213   :  { %4494 = vmatmul.msk.bf16.gmra.mxu1 %vm1392_vm1, %v6344_v44  ;;  %4522 = vmatmul.msk.bf16.gmra.mxu3 %vm1392_vm1, %v6344_v44 }
 0x214   :  { %4550 = vmatmul.msk.bf16.gmra.mxu2 %vm1392_vm1, %v6344_v44  ;;  %4578 = vmatmul.msk.bf16.gmra.mxu0 %vm1392_vm1, %v6344_v44 }
 0x223   :  { %4495 = vmatmul.msk.bf16.gmra.mxu1 %vm1392_vm1, %v6409_v62  ;;  %4523 = vmatmul.msk.bf16.gmra.mxu3 %vm1392_vm1, %v6409_v62 }
 0x224   :  { %4551 = vmatmul.msk.bf16.gmra.mxu2 %vm1392_vm1, %v6409_v62  ;;  %4579 = vmatmul.msk.bf16.gmra.mxu0 %vm1392_vm1, %v6409_v62 }
 0x233   :  { %4496 = vmatmul.msk.bf16.gmra.mxu1 %vm1392_vm1, %v6426_v40  ;;  %4524 = vmatmul.msk.bf16.gmra.mxu3 %vm1392_vm1, %v6426_v40 }
 0x234   :  { %4552 = vmatmul.msk.bf16.gmra.mxu2 %vm1392_vm1, %v6426_v40  ;;  %4580 = vmatmul.msk.bf16.gmra.mxu0 %vm1392_vm1, %v6426_v40 }
 0x240   :  { %v1414_v11 = vpop.f32.mrf.mxu1 }
 0x241   :  { %v1434_v48 = vpack.c.bf16 %v1414_v11, %v1414_v11  ;;  %v1649_v49 = vpop.f32.mrf.mxu0 }
 0x242   :  { %v1669_v42 = vpack.c.bf16 %v1649_v49, %v1649_v49 }
 0x243   :  { %1443 = vst.msk [vmem:[#allocation2] sm:$0xf] %vm1442_vm2, %v1434_v48  ;;  %4605 = vmatmul.msk.bf16.vlgmr.msrb.gmra.mxu1 %vm1392_vm1, %v6327_v57 }
 0x244   :  { %1677 = vst.msk [vmem:[#allocation2 + $0x60] sm:$0xf] %vm1442_vm2, %v1669_v42 }
 0x246   :  { %v1493_v27 = vpop.f32.mrf.mxu3 }
 0x247   :  { %v1513_v56 = vpack.c.bf16 %v1493_v27, %v1493_v27  ;;  %v1571_v52 = vpop.f32.mrf.mxu2 }
 0x248   :  { %v1591_v4 = vpack.c.bf16 %v1571_v52, %v1571_v52  ;;  %v1416_v3 = vpop.f32.mrf.mxu1 }
 0x249   :  { %1521 = vst.msk [vmem:[#allocation2 + $0x20] sm:$0xf] %vm1442_vm2, %v1513_v56  ;;  %v1435_v18 = vpack.c.bf16 %v1416_v3, %v1416_v3  ;;  %v1651_v6 = vpop.f32.mrf.mxu0 }
 0x24a   :  { %1599 = vst.msk [vmem:[#allocation2 + $0x40] sm:$0xf] %vm1442_vm2, %v1591_v4  ;;  %v1670_v9 = vpack.c.bf16 %v1651_v6, %v1651_v6 }
 0x24b   :  { %1444 = vst.msk [vmem:[#allocation2 + $0x4] sm:$0xf] %vm1442_vm2, %v1435_v18 }
 0x24c   :  { %1678 = vst.msk [vmem:[#allocation2 + $0x64] sm:$0xf] %vm1442_vm2, %v1670_v9 }
 0x24e   :  { %v1495_v45 = vpop.f32.mrf.mxu3 }
 0x24f   :  { %v1514_v57 = vpack.c.bf16 %v1495_v45, %v1495_v45  ;;  %v1573_v47 = vpop.f32.mrf.mxu2 }
 0x250   :  { %v1592_v51 = vpack.c.bf16 %v1573_v47, %v1573_v47  ;;  %v1419_v60 = vpop.f32.mrf.mxu1 }
 0x251   :  { %1522 = vst.msk [vmem:[#allocation2 + $0x24] sm:$0xf] %vm1442_vm2, %v1514_v57  ;;  %v1436_v22 = vpack.c.bf16 %v1419_v60, %v1419_v60  ;;  %v1654_v24 = vpop.f32.mrf.mxu0 }
 0x252   :  { %1600 = vst.msk [vmem:[#allocation2 + $0x44] sm:$0xf] %vm1442_vm2, %v1592_v51  ;;  %v1671_v54 = vpack.c.bf16 %v1654_v24, %v1654_v24 }
 0x253   :  { %1445 = vst.msk [vmem:[#allocation2 + $0x8] sm:$0xf] %vm1442_vm2, %v1436_v22  ;;  %4606 = vmatmul.msk.bf16.gmra.mxu1 %vm1392_vm1, %v6344_v44 }
 0x254   :  { %1679 = vst.msk [vmem:[#allocation2 + $0x68] sm:$0xf] %vm1442_vm2, %v1671_v54 }
 0x256   :  { %v1498_v55 = vpop.f32.mrf.mxu3 }
 0x257   :  { %v1515_v1 = vpack.c.bf16 %v1498_v55, %v1498_v55  ;;  %v1576_v58 = vpop.f32.mrf.mxu2  ;;  %v5393_v55 = vld [vmem:[#allocation2 + $0x60] sm:$0xff] }
 0x258   :  { %v1593_v63 = vpack.c.bf16 %v1576_v58, %v1576_v58  ;;  %v1421_v0 = vpop.f32.mrf.mxu1 }
 0x259   :  { %1523 = vst.msk [vmem:[#allocation2 + $0x28] sm:$0xf] %vm1442_vm2, %v1515_v1  ;;  %v1437_v5 = vpack.c.bf16 %v1421_v0, %v1421_v0  ;;  %v1656_v32 = vpop.f32.mrf.mxu0 }
 0x25a   :  { %1601 = vst.msk [vmem:[#allocation2 + $0x48] sm:$0xf] %vm1442_vm2, %v1593_v63  ;;  %v1672_v2 = vpack.c.bf16 %v1656_v32, %v1656_v32 }
 0x25b   :  { %1446 = vst.msk [vmem:[#allocation2 + $0xc] sm:$0xf] %vm1442_vm2, %v1437_v5 }
 0x25c   :  { %1680 = vst.msk [vmem:[#allocation2 + $0x6c] sm:$0xf] %vm1442_vm2, %v1672_v2 }
 0x25e   :  { %v1500_v25 = vpop.f32.mrf.mxu3 }
 0x25f   :  { %v1516_v44 = vpack.c.bf16 %v1500_v25, %v1500_v25  ;;  %v1578_v7 = vpop.f32.mrf.mxu2  ;;  %v5385_v25 = vld [vmem:[#allocation2 + $0x20] sm:$0xff] }
 0x260   :  { %v1594_v13 = vpack.c.bf16 %v1578_v7, %v1578_v7  ;;  %v1424_v14 = vpop.f32.mrf.mxu1 }
 0x261   :  { %1524 = vst.msk [vmem:[#allocation2 + $0x2c] sm:$0xf] %vm1442_vm2, %v1516_v44  ;;  %v1438_v15 = vpack.c.bf16 %v1424_v14, %v1424_v14  ;;  %v1659_v17 = vpop.f32.mrf.mxu0 }
 0x262   :  { %1602 = vst.msk [vmem:[#allocation2 + $0x4c] sm:$0xf] %vm1442_vm2, %v1594_v13  ;;  %v1673_v19 = vpack.c.bf16 %v1659_v17, %v1659_v17 }
 0x263   :  { %1447 = vst.msk [vmem:[#allocation2 + $0x10] sm:$0xf] %vm1442_vm2, %v1438_v15  ;;  %4607 = vmatmul.msk.bf16.gmra.mxu1 %vm1392_vm1, %v6409_v62  ;;  %v5394_v51 = vld [vmem:[#allocation2 + $0x68] sm:$0xff] }
 0x264   :  { %1681 = vst.msk [vmem:[#allocation2 + $0x70] sm:$0xf] %vm1442_vm2, %v1673_v19 }
 0x266   :  { %v1503_v8 = vpop.f32.mrf.mxu3 }
 0x267   :  { %v1517_v21 = vpack.c.bf16 %v1503_v8, %v1503_v8  ;;  %v1581_v20 = vpop.f32.mrf.mxu2 }
 0x268   :  { %v1595_v41 = vpack.c.bf16 %v1581_v20, %v1581_v20  ;;  %v1426_v26 = vpop.f32.mrf.mxu1  ;;  %v5386_v63 = vld [vmem:[#allocation2 + $0x28] sm:$0xff] }
 0x269   :  { %1525 = vst.msk [vmem:[#allocation2 + $0x30] sm:$0xf] %vm1442_vm2, %v1517_v21  ;;  %v1439_v29 = vpack.c.bf16 %v1426_v26, %v1426_v26  ;;  %v1661_v53 = vpop.f32.mrf.mxu0 }
 0x26a   :  { %1603 = vst.msk [vmem:[#allocation2 + $0x50] sm:$0xf] %vm1442_vm2, %v1595_v41  ;;  %v1674_v12 = vpack.c.bf16 %v1661_v53, %v1661_v53  ;;  %v5390_v41 = vld [vmem:[#allocation2 + $0x48] sm:$0xff]  ;;  %v4613_v53 = vld [vmem:[%s7106_s5 + $0x14] sm:$0xf0] }
 0x26b   :  { %1448 = vst.msk [vmem:[#allocation2 + $0x14] sm:$0xf] %vm1442_vm2, %v1439_v29  ;;  %v5341_v29 = vld [vmem:[%s7106_s5 + $0x4] sm:$0xf] }
 0x26c   :  { %1682 = vst.msk [vmem:[#allocation2 + $0x74] sm:$0xf] %vm1442_vm2, %v1674_v12 }
 0x26e   :  { %v1505_v16 = vpop.f32.mrf.mxu3 }
 0x26f   :  { %v1518_v62 = vpack.c.bf16 %v1505_v16, %v1505_v16  ;;  %v1583_v23 = vpop.f32.mrf.mxu2 }
 0x270   :  { %v1596_v43 = vpack.c.bf16 %v1583_v23, %v1583_v23  ;;  %v1429_v59 = vpop.f32.mrf.mxu1  ;;  %v5389_v23 = vld [vmem:[#allocation2 + $0x40] sm:$0xff] }
 0x271   :  { %1526 = vst.msk [vmem:[#allocation2 + $0x34] sm:$0xf] %vm1442_vm2, %v1518_v62  ;;  %v1440_v61 = vpack.c.bf16 %v1429_v59, %v1429_v59  ;;  %v1664_v10 = vpop.f32.mrf.mxu0 }
 0x272   :  { %1604 = vst.msk [vmem:[#allocation2 + $0x54] sm:$0xf] %vm1442_vm2, %v1596_v43  ;;  %v1675_v28 = vpack.c.bf16 %v1664_v10, %v1664_v10  ;;  %v5383_v26 = vld [vmem:[#allocation2 + $0x10] sm:$0xff]  ;;  %v4616_v10 = vor.u32 %v5341_v29, %v4613_v53 }
 0x273   :  { %1449 = vst.msk [vmem:[#allocation2 + $0x18] sm:$0xf] %vm1442_vm2, %v1440_v61  ;;  %4608 = vmatmul.msk.bf16.gmra.mxu1 %vm1392_vm1, %v6426_v40  ;;  %v5395_v3 = vld [vmem:[#allocation2 + $0x70] sm:$0xff]  ;;  %v5382_v61 = vld [vmem:[#allocation2 + $0x8] sm:$0xff] }
 0x274   :  { %1683 = vst.msk [vmem:[#allocation2 + $0x78] sm:$0xf] %vm1442_vm2, %v1675_v28 }
 0x276   :  { %v1508_v50 = vpop.f32.mrf.mxu3 }
 0x277   :  { %v1519_v33 = vpack.c.bf16 %v1508_v50, %v1508_v50  ;;  %v1586_v34 = vpop.f32.mrf.mxu2 }
 0x278   :  { %v1597_v35 = vpack.c.bf16 %v1586_v34, %v1586_v34  ;;  %v1431_v36 = vpop.f32.mrf.mxu1  ;;  %v5387_v60 = vld [vmem:[#allocation2 + $0x30] sm:$0xff]  ;;  %v4611_v34 = vld [vmem:[%s7106_s5] sm:$0xf] }
 0x279   :  { %1527 = vst.msk [vmem:[#allocation2 + $0x38] sm:$0xf] %vm1442_vm2, %v1519_v33  ;;  %v1441_v37 = vpack.c.bf16 %v1431_v36, %v1431_v36  ;;  %v1666_v39 = vpop.f32.mrf.mxu0  ;;  %v5391_v14 = vld [vmem:[#allocation2 + $0x50] sm:$0xff]  ;;  %v5381_v36 = vld [vmem:[#allocation2] sm:$0xff] }
 0x27a   :  { %1605 = vst.msk [vmem:[#allocation2 + $0x58] sm:$0xf] %vm1442_vm2, %v1597_v35  ;;  %v1676_v30 = vpack.c.bf16 %v1666_v39, %v1666_v39  ;;  %v5343_v35 = vld [vmem:[%s7106_s5 + $0x10] sm:$0xf0] }
 0x27b   :  { %1450 = vst.msk [vmem:[#allocation2 + $0x1c] sm:$0xf] %vm1442_vm2, %v1441_v37  ;;  %v4612_v37 = vor.u32 %v5343_v35, %v4611_v34 }
 0x27c   :  { %1684 = vst.msk [vmem:[#allocation2 + $0x7c] sm:$0xf] %vm1442_vm2, %v1676_v30 }
 0x27e   :  { %v1510_v31 = vpop.f32.mrf.mxu3 }
 0x27f   :  { %v1520_v40 = vpack.c.bf16 %v1510_v31, %v1510_v31  ;;  %v1588_v38 = vpop.f32.mrf.mxu2 }
 0x280   :  { %v1598_v46 = vpack.c.bf16 %v1588_v38, %v1588_v38  ;;  %v1727_v11 = vpop.f32.mrf.mxu1 }
 0x281   :  { %1528 = vst.msk [vmem:[#allocation2 + $0x3c] sm:$0xf] %vm1442_vm2, %v1520_v40  ;;  %v1747_v48 = vpack.c.bf16 %v1727_v11, %v1727_v11  ;;  %v1961_v49 = vpop.f32.mrf.mxu0 }
 0x282   :  { %1606 = vst.msk [vmem:[#allocation2 + $0x5c] sm:$0xf] %vm1442_vm2, %v1598_v46  ;;  %v1981_v42 = vpack.c.bf16 %v1961_v49, %v1961_v49  ;;  %v5384_v19 = vld [vmem:[#allocation2 + $0x18] sm:$0xff]  ;;  %v5346_v49 = vld [vmem:[%s7106_s5 + $0x2c] sm:$0xf] }
 0x283   :  { %1755 = vst.msk [vmem:[#allocation2 + $0x80] sm:$0xf] %vm1442_vm2, %v1747_v48  ;;  %v5396_v27 = vld [vmem:[#allocation2 + $0x78] sm:$0xff] }
 0x284   :  { %1989 = vst.msk [vmem:[#allocation2 + $0xe0] sm:$0xf] %vm1442_vm2, %v1981_v42  ;;  %2780 = vmatpush.bf16.msra.mxu2 %v5396_v27  ;;  %v4633_v42 = vld [vmem:[%s7106_s5 + $0x3c] sm:$0xf0] }
 0x286   :  { %v1805_v56 = vpop.f32.mrf.mxu3 }
 0x287   :  { %v1825_v52 = vpack.c.bf16 %v1805_v56, %v1805_v56  ;;  %v1883_v4 = vpop.f32.mrf.mxu2 }
 0x288   :  { %v1903_v18 = vpack.c.bf16 %v1883_v4, %v1883_v4  ;;  %v1729_v6 = vpop.f32.mrf.mxu1  ;;  %v5388_v9 = vld [vmem:[#allocation2 + $0x38] sm:$0xff]  ;;  %2781 = vmatpush.bf16.msra.mxu2 %v5395_v3 }
 0x289   :  { %1833 = vst.msk [vmem:[#allocation2 + $0xa0] sm:$0xf] %vm1442_vm2, %v1825_v52  ;;  %v1748_v45 = vpack.c.bf16 %v1729_v6, %v1729_v6  ;;  %v1963_v57 = vpop.f32.mrf.mxu0  ;;  %2731 = vmatpush.bf16.msrb.mxu3 %v5388_v9  ;;  %v5392_v2 = vld [vmem:[#allocation2 + $0x58] sm:$0xff] }
 0x28a   :  { %1911 = vst.msk [vmem:[#allocation2 + $0xc0] sm:$0xf] %vm1442_vm2, %v1903_v18  ;;  %v1982_v47 = vpack.c.bf16 %v1963_v57, %v1963_v57  ;;  %v4636_v18 = vor.u32 %v5346_v49, %v4633_v42  ;;  %v4631_v57 = vld [vmem:[%s7106_s5 + $0x28] sm:$0xf] }
 0x28b   :  { %1756 = vst.msk [vmem:[#allocation2 + $0x84] sm:$0xf] %vm1442_vm2, %v1748_v45 }
 0x28c   :  { %1990 = vst.msk [vmem:[#allocation2 + $0xe4] sm:$0xf] %vm1442_vm2, %v1982_v47  ;;  %2782 = vmatpush.bf16.msra.mxu2 %v5394_v51  ;;  %v5348_v47 = vld [vmem:[%s7106_s5 + $0x38] sm:$0xf0] }
 0x28d   :  { %2732 = vmatpush.bf16.msrb.mxu3 %v5387_v60  ;;  %v4632_v51 = vor.u32 %v5348_v47, %v4631_v57 }
 0x28e   :  { %v1807_v22 = vpop.f32.mrf.mxu3 }
 0x28f   :  { %v1826_v24 = vpack.c.bf16 %v1807_v22, %v1807_v22  ;;  %v1885_v54 = vpop.f32.mrf.mxu2 }
 0x290   :  { %v1904_v1 = vpack.c.bf16 %v1885_v54, %v1885_v54  ;;  %v1732_v58 = vpop.f32.mrf.mxu1  ;;  %2783 = vmatpush.bf16.msra.mxu2 %v5393_v55 }
 0x291   :  { %1834 = vst.msk [vmem:[#allocation2 + $0xa4] sm:$0xf] %vm1442_vm2, %v1826_v24  ;;  %v1749_v0 = vpack.c.bf16 %v1732_v58, %v1732_v58  ;;  %v1966_v5 = vpop.f32.mrf.mxu0  ;;  %2733 = vmatpush.bf16.msrb.mxu3 %v5386_v63 }
 0x292   :  { %1912 = vst.msk [vmem:[#allocation2 + $0xc4] sm:$0xf] %vm1442_vm2, %v1904_v1  ;;  %v1983_v32 = vpack.c.bf16 %v1966_v5, %v1966_v5  ;;  %v4653_v5 = vld [vmem:[%s7106_s5 + $0x64] sm:$0xf0] }
 0x293   :  { %1757 = vst.msk [vmem:[#allocation2 + $0x88] sm:$0xf] %vm1442_vm2, %v1749_v0  ;;  %v5351_v0 = vld [vmem:[%s7106_s5 + $0x54] sm:$0xf] }
 0x294   :  { %1991 = vst.msk [vmem:[#allocation2 + $0xe8] sm:$0xf] %vm1442_vm2, %v1983_v32  ;;  %2784 = vmatpush.bf16.msra.mxu2 %v5392_v2 }
 0x295   :  { %2734 = vmatpush.bf16.msrb.mxu3 %v5385_v25 }
 0x296   :  { %v1810_v44 = vpop.f32.mrf.mxu3 }
 0x297   :  { %v1827_v7 = vpack.c.bf16 %v1810_v44, %v1810_v44  ;;  %v1888_v13 = vpop.f32.mrf.mxu2 }
 0x298   :  { %v1905_v15 = vpack.c.bf16 %v1888_v13, %v1888_v13  ;;  %v1734_v17 = vpop.f32.mrf.mxu1  ;;  %2785 = vmatpush.bf16.msra.mxu2 %v5391_v14  ;;  %v4656_v13 = vor.u32 %v5351_v0, %v4653_v5  ;;  %v4711_v0 = vld [vmem:[%s7106_s5 + $0xc8] sm:$0xf]  ;;  %v5368_v5 = vld [vmem:[%s7106_s5 + $0xd8] sm:$0xf0] }
 0x299   :  { %1835 = vst.msk [vmem:[#allocation2 + $0xa8] sm:$0xf] %vm1442_vm2, %v1827_v7  ;;  %v1750_v8 = vpack.c.bf16 %v1734_v17, %v1734_v17  ;;  %v1968_v21 = vpop.f32.mrf.mxu0  ;;  %2735 = vmatpush.bf16.msrb.mxu3 %v5384_v19  ;;  %v5353_v17 = vld [vmem:[%s7106_s5 + $0x60] sm:$0xf0] }
 0x29a   :  { %1913 = vst.msk [vmem:[#allocation2 + $0xc8] sm:$0xf] %vm1442_vm2, %v1905_v15  ;;  %v1984_v20 = vpack.c.bf16 %v1968_v21, %v1968_v21  ;;  %v4651_v15 = vld [vmem:[%s7106_s5 + $0x50] sm:$0xf] }
 0x29b   :  { %1758 = vst.msk [vmem:[#allocation2 + $0x8c] sm:$0xf] %vm1442_vm2, %v1750_v8  ;;  %v4652_v8 = vor.u32 %v5353_v17, %v4651_v15  ;;  %v4733_v15 = vld [vmem:[%s7106_s5 + $0x104] sm:$0xf0]  ;;  %v5352_v17 = vld [vmem:[%s7106_s5 + $0x5c] sm:$0xf] }
 0x29c   :  { %1992 = vst.msk [vmem:[#allocation2 + $0xec] sm:$0xf] %vm1442_vm2, %v1984_v20  ;;  %2786 = vmatpush.bf16.msra.mxu2 %v5390_v41 }
 0x29d   :  { %2736 = vmatpush.bf16.msrb.mxu3 %v5383_v26 }
 0x29e   :  { %v1812_v12 = vpop.f32.mrf.mxu3 }
 0x29f   :  { %v1828_v16 = vpack.c.bf16 %v1812_v12, %v1812_v12  ;;  %v1890_v62 = vpop.f32.mrf.mxu2  ;;  %v5356_v12 = vld [vmem:[%s7106_s5 + $0x7c] sm:$0xf] }
 0x2a0   :  { %v1906_v43 = vpack.c.bf16 %v1890_v62, %v1890_v62  ;;  %v1737_v59 = vpop.f32.mrf.mxu1  ;;  %2787 = vmatpush.bf16.msra.mxu2 %v5389_v23  ;;  %v5409_v62 = vld [vmem:[#allocation2 + $0xe0] sm:$0xff] }
 0x2a1   :  { %1836 = vst.msk [vmem:[#allocation2 + $0xac] sm:$0xf] %vm1442_vm2, %v1828_v16  ;;  %v1751_v28 = vpack.c.bf16 %v1737_v59, %v1737_v59  ;;  %v1971_v50 = vpop.f32.mrf.mxu0  ;;  %2737 = vmatpush.bf16.msrb.mxu3 %v5382_v61  ;;  %v4673_v16 = vld [vmem:[%s7106_s5 + $0x8c] sm:$0xf0] }
 0x2a2   :  { %1914 = vst.msk [vmem:[#allocation2 + $0xcc] sm:$0xf] %vm1442_vm2, %v1906_v43  ;;  %v1985_v33 = vpack.c.bf16 %v1971_v50, %v1971_v50  ;;  %v4676_v59 = vor.u32 %v5356_v12, %v4673_v16  ;;  %v5398_v42 = vld [vmem:[#allocation2 + $0x88] sm:$0xff] }
 0x2a3   :  { %1759 = vst.msk [vmem:[#allocation2 + $0x90] sm:$0xf] %vm1442_vm2, %v1751_v28  ;;  %2788 = vmatmul.bf16.vlgmr.msra.gmra.mxu2 %v4616_v10  ;;  %v5410_v29 = vld [vmem:[#allocation2 + $0xe8] sm:$0xff]  ;;  %v4671_v10 = vld [vmem:[%s7106_s5 + $0x78] sm:$0xf] }
 0x2a4   :  { %1993 = vst.msk [vmem:[#allocation2 + $0xf0] sm:$0xf] %vm1442_vm2, %v1985_v33  ;;  %v5358_v28 = vld [vmem:[%s7106_s5 + $0x88] sm:$0xf0]  ;;  %v5401_v33 = vld [vmem:[#allocation2 + $0xa0] sm:$0xff] }
 0x2a5   :  { %2738 = vmatpush.bf16.msrb.mxu3 %v5381_v36  ;;  %v4672_v34 = vor.u32 %v5358_v28, %v4671_v10  ;;  %v5357_v10 = vld [vmem:[%s7106_s5 + $0x84] sm:$0xf]  ;;  %v4681_v28 = vld [vmem:[%s7106_s5 + $0x94] sm:$0xf0] }
 0x2a6   :  { %v1815_v39 = vpop.f32.mrf.mxu3 }
 0x2a7   :  { %v1829_v30 = vpack.c.bf16 %v1815_v39, %v1815_v39  ;;  %v1893_v31 = vpop.f32.mrf.mxu2 }
 0x2a8   :  { %v1907_v40 = vpack.c.bf16 %v1893_v31, %v1893_v31  ;;  %v1739_v38 = vpop.f32.mrf.mxu1  ;;  %2739 = vmatmul.bf16.vlgmr.msrb.gmra.mxu3 %v4612_v37  ;;  %v5402_v43 = vld [vmem:[#allocation2 + $0xa8] sm:$0xff] }
 0x2a9   :  { %1837 = vst.msk [vmem:[#allocation2 + $0xb0] sm:$0xf] %vm1442_vm2, %v1829_v30  ;;  %v1752_v46 = vpack.c.bf16 %v1739_v38, %v1739_v38  ;;  %v1973_v11 = vpop.f32.mrf.mxu0  ;;  %v5406_v30 = vld [vmem:[#allocation2 + $0xc8] sm:$0xff]  ;;  %v4693_v38 = vld [vmem:[%s7106_s5 + $0xb4] sm:$0xf0] }
 0x2aa   :  { %1915 = vst.msk [vmem:[#allocation2 + $0xd0] sm:$0xf] %vm1442_vm2, %v1907_v40  ;;  %v1986_v48 = vpack.c.bf16 %v1973_v11, %v1973_v11  ;;  %v5361_v40 = vld [vmem:[%s7106_s5 + $0xa4] sm:$0xf]  ;;  %v4621_v11 = vld [vmem:[%s7106_s5 + $0x1c] sm:$0xf0] }
 0x2ab   :  { %1760 = vst.msk [vmem:[#allocation2 + $0x94] sm:$0xf] %vm1442_vm2, %v1752_v46  ;;  %v5342_v46 = vld [vmem:[%s7106_s5 + $0xc] sm:$0xf] }
 0x2ac   :  { %1994 = vst.msk [vmem:[#allocation2 + $0xf4] sm:$0xf] %vm1442_vm2, %v1986_v48  ;;  %v5405_v48 = vld [vmem:[#allocation2 + $0xc0] sm:$0xff] }
 0x2ae   :  { %v1817_v27 = vpop.f32.mrf.mxu3 }
 0x2af   :  { %v1830_v56 = vpack.c.bf16 %v1817_v27, %v1817_v27  ;;  %v1895_v52 = vpop.f32.mrf.mxu2  ;;  %v4696_v27 = vor.u32 %v5361_v40, %v4693_v38  ;;  %v4701_v40 = vld [vmem:[%s7106_s5 + $0xbc] sm:$0xf0]  ;;  %v4699_v38 = vld [vmem:[%s7106_s5 + $0xa8] sm:$0xf] }
 0x2b0   :  { %v1908_v4 = vpack.c.bf16 %v1895_v52, %v1895_v52  ;;  %v1742_v3 = vpop.f32.mrf.mxu1 }
 0x2b1   :  { %1838 = vst.msk [vmem:[#allocation2 + $0xb4] sm:$0xf] %vm1442_vm2, %v1830_v56  ;;  %v1753_v6 = vpack.c.bf16 %v1742_v3, %v1742_v3  ;;  %v1976_v9 = vpop.f32.mrf.mxu0  ;;  %v4624_v56 = vor.u32 %v5342_v46, %v4621_v11  ;;  %v5363_v3 = vld [vmem:[%s7106_s5 + $0xb0] sm:$0xf0]  ;;  %v5364_v11 = vld [vmem:[%s7106_s5 + $0xb8] sm:$0xf0] }
 0x2b2   :  { %1916 = vst.msk [vmem:[#allocation2 + $0xd4] sm:$0xf] %vm1442_vm2, %v1908_v4  ;;  %v1987_v45 = vpack.c.bf16 %v1976_v9, %v1976_v9  ;;  %v5399_v31 = vld [vmem:[#allocation2 + $0x90] sm:$0xff]  ;;  %v4691_v4 = vld [vmem:[%s7106_s5 + $0xa0] sm:$0xf] }
 0x2b3   :  { %1761 = vst.msk [vmem:[#allocation2 + $0x98] sm:$0xf] %vm1442_vm2, %v1753_v6  ;;  %2793 = vmatmul.bf16.gmra.mxu2 %v4636_v18  ;;  %v5411_v21 = vld [vmem:[#allocation2 + $0xf0] sm:$0xff]  ;;  %v4619_v18 = vld [vmem:[%s7106_s5 + $0x8] sm:$0xf]  ;;  %v5397_v9 = vld [vmem:[#allocation2 + $0x80] sm:$0xff] }
 0x2b4   :  { %1995 = vst.msk [vmem:[#allocation2 + $0xf8] sm:$0xf] %vm1442_vm2, %v1987_v45  ;;  %v5344_v6 = vld [vmem:[%s7106_s5 + $0x18] sm:$0xf0]  ;;  %v4692_v45 = vor.u32 %v5363_v3, %v4691_v4  ;;  %v4721_v4 = vld [vmem:[%s7106_s5 + $0xe4] sm:$0xf0] }
 0x2b5   :  { %v4620_v57 = vor.u32 %v5344_v6, %v4619_v18  ;;  %v4719_v3 = vld [vmem:[%s7106_s5 + $0xd0] sm:$0xf]  ;;  %v5369_v6 = vld [vmem:[%s7106_s5 + $0xe0] sm:$0xf0] }
 0x2b6   :  { %v1820_v60 = vpop.f32.mrf.mxu3 }
 0x2b7   :  { %v1831_v22 = vpack.c.bf16 %v1820_v60, %v1820_v60  ;;  %v1898_v24 = vpop.f32.mrf.mxu2  ;;  %v5366_v60 = vld [vmem:[%s7106_s5 + $0xcc] sm:$0xf] }
 0x2b8   :  { %v1909_v54 = vpack.c.bf16 %v1898_v24, %v1898_v24  ;;  %v1744_v55 = vpop.f32.mrf.mxu1  ;;  %2744 = vmatmul.bf16.gmra.mxu3 %v4632_v51  ;;  %v5403_v53 = vld [vmem:[#allocation2 + $0xb0] sm:$0xff] }
 0x2b9   :  { %1839 = vst.msk [vmem:[#allocation2 + $0xb8] sm:$0xf] %vm1442_vm2, %v1831_v22  ;;  %v1754_v1 = vpack.c.bf16 %v1744_v55, %v1744_v55  ;;  %v1978_v58 = vpop.f32.mrf.mxu0  ;;  %v5407_v35 = vld [vmem:[#allocation2 + $0xd0] sm:$0xff]  ;;  %v4713_v22 = vld [vmem:[%s7106_s5 + $0xdc] sm:$0xf0] }
 0x2ba   :  { %1917 = vst.msk [vmem:[#allocation2 + $0xd8] sm:$0xf] %vm1442_vm2, %v1909_v54  ;;  %v1988_v63 = vpack.c.bf16 %v1978_v58, %v1978_v58  ;;  %v5347_v24 = vld [vmem:[%s7106_s5 + $0x34] sm:$0xf]  ;;  %v4641_v54 = vld [vmem:[%s7106_s5 + $0x44] sm:$0xf0] }
 0x2bb   :  { %1762 = vst.msk [vmem:[#allocation2 + $0x9c] sm:$0xf] %vm1442_vm2, %v1754_v1  ;;  %v4716_v1 = vor.u32 %v5366_v60, %v4713_v22  ;;  %v4644_v58 = vor.u32 %v5347_v24, %v4641_v54  ;;  %v5372_v22 = vld [vmem:[%s7106_s5 + $0xfc] sm:$0xf]  ;;  %v4741_v24 = vld [vmem:[%s7106_s5 + $0x10c] sm:$0xf0] }
 0x2bc   :  { %1996 = vst.msk [vmem:[#allocation2 + $0xfc] sm:$0xf] %vm1442_vm2, %v1988_v63  ;;  %v4739_v54 = vld [vmem:[%s7106_s5 + $0xf8] sm:$0xf] }
 0x2be   :  { %v1822_v32 = vpop.f32.mrf.mxu3 }
 0x2bf   :  { %v1832_v2 = vpack.c.bf16 %v1822_v32, %v1822_v32  ;;  %v1900_v25 = vpop.f32.mrf.mxu2  ;;  %v4639_v32 = vld [vmem:[%s7106_s5 + $0x30] sm:$0xf] }
 0x2c0   :  { %v1910_v44 = vpack.c.bf16 %v1900_v25, %v1900_v25  ;;  %v2039_v7 = vpop.f32.mrf.mxu1  ;;  %v4712_v25 = vor.u32 %v5368_v5, %v4711_v0 }
 0x2c1   :  { %1840 = vst.msk [vmem:[#allocation2 + $0xbc] sm:$0xf] %vm1442_vm2, %v1832_v2  ;;  %v2059_v14 = vpack.c.bf16 %v2039_v7, %v2039_v7  ;;  %v5349_v2 = vld [vmem:[%s7106_s5 + $0x40] sm:$0xf0] }
 0x2c2   :  { %1918 = vst.msk [vmem:[#allocation2 + $0xdc] sm:$0xf] %vm1442_vm2, %v1910_v44  ;;  %v5400_v37 = vld [vmem:[#allocation2 + $0x98] sm:$0xff]  ;;  %v4640_v44 = vor.u32 %v5349_v2, %v4639_v32 }
 0x2c3   :  { %2067 = vst.msk [vmem:[#allocation2 + $0x100] sm:$0xf] %vm1442_vm2, %v2059_v14  ;;  %v5412_v19 = vld [vmem:[#allocation2 + $0xf8] sm:$0xff]  ;;  %2798 = vmatmul.bf16.gmra.mxu2 %v4656_v13  ;;  %v5371_v14 = vld [vmem:[%s7106_s5 + $0xf4] sm:$0xf] }
 0x2c4   :  { %2878 = vmatpush.bf16.msra.mxu1 %v5412_v19  ;;  %v4661_v19 = vld [vmem:[%s7106_s5 + $0x6c] sm:$0xf0] }
 0x2c8   :  { %v2041_v20 = vpop.f32.mrf.mxu1  ;;  %v5404_v41 = vld [vmem:[#allocation2 + $0xb8] sm:$0xff]  ;;  %2879 = vmatpush.bf16.msra.mxu1 %v5411_v21  ;;  %2749 = vmatmul.bf16.gmra.mxu3 %v4652_v8  ;;  %v4736_v8 = vor.u32 %v5371_v14, %v4733_v15  ;;  %v4731_v21 = vld [vmem:[%s7106_s5 + $0xf0] sm:$0xf]  ;;  %v5379_v14 = vld [vmem:[%s7106_s5 + $0x130] sm:$0xf0] }
 0x2c9   :  { %v2060_v26 = vpack.c.bf16 %v2041_v20, %v2041_v20  ;;  %2829 = vmatpush.bf16.msra.mxu0 %v5404_v41  ;;  %v5408_v50 = vld [vmem:[#allocation2 + $0xd8] sm:$0xff]  ;;  %v5373_v20 = vld [vmem:[%s7106_s5 + $0x100] sm:$0xf0]  ;;  %v4664_v41 = vor.u32 %v5352_v17, %v4661_v19  ;;  %v4687_v15 = vld [vmem:[%s7106_s5 + $0x88] sm:$0xf] }
 0x2ca   :  { %v4732_v12 = vor.u32 %v5373_v20, %v4731_v21  ;;  %v5360_v17 = vld [vmem:[%s7106_s5 + $0x98] sm:$0xf0] }
 0x2cb   :  { %2068 = vst.msk [vmem:[#allocation2 + $0x104] sm:$0xf] %vm1442_vm2, %v2060_v26  ;;  %v4688_v21 = vor.u32 %v5360_v17, %v4687_v15  ;;  %v5440_v15 = vld [vmem:[%s7108_s7 + $0xb8] sm:$0xff] }
 0x2cc   :  { %2880 = vmatpush.bf16.msra.mxu1 %v5410_v29  ;;  %v4659_v29 = vld [vmem:[%s7106_s5 + $0x58] sm:$0xf] }
 0x2cd   :  { %2830 = vmatpush.bf16.msra.mxu0 %v5403_v53  ;;  %v5354_v53 = vld [vmem:[%s7106_s5 + $0x68] sm:$0xf0] }
 0x2ce   :  { %v4660_v16 = vor.u32 %v5354_v53, %v4659_v29 }
 0x2d0   :  { %v2044_v23 = vpop.f32.mrf.mxu1  ;;  %2881 = vmatpush.bf16.msra.mxu1 %v5409_v62 }
 0x2d1   :  { %v2061_v61 = vpack.c.bf16 %v2044_v23, %v2044_v23  ;;  %2831 = vmatpush.bf16.msra.mxu0 %v5402_v43  ;;  %v5376_v43 = vld [vmem:[%s7106_s5 + $0x11c] sm:$0xf] }
 0x2d3   :  { %2069 = vst.msk [vmem:[#allocation2 + $0x108] sm:$0xf] %vm1442_vm2, %v2061_v61  ;;  %2803 = vmatmul.bf16.gmra.mxu2 %v4676_v59  ;;  %v4753_v59 = vld [vmem:[%s7106_s5 + $0x12c] sm:$0xf0]  ;;  %v5413_v61 = vld [vmem:[#allocation2 + $0x100] sm:$0xff] }
 0x2d4   :  { %2882 = vmatpush.bf16.msra.mxu1 %v5408_v50  ;;  %v4756_v50 = vor.u32 %v5376_v43, %v4753_v59 }
 0x2d5   :  { %2832 = vmatpush.bf16.msra.mxu0 %v5401_v33  ;;  %v4751_v33 = vld [vmem:[%s7106_s5 + $0x118] sm:$0xf] }
 0x2d8   :  { %v2046_v36 = vpop.f32.mrf.mxu1  ;;  %2883 = vmatpush.bf16.msra.mxu1 %v5407_v35  ;;  %2754 = vmatmul.bf16.gmra.mxu3 %v4672_v34  ;;  %v4684_v34 = vor.u32 %v5357_v10, %v4681_v28  ;;  %v5378_v35 = vld [vmem:[%s7106_s5 + $0x128] sm:$0xf0]  ;;  %v5375_v10 = vld [vmem:[%s7106_s5 + $0x110] sm:$0xf0] }
 0x2d9   :  { %v2062_v39 = vpack.c.bf16 %v2046_v36, %v2046_v36  ;;  %2833 = vmatpush.bf16.msra.mxu0 %v5400_v37  ;;  %v4679_v36 = vld [vmem:[%s7106_s5 + $0x80] sm:$0xf]  ;;  %v5359_v37 = vld [vmem:[%s7106_s5 + $0x90] sm:$0xf0] }
 0x2db   :  { %2070 = vst.msk [vmem:[#allocation2 + $0x10c] sm:$0xf] %vm1442_vm2, %v2062_v39  ;;  %v4752_v39 = vor.u32 %v5378_v35, %v4751_v33 }
 0x2dc   :  { %2884 = vmatpush.bf16.msra.mxu1 %v5406_v30  ;;  %v4680_v30 = vor.u32 %v5359_v37, %v4679_v36  ;;  %v5424_v37 = vld [vmem:[%s7108_s7 + $0x38] sm:$0xff] }
 0x2dd   :  { %2834 = vmatpush.bf16.msra.mxu0 %v5399_v31  ;;  %v5362_v31 = vld [vmem:[%s7106_s5 + $0xac] sm:$0xf]  ;;  %3041 = vmatpush.bf16.msrb.mxu2 %v5424_v37 }
 0x2de   :  { %v4704_v46 = vor.u32 %v5362_v31, %v4701_v40  ;;  %v5423_v31 = vld [vmem:[%s7108_s7 + $0x30] sm:$0xff]  ;;  %v4767_v40 = vld [vmem:[%s7106_s5 + $0x128] sm:$0xf] }
 0x2e0   :  { %v2049_v49 = vpop.f32.mrf.mxu1  ;;  %2885 = vmatpush.bf16.msra.mxu1 %v5405_v48  ;;  %v4627_v48 = vld [vmem:[%s7106_s5 + $0x10] sm:$0xf] }
 0x2e1   :  { %v2063_v52 = vpack.c.bf16 %v2049_v49, %v2049_v49  ;;  %2835 = vmatpush.bf16.msra.mxu0 %v5398_v42  ;;  %v5345_v49 = vld [vmem:[%s7106_s5 + $0x20] sm:$0xf0]  ;;  %v4700_v42 = vor.u32 %v5364_v11, %v4699_v38  ;;  %v5380_v38 = vld [vmem:[%s7106_s5 + $0x138] sm:$0xf0]  ;;  %3042 = vmatpush.bf16.msrb.mxu2 %v5423_v31 }
 0x2e2   :  { %v5414_v23 = vld [vmem:[#allocation2 + $0x108] sm:$0xff] }
 0x2e3   :  { %2071 = vst.msk [vmem:[#allocation2 + $0x110] sm:$0xf] %vm1442_vm2, %v2063_v52  ;;  %2808 = vmatmul.bf16.gmra.mxu2 %v4696_v27  ;;  %2886 = vmatmul.bf16.vlgmr.msra.gmra.mxu1 %v4624_v56  ;;  %v4628_v27 = vor.u32 %v5345_v49, %v4627_v48  ;;  %v5367_v52 = vld [vmem:[%s7106_s5 + $0xd4] sm:$0xf]  ;;  %v5422_v48 = vld [vmem:[%s7108_s7 + $0x28] sm:$0xff]  ;;  %v5428_v49 = vld [vmem:[%s7108_s7 + $0x58] sm:$0xff] }
 0x2e4   :  { %v4724_v18 = vor.u32 %v5367_v52, %v4721_v4  ;;  %v5421_v52 = vld [vmem:[%s7108_s7 + $0x20] sm:$0xff]  ;;  %v5427_v4 = vld [vmem:[%s7108_s7 + $0x50] sm:$0xff] }
 0x2e5   :  { %2836 = vmatpush.bf16.msra.mxu0 %v5397_v9  ;;  %v4647_v9 = vld [vmem:[%s7106_s5 + $0x38] sm:$0xf]  ;;  %3043 = vmatpush.bf16.msrb.mxu2 %v5422_v48  ;;  %v5437_v48 = vld [vmem:[%s7108_s7 + $0xa0] sm:$0xff] }
 0x2e8   :  { %v2051_v47 = vpop.f32.mrf.mxu1  ;;  %2759 = vmatmul.bf16.gmra.mxu3 %v4692_v45  ;;  %2837 = vmatmul.bf16.vlgmr.msra.gmra.mxu0 %v4620_v57  ;;  %v5350_v45 = vld [vmem:[%s7106_s5 + $0x48] sm:$0xf0] }
 0x2e9   :  { %v2064_v51 = vpack.c.bf16 %v2051_v47, %v2051_v47  ;;  %v4720_v47 = vor.u32 %v5369_v6, %v4719_v3  ;;  %3130 = vmatpush.bf16.msrb.mxu0 %v5428_v49  ;;  %3044 = vmatpush.bf16.msrb.mxu2 %v5421_v52  ;;  %v5420_v6 = vld [vmem:[%s7108_s7 + $0x18] sm:$0xff] }
 0x2eb   :  { %2072 = vst.msk [vmem:[#allocation2 + $0x114] sm:$0xf] %vm1442_vm2, %v2064_v51  ;;  %v4648_v51 = vor.u32 %v5350_v45, %v4647_v9  ;;  %v5426_v9 = vld [vmem:[%s7108_s7 + $0x48] sm:$0xff]  ;;  %v5432_v45 = vld [vmem:[%s7108_s7 + $0x78] sm:$0xff] }
 0x2ec   :  { %3180 = vmatpush.bf16.msrb.mxu1 %v5432_v45 }
 0x2ed   :  { %3131 = vmatpush.bf16.msrb.mxu0 %v5427_v4  ;;  %3081 = vmatpush.bf16.msra.mxu2 %v5420_v6 }
 0x2f0   :  { %v2054_v55 = vpop.f32.mrf.mxu1 }
 0x2f1   :  { %v2065_v63 = vpack.c.bf16 %v2054_v55, %v2054_v55  ;;  %v4744_v55 = vor.u32 %v5372_v22, %v4741_v24  ;;  %3132 = vmatpush.bf16.msrb.mxu0 %v5426_v9  ;;  %v5425_v22 = vld [vmem:[%s7108_s7 + $0x40] sm:$0xff]  ;;  %v5431_v24 = vld [vmem:[%s7108_s7 + $0x70] sm:$0xff] }
 0x2f2   :  { %v5415_v62 = vld [vmem:[#allocation2 + $0x110] sm:$0xff]  ;;  %3181 = vmatpush.bf16.msrb.mxu1 %v5431_v24  ;;  %v5434_v24 = vld [vmem:[%s7108_s7 + $0x88] sm:$0xff] }
 0x2f3   :  { %2073 = vst.msk [vmem:[#allocation2 + $0x118] sm:$0xf] %vm1442_vm2, %v2065_v63  ;;  %2813 = vmatmul.bf16.gmra.mxu2 %v4716_v1  ;;  %2891 = vmatmul.bf16.gmra.mxu1 %v4644_v58  ;;  %v5374_v1 = vld [vmem:[%s7106_s5 + $0x108] sm:$0xf0]  ;;  %v4667_v58 = vld [vmem:[%s7106_s5 + $0x60] sm:$0xf] }
 0x2f4   :  { %v5355_v63 = vld [vmem:[%s7106_s5 + $0x70] sm:$0xf0]  ;;  %v4740_v5 = vor.u32 %v5374_v1, %v4739_v54 }
 0x2f5   :  { %v4668_v32 = vor.u32 %v5355_v63, %v4667_v58  ;;  %3133 = vmatpush.bf16.msrb.mxu0 %v5425_v22  ;;  %v5418_v58 = vld [vmem:[%s7108_s7 + $0x8] sm:$0xff]  ;;  %v5435_v9 = vld [vmem:[%s7108_s7 + $0x90] sm:$0xff] }
 0x2f6   :  { %v5430_v63 = vld [vmem:[%s7108_s7 + $0x68] sm:$0xff] }
 0x2f7   :  { %3182 = vmatpush.bf16.msrb.mxu1 %v5430_v63 }
 0x2f8   :  { %v2056_v7 = vpop.f32.mrf.mxu1  ;;  %2764 = vmatmul.bf16.gmra.mxu3 %v4712_v25  ;;  %2842 = vmatmul.bf16.gmra.mxu0 %v4640_v44  ;;  %v5377_v25 = vld [vmem:[%s7106_s5 + $0x124] sm:$0xf]  ;;  %v4761_v44 = vld [vmem:[%s7106_s5 + $0x134] sm:$0xf0] }
 0x2f9   :  { %v2066_v13 = vpack.c.bf16 %v2056_v7, %v2056_v7  ;;  %v4759_v7 = vld [vmem:[%s7106_s5 + $0x120] sm:$0xf]  ;;  %3280 = vmatpush.bf16.msra.mxu0 %v5440_v15 }
 0x2fb   :  { %2074 = vst.msk [vmem:[#allocation2 + $0x11c] sm:$0xf] %vm1442_vm2, %v2066_v13  ;;  %v4764_v13 = vor.u32 %v5377_v25, %v4761_v44  ;;  %v5417_v25 = vld [vmem:[%s7108_s7] sm:$0xff] }
 0x2fc   :  { %v5429_v44 = vld [vmem:[%s7108_s7 + $0x60] sm:$0xff] }
 0x2fd   :  { %3183 = vmatpush.bf16.msrb.mxu1 %v5429_v44  ;;  %v5433_v44 = vld [vmem:[%s7108_s7 + $0x80] sm:$0xff] }
 0x302   :  { %v5416_v26 = vld [vmem:[#allocation2 + $0x118] sm:$0xff] }
 0x303   :  { %2931 = vmatpush.bf16.msra.mxu3 %v5416_v26  ;;  %2818 = vmatmul.bf16.gmra.mxu2 %v4736_v8  ;;  %v4760_v8 = vor.u32 %v5379_v14, %v4759_v7  ;;  %v5365_v26 = vld [vmem:[%s7106_s5 + $0xc0] sm:$0xf0] }
 0x304   :  { %2896 = vmatmul.bf16.gmra.mxu1 %v4664_v41  ;;  %v4707_v41 = vld [vmem:[%s7106_s5 + $0xb0] sm:$0xf] }
 0x305   :  { %v4708_v53 = vor.u32 %v5365_v26, %v4707_v41  ;;  %v2224_v41 = vpop.permute.xlu1 %2223  ;;  %v5439_v26 = vld [vmem:[%s7108_s7 + $0xb0] sm:$0xff] }
 0x306   :  { %3281 = vmatpush.bf16.msra.mxu0 %v5439_v26  ;;  %v5448_v26 = vld [vmem:[%s7108_s7 + $0xf8] sm:$0xff] }
 0x307   :  { %2932 = vmatpush.bf16.msra.mxu3 %v5415_v62  ;;  %v5370_v62 = vld [vmem:[%s7106_s5 + $0xe8] sm:$0xf0] }
 0x308   :  { %2769 = vmatmul.bf16.gmra.mxu3 %v4732_v12  ;;  %2847 = vmatmul.bf16.gmra.mxu0 %v4660_v16  ;;  %v4727_v16 = vld [vmem:[%s7106_s5 + $0xd8] sm:$0xf] }
 0x309   :  { %v4728_v43 = vor.u32 %v5370_v62, %v4727_v16  ;;  %v2214_v62 = vpop.permute.xlu0 %2213 }
 0x30b   :  { %2933 = vmatpush.bf16.msra.mxu3 %v5414_v23 }
 0x30f   :  { %2934 = vmatpush.bf16.msra.mxu3 %v5413_v61  ;;  %v4747_v61 = vld [vmem:[%s7106_s5 + $0x100] sm:$0xf] }
 0x310   :  { %v4748_v33 = vor.u32 %v5375_v10, %v4747_v61  ;;  %v5438_v61 = vld [vmem:[%s7108_s7 + $0xa8] sm:$0xff]  ;;  %v5444_v10 = vld [vmem:[%s7108_s7 + $0xd8] sm:$0xff] }
 0x311   :  { %3282 = vmatpush.bf16.msra.mxu0 %v5438_v61  ;;  %3330 = vmatpush.bf16.msra.mxu1 %v5444_v10 }
 0x313   :  { %2823 = vmatmul.bf16.gmra.mxu2 %v4756_v50 }
 0x314   :  { %2901 = vmatmul.bf16.gmra.mxu1 %v4684_v34 }
 0x315   :  { %3283 = vmatpush.bf16.msra.mxu0 %v5437_v48  ;;  %v5446_v48 = vld [vmem:[%s7108_s7 + $0xe8] sm:$0xff] }
 0x318   :  { %2774 = vmatmul.bf16.gmra.mxu3 %v4752_v39  ;;  %2852 = vmatmul.bf16.gmra.mxu0 %v4680_v30 }
 0x324   :  { %2906 = vmatmul.bf16.gmra.mxu1 %v4704_v46 }
 0x326   :  { %v6822_v28 = vpop.f32.mrf.mxu2 }
 0x328   :  { %2857 = vmatmul.bf16.gmra.mxu0 %v4700_v42  ;;  %4913 = vmatmul.msk.bf16.vlgmr.msra.gmra.mxu3 %vm1392_vm1, %v4628_v27  ;;  %v4768_v42 = vor.u32 %v5380_v38, %v4767_v40 }
 0x32b   :  { %v6723_v56 = vpop.f32.mrf.mxu3 }
 0x32e   :  { %v2791_v39 = vpop.f32.mrf.mxu2 }
 0x333   :  { %v6743_v57 = vpop.f32.mrf.mxu3 }
 0x334   :  { %2911 = vmatmul.bf16.gmra.mxu1 %v4724_v18 }
 0x336   :  { %v2794_v27 = vpop.f32.mrf.mxu2 }
 0x338   :  { %2862 = vmatmul.bf16.gmra.mxu0 %v4720_v47  ;;  %4914 = vmatmul.msk.bf16.gmra.mxu3 %vm1392_vm1, %v4648_v51  ;;  %v5419_v51 = vld [vmem:[%s7108_s7 + $0x10] sm:$0xff] }
 0x339   :  { %3082 = vmatpush.bf16.msra.mxu2 %v5419_v51 }
 0x33b   :  { %v6746_v60 = vpop.f32.mrf.mxu3 }
 0x33d   :  { %3083 = vmatpush.bf16.msra.mxu2 %v5418_v58  ;;  %v5441_v58 = vld [vmem:[%s7108_s7 + $0xc0] sm:$0xff] }
 0x33e   :  { %v2796_v54 = vpop.f32.mrf.mxu2 }
 0x341   :  { %3084 = vmatpush.bf16.msra.mxu2 %v5417_v25 }
 0x343   :  { %v6766_v0 = vpop.f32.mrf.mxu3 }
 0x344   :  { %2916 = vmatmul.bf16.gmra.mxu1 %v4744_v55 }
 0x348   :  { %2867 = vmatmul.bf16.gmra.mxu0 %v4740_v5  ;;  %4915 = vmatmul.msk.bf16.gmra.mxu3 %vm1392_vm1, %v4668_v32  ;;  %v2219_v5 = vpop.permute.xlu2 %2218 }
 0x349   :  { %v2743_v7 = vadd.f32 %v6743_v57, %v2219_v5  ;;  %v2746_v57 = vadd.f32 %v6746_v60, %v2224_v41  ;;  %v2239_v41 = vpop.permute.xlu1 %2238 }
 0x34b   :  { %v6769_v2 = vpop.f32.mrf.mxu3  ;;  %v2792_v17 = vadd.f32 %v2791_v39, %v2743_v7  ;;  %v2795_v37 = vadd.f32 %v2794_v27, %v2746_v57  ;;  %v5452_v7 = vld [vmem:[%s7108_s7 + $0x118] sm:$0xff]  ;;  %v5451_v57 = vld [vmem:[%s7108_s7 + $0x110] sm:$0xff] }
 0x350   :  { %v2229_v40 = vpop.permute.xlu2 %2228 }
 0x353   :  { %v6789_v19 = vpop.f32.mrf.mxu3 }
 0x354   :  { %2921 = vmatmul.bf16.gmra.mxu1 %v4764_v13  ;;  %v6897_v13 = vpop.f32.mrf.mxu2 }
 0x358   :  { %2872 = vmatmul.bf16.gmra.mxu0 %v4760_v8  ;;  %4916 = vmatmul.msk.bf16.gmra.mxu3 %vm1392_vm1, %v4688_v21 }
 0x35b   :  { %v6792_v20 = vpop.f32.mrf.mxu3 }
 0x360   :  { %v6829_v35 = vpop.f32.mrf.mxu1 }
 0x363   :  { %v6800_v29 = vpop.f32.mrf.mxu3 }
 0x365   :  { %v6826_v34 = vpop.f32.mrf.mxu0 }
 0x368   :  { %4917 = vmatmul.msk.bf16.gmra.mxu3 %vm1392_vm1, %v4708_v53  ;;  %v2889_v46 = vpop.f32.mrf.mxu1 }
 0x36b   :  { %v6803_v12 = vpop.f32.mrf.mxu3 }
 0x36d   :  { %v2840_v30 = vpop.f32.mrf.mxu0 }
 0x36e   :  { %v2841_v21 = vadd.f32 %v2840_v30, %v2792_v17  ;;  %v6917_v30 = vpop.f32.mrf.mxu2 }
 0x370   :  { %v2892_v47 = vpop.f32.mrf.mxu1  ;;  %v2890_v16 = vadd.f32 %v2889_v46, %v2841_v21  ;;  %v5436_v46 = vld [vmem:[%s7108_s7 + $0x98] sm:$0xff] }
 0x373   :  { %v6811_v23 = vpop.f32.mrf.mxu3 }
 0x375   :  { %v2843_v3 = vpop.f32.mrf.mxu0 }
 0x376   :  { %v2844_v60 = vadd.f32 %v2843_v3, %v2795_v37  ;;  %v2804_v22 = vpop.f32.mrf.mxu2 }
 0x378   :  { %4918 = vmatmul.msk.bf16.gmra.mxu3 %vm1392_vm1, %v4728_v43  ;;  %v6888_v32 = vpop.f32.mrf.mxu1  ;;  %v2893_v4 = vadd.f32 %v2892_v47, %v2844_v60 }
 0x37b   :  { %v6814_v59 = vpop.f32.mrf.mxu3 }
 0x37d   :  { %v2845_v55 = vpop.f32.mrf.mxu0 }
 0x37e   :  { %v2806_v61 = vpop.f32.mrf.mxu2 }
 0x381   :  { %v6908_v53 = vpop.f32.mrf.mxu1 }
 0x383   :  { %v6824_v50 = vpop.f32.mrf.mxu3 }
 0x385   :  { %v6902_v8 = vpop.f32.mrf.mxu0 }
 0x388   :  { %4919 = vmatmul.msk.bf16.gmra.mxu3 %vm1392_vm1, %v4748_v33  ;;  %v2741_v33 = vadd.f32 %v6723_v56, %v2214_v62  ;;  %v5443_v56 = vld [vmem:[%s7108_s7 + $0xd0] sm:$0xff]  ;;  %v2753_v62 = vadd.f32 %v6789_v19, %v2239_v41  ;;  %v5450_v19 = vld [vmem:[%s7108_s7 + $0x108] sm:$0xff] }
 0x389   :  { %3331 = vmatpush.bf16.msra.mxu1 %v5443_v56  ;;  %v6934_v3 = vpop.f32.mrf.mxu1  ;;  %v5449_v56 = vld [vmem:[%s7108_s7 + $0x100] sm:$0xff] }
 0x38a   :  { %v2790_v49 = vadd.f32 %v6822_v28, %v2741_v33 }
 0x38b   :  { %v6831_v36 = vpop.f32.mrf.mxu3 }
 0x38c   :  { %v2839_v52 = vadd.f32 %v6826_v34, %v2790_v49 }
 0x38d   :  { %v6919_v38 = vpop.f32.mrf.mxu0 }
 0x38e   :  { %v2888_v34 = vadd.f32 %v6829_v35, %v2839_v52  ;;  %v2234_v35 = vpop.permute.xlu0 %2233  ;;  %v5445_v52 = vld [vmem:[%s7108_s7 + $0xe0] sm:$0xff] }
 0x391   :  { %v2902_v21 = vpop.f32.mrf.mxu1 }
 0x393   :  { %v6845_v11 = vpop.f32.mrf.mxu3 }
 0x395   :  { %v2853_v25 = vpop.f32.mrf.mxu0 }
 0x398   :  { %4920 = vmatmul.msk.bf16.gmra.mxu3 %vm1392_vm1, %v4768_v42  ;;  %v2748_v42 = vadd.f32 %v6766_v0, %v2229_v40  ;;  %v5442_v0 = vld [vmem:[%s7108_s7 + $0xc8] sm:$0xff]  ;;  %v2244_v40 = vpop.permute.xlu2 %2243 }
 0x399   :  { %3332 = vmatpush.bf16.msra.mxu1 %v5442_v0  ;;  %v2756_v49 = vadd.f32 %v6792_v20, %v2244_v40 }
 0x39a   :  { %v2797_v28 = vadd.f32 %v2796_v54, %v2748_v42  ;;  %v2809_v42 = vpop.f32.mrf.mxu2 }
 0x39b   :  { %v6860_v18 = vpop.f32.mrf.mxu3 }
 0x39c   :  { %v2846_v47 = vadd.f32 %v2845_v55, %v2797_v28 }
 0x39d   :  { %3333 = vmatpush.bf16.msra.mxu1 %v5441_v58  ;;  %v2855_v33 = vpop.f32.mrf.mxu0 }
 0x39e   :  { %v2895_v54 = vadd.f32 %v6888_v32, %v2846_v47  ;;  %v5453_v47 = vld [vmem:[%s7108_s7 + $0x120] sm:$0xff] }
 0x3a3   :  { %v6880_v1 = vpop.f32.mrf.mxu3 }
 0x3a5   :  { %v2858_v20 = vpop.f32.mrf.mxu0 }
 0x3ab   :  { %v2936_v14 = vpop.f32.mrf.mxu3 }
 0x3ac   :  { %v2937_v63 = vadd.f32 %v2936_v14, %v2888_v34  ;;  %v2751_v14 = vadd.f32 %v6769_v2, %v2234_v35  ;;  %v2249_v34 = vpop.permute.xlu0 %2248 }
 0x3ae   :  { %v2976_v15 = vmax.f32 %v2937_v63, 0.0 }
 0x3b0   :  { %v2992_v2 = vpack.c.bf16 %v2976_v15, %v2976_v15  ;;  %v2860_v15 = vpop.f32.mrf.mxu0 }
 0x3b3   :  { %v2938_v43 = vpop.f32.mrf.mxu3 }
 0x3b4   :  { %v2939_v39 = vadd.f32 %v2938_v43, %v2890_v16  ;;  %v2800_v16 = vadd.f32 %v6897_v13, %v2751_v14  ;;  %v5456_v13 = vld [vmem:[%s7108_s7 + $0x138] sm:$0xff]  ;;  %v2254_v14 = vpop.permute.xlu1 %2253 }
 0x3b6   :  { %v2977_v31 = vmax.f32 %v2939_v39, 0.0  ;;  %v2849_v10 = vadd.f32 %v6902_v8, %v2800_v16  ;;  %v5447_v39 = vld [vmem:[%s7108_s7 + $0xf0] sm:$0xff]  ;;  %v2802_v8 = vadd.f32 %v6917_v30, %v2753_v62  ;;  %v5457_v62 = vld [vmem:[%s7108_s7 + $0x140] sm:$0xff] }
 0x3b7   :  { %v5455_v30 = vld [vmem:[%s7108_s7 + $0x130] sm:$0xff] }
 0x3b8   :  { %v3001_v27 = vpack.c.bf16 %v2977_v31, %v2977_v31  ;;  %v2898_v60 = vadd.f32 %v6908_v53, %v2849_v10  ;;  %v2851_v31 = vadd.f32 %v6919_v38, %v2802_v8 }
 0x3ba   :  { %4937 = vmatmul.msk.bf16.vlgmr.msrb.gmra.mxu2 %vm1392_vm1, %v3001_v27  ;;  %v2900_v38 = vadd.f32 %v6934_v3, %v2851_v31  ;;  %v5460_v3 = vld [vmem:[%s7108_s7 + $0x158] sm:$0xff]  ;;  %v2863_v31 = vpop.f32.mrf.mxu0 }
 0x3bb   :  { %v2941_v6 = vpop.f32.mrf.mxu3  ;;  %3230 = vmatpush.bf16.msrb.mxu2 %v5436_v46  ;;  %v2904_v46 = vpop.f32.mrf.mxu1 }
 0x3bc   :  { %v2942_v45 = vadd.f32 %v2941_v6, %v2893_v4  ;;  %v5454_v4 = vld [vmem:[%s7108_s7 + $0x128] sm:$0xff]  ;;  %v2805_v6 = vadd.f32 %v2804_v22, %v2756_v49 }
 0x3be   :  { %v2978_v51 = vmax.f32 %v2942_v45, 0.0  ;;  %v2854_v28 = vadd.f32 %v2853_v25, %v2805_v6  ;;  %v5459_v25 = vld [vmem:[%s7108_s7 + $0x150] sm:$0xff] }
 0x3bf   :  { %3231 = vmatpush.bf16.msrb.mxu2 %v5435_v9 }
 0x3c0   :  { %v3090_v5 = vpack.c.bf16 %v2978_v51, %v2978_v51  ;;  %v2758_v51 = vadd.f32 %v6800_v29, %v2249_v34  ;;  %v2903_v63 = vadd.f32 %v2902_v21, %v2854_v28  ;;  %v5463_v21 = vld [vmem:[%s7108_s7 + $0x170] sm:$0xff]  ;;  %v5476_v34 = vld [vmem:[%s7108_s7 + $0x1d8] sm:$0xff] }
 0x3c2   :  { %4971 = vmatmul.msk.bf16.vlgmr.msrb.gmra.mxu0 %vm1392_vm1, %v3090_v5  ;;  %v2807_v29 = vadd.f32 %v2806_v61, %v2758_v51 }
 0x3c3   :  { %v2943_v55 = vpop.f32.mrf.mxu3  ;;  %3232 = vmatpush.bf16.msrb.mxu2 %v5434_v24  ;;  %3430 = vmatpush.bf16.msrb.mxu0 %v5452_v7  ;;  %v2907_v58 = vpop.f32.mrf.mxu1 }
 0x3c4   :  { %v2944_v17 = vadd.f32 %v2943_v55, %v2895_v54  ;;  %v5464_v54 = vld [vmem:[%s7108_s7 + $0x178] sm:$0xff]  ;;  %v2811_v55 = vpop.f32.mrf.mxu2 }
 0x3c6   :  { %v2979_v32 = vmax.f32 %v2944_v17, 0.0  ;;  %v5458_v17 = vld [vmem:[%s7108_s7 + $0x148] sm:$0xff] }
 0x3c7   :  { %3233 = vmatpush.bf16.msrb.mxu2 %v5433_v44  ;;  %3431 = vmatpush.bf16.msrb.mxu0 %v5451_v57  ;;  %v2856_v44 = vadd.f32 %v2855_v33, %v2807_v29 }
 0x3c8   :  { %v3140_v43 = vpack.c.bf16 %v2979_v32, %v2979_v32  ;;  %v2761_v32 = vadd.f32 %v6803_v12, %v2254_v14  ;;  %v5468_v12 = vld [vmem:[%s7108_s7 + $0x198] sm:$0xff] }
 0x3ca   :  { %4954 = vmatmul.msk.bf16.vlgmr.msra.gmra.mxu2 %vm1392_vm1, %v2992_v2  ;;  %4988 = vmatmul.msk.bf16.vlgmr.msrb.gmra.mxu1 %vm1392_vm1, %v3140_v43  ;;  %v5462_v2 = vld [vmem:[%s7108_s7 + $0x168] sm:$0xff]  ;;  %v2810_v43 = vadd.f32 %v2809_v42, %v2761_v32  ;;  %v2264_v42 = vpop.permute.xlu0 %2263  ;;  %v5473_v32 = vld [vmem:[%s7108_s7 + $0x1c0] sm:$0xff] }
 0x3cb   :  { %v2946_v37 = vpop.f32.mrf.mxu3  ;;  %3380 = vmatpush.bf16.msra.mxu2 %v5448_v26  ;;  %3432 = vmatpush.bf16.msrb.mxu0 %v5450_v19  ;;  %v2905_v26 = vadd.f32 %v2904_v46, %v2856_v44  ;;  %v2909_v57 = vpop.f32.mrf.mxu1  ;;  %v5461_v19 = vld [vmem:[%s7108_s7 + $0x160] sm:$0xff]  ;;  %v5480_v44 = vld [vmem:[%s7108_s7 + $0x1f8] sm:$0xff] }
 0x3cc   :  { %3480 = vmatpush.bf16.msrb.mxu1 %v5456_v13  ;;  %v2947_v53 = vadd.f32 %v2946_v37, %v2898_v60  ;;  %v2859_v10 = vadd.f32 %v2858_v20, %v2810_v43  ;;  %v2259_v37 = vpop.permute.xlu2 %2258  ;;  %v5467_v13 = vld [vmem:[%s7108_s7 + $0x190] sm:$0xff]  ;;  %v2865_v20 = vpop.f32.mrf.mxu0 }
 0x3cd   :  { %v2763_v8 = vadd.f32 %v6811_v23, %v2259_v37 }
 0x3ce   :  { %v2980_v9 = vmax.f32 %v2947_v53, 0.0  ;;  %v2908_v40 = vadd.f32 %v2907_v58, %v2859_v10  ;;  %v5469_v58 = vld [vmem:[%s7108_s7 + $0x1a0] sm:$0xff] }
 0x3cf   :  { %3381 = vmatpush.bf16.msra.mxu2 %v5447_v39  ;;  %3433 = vmatpush.bf16.msrb.mxu0 %v5449_v56  ;;  %v2814_v39 = vpop.f32.mrf.mxu2  ;;  %v5472_v56 = vld [vmem:[%s7108_s7 + $0x1b8] sm:$0xff] }
 0x3d0   :  { %3481 = vmatpush.bf16.msrb.mxu1 %v5455_v30  ;;  %v3190_v24 = vpack.c.bf16 %v2980_v9, %v2980_v9  ;;  %v2812_v30 = vadd.f32 %v2811_v55, %v2763_v8  ;;  %v5474_v55 = vld [vmem:[%s7108_s7 + $0x1c8] sm:$0xff] }
 0x3d2   :  { %v2861_v23 = vadd.f32 %v2860_v15, %v2812_v30 }
 0x3d3   :  { %v2948_v27 = vpop.f32.mrf.mxu3  ;;  %3382 = vmatpush.bf16.msra.mxu2 %v5446_v48  ;;  %v5466_v48 = vld [vmem:[%s7108_s7 + $0x188] sm:$0xff]  ;;  %v2912_v53 = vpop.f32.mrf.mxu1 }
 0x3d4   :  { %v2949_v0 = vadd.f32 %v2948_v27, %v2900_v38  ;;  %3482 = vmatpush.bf16.msrb.mxu1 %v5454_v4  ;;  %v5465_v27 = vld [vmem:[%s7108_s7 + $0x180] sm:$0xff]  ;;  %v2766_v4 = vadd.f32 %v6814_v59, %v2264_v42  ;;  %v2868_v15 = vpop.f32.mrf.mxu0 }
 0x3d6   :  { %v2981_v45 = vmax.f32 %v2949_v0, 0.0  ;;  %v2910_v0 = vadd.f32 %v2909_v57, %v2861_v23 }
 0x3d7   :  { %3383 = vmatpush.bf16.msra.mxu2 %v5445_v52  ;;  %v5471_v52 = vld [vmem:[%s7108_s7 + $0x1b0] sm:$0xff]  ;;  %v2816_v9 = vpop.f32.mrf.mxu2 }
 0x3d8   :  { %v3240_v22 = vpack.c.bf16 %v2981_v45, %v2981_v45  ;;  %3483 = vmatpush.bf16.msrb.mxu1 %v5453_v47  ;;  %v5470_v45 = vld [vmem:[%s7108_s7 + $0x1a8] sm:$0xff] }
 0x3da   :  { %5005 = vmatmul.msk.bf16.vlgmr.msrb.gmra.mxu2 %vm1392_vm1, %v3190_v24  ;;  %5022 = vmatmul.msk.bf16.vlgmr.msra.gmra.mxu0 %vm1392_vm1, %v3240_v22  ;;  %v2269_v24 = vpop.permute.xlu1 %2268 }
 0x3db   :  { %v2951_v5 = vpop.f32.mrf.mxu3  ;;  %3530 = vmatpush.bf16.msrb.mxu2 %v5460_v3  ;;  %3580 = vmatpush.bf16.msra.mxu0 %v5464_v54  ;;  %v2815_v3 = vadd.f32 %v2814_v39, %v2766_v4  ;;  %v2914_v22 = vpop.f32.mrf.mxu1 }
 0x3dc   :  { %v2952_v35 = vadd.f32 %v2951_v5, %v2903_v63  ;;  %v5475_v63 = vld [vmem:[%s7108_s7 + $0x1d0] sm:$0xff]  ;;  %v2768_v5 = vadd.f32 %v6824_v50, %v2269_v24  ;;  %v2279_v39 = vpop.permute.xlu0 %2278 }
 0x3dd   :  { %v2864_v59 = vadd.f32 %v2863_v31, %v2815_v3 }
 0x3de   :  { %v2982_v7 = vmax.f32 %v2952_v35, 0.0 }
 0x3df   :  { %3531 = vmatpush.bf16.msrb.mxu2 %v5459_v25  ;;  %3581 = vmatpush.bf16.msra.mxu0 %v5463_v21  ;;  %v2913_v54 = vadd.f32 %v2912_v53, %v2864_v59  ;;  %v2819_v29 = vpop.f32.mrf.mxu2  ;;  %v2274_v21 = vpop.permute.xlu2 %2273 }
 0x3e0   :  { %v3290_v41 = vpack.c.bf16 %v2982_v7, %v2982_v7  ;;  %v2817_v7 = vadd.f32 %v2816_v9, %v2768_v5 }
 0x3e2   :  { %5039 = vmatmul.msk.bf16.vlgmr.msra.gmra.mxu1 %vm1392_vm1, %v3290_v41  ;;  %v2866_v50 = vadd.f32 %v2865_v20, %v2817_v7  ;;  %v5479_v41 = vld [vmem:[%s7108_s7 + $0x1f0] sm:$0xff] }
 0x3e3   :  { %v2953_v16 = vpop.f32.mrf.mxu3  ;;  %3532 = vmatpush.bf16.msrb.mxu2 %v5458_v17  ;;  %3582 = vmatpush.bf16.msra.mxu0 %v5462_v2 }
 0x3e4   :  { %v2954_v61 = vadd.f32 %v2953_v16, %v2905_v26  ;;  %3630 = vmatpush.bf16.msra.mxu1 %v5468_v12  ;;  %v2771_v26 = vadd.f32 %v6831_v36, %v2274_v21  ;;  %v2917_v16 = vpop.f32.mrf.mxu1  ;;  %v5478_v12 = vld [vmem:[%s7108_s7 + $0x1e8] sm:$0xff]  ;;  %v2870_v36 = vpop.f32.mrf.mxu0 }
 0x3e6   :  { %v2983_v33 = vmax.f32 %v2954_v61, 0.0  ;;  %v2820_v43 = vadd.f32 %v2819_v29, %v2771_v26 }
 0x3e7   :  { %3533 = vmatpush.bf16.msrb.mxu2 %v5457_v62  ;;  %3583 = vmatpush.bf16.msra.mxu0 %v5461_v19  ;;  %v2915_v62 = vadd.f32 %v2914_v22, %v2866_v50  ;;  %v2821_v10 = vpop.f32.mrf.mxu2  ;;  %v5477_v19 = vld [vmem:[%s7108_s7 + $0x1e0] sm:$0xff]  ;;  %v2289_v20 = vpop.permute.xlu2 %2288 }
 0x3e8   :  { %v3340_v60 = vpack.c.bf16 %v2983_v33, %v2983_v33  ;;  %3631 = vmatpush.bf16.msra.mxu1 %v5467_v13  ;;  %v2869_v33 = vadd.f32 %v2868_v15, %v2820_v43  ;;  %v2773_v13 = vadd.f32 %v6845_v11, %v2279_v39 }
 0x3ea   :  { %5056 = vmatmul.msk.bf16.vlgmr.msra.gmra.mxu2 %vm1392_vm1, %v3340_v60  ;;  %v2918_v60 = vadd.f32 %v2917_v16, %v2869_v33 }
 0x3eb   :  { %v2956_v46 = vpop.f32.mrf.mxu3  ;;  %3680 = vmatpush.bf16.msra.mxu2 %v5472_v56 }
 0x3ec   :  { %v2957_v49 = vadd.f32 %v2956_v46, %v2908_v40  ;;  %3632 = vmatpush.bf16.msra.mxu1 %v5466_v48  ;;  %v2919_v31 = vpop.f32.mrf.mxu1  ;;  %v2822_v46 = vadd.f32 %v2821_v10, %v2773_v13  ;;  %v2873_v42 = vpop.f32.mrf.mxu0 }
 0x3ee   :  { %v2984_v38 = vmax.f32 %v2957_v49, 0.0  ;;  %v2871_v56 = vadd.f32 %v2870_v36, %v2822_v46  ;;  %v2284_v49 = vpop.permute.xlu1 %2283 }
 0x3ef   :  { %3681 = vmatpush.bf16.msra.mxu2 %v5471_v52  ;;  %v2824_v53 = vpop.f32.mrf.mxu2  ;;  %v2776_v23 = vadd.f32 %v6860_v18, %v2284_v49 }
 0x3f0   :  { %v3390_v6 = vpack.c.bf16 %v2984_v38, %v2984_v38  ;;  %3633 = vmatpush.bf16.msra.mxu1 %v5465_v27  ;;  %v2920_v27 = vadd.f32 %v2919_v31, %v2871_v56 }
 0x3f1   :  { %v2825_v52 = vadd.f32 %v2824_v53, %v2776_v23 }
 0x3f2   :  { %5073 = vmatmul.msk.bf16.vlgmr.msrb.gmra.mxu0 %vm1392_vm1, %v3390_v6 }
 0x3f3   :  { %v2958_v28 = vpop.f32.mrf.mxu3  ;;  %3682 = vmatpush.bf16.msra.mxu2 %v5470_v45  ;;  %3730 = vmatpush.bf16.msrb.mxu0 %v5476_v34  ;;  %v2874_v9 = vadd.f32 %v2873_v42, %v2825_v52 }
 0x3f4   :  { %v2959_v47 = vadd.f32 %v2958_v28, %v2910_v0  ;;  %v2922_v6 = vpop.f32.mrf.mxu1  ;;  %v2778_v28 = vadd.f32 %v6880_v1, %v2289_v20  ;;  %v2875_v18 = vpop.f32.mrf.mxu0 }
 0x3f5   :  { %v2923_v3 = vadd.f32 %v2922_v6, %v2874_v9  ;;  %v5486_v6 = vld [vmem:[%s7109_s8] ss:$0 sm:$0xff] }
 0x3f6   :  { %v2985_v51 = vmax.f32 %v2959_v47, 0.0 }
 0x3f7   :  { %3683 = vmatpush.bf16.msra.mxu2 %v5469_v58  ;;  %3731 = vmatpush.bf16.msrb.mxu0 %v5475_v63  ;;  %v2826_v34 = vpop.f32.mrf.mxu2 }
 0x3f8   :  { %v3440_v25 = vpack.c.bf16 %v2985_v51, %v2985_v51  ;;  %v2827_v59 = vadd.f32 %v2826_v34, %v2778_v28 }
 0x3fa   :  { %5090 = vmatmul.msk.bf16.vlgmr.msrb.gmra.mxu1 %vm1392_vm1, %v3440_v25  ;;  %v2876_v24 = vadd.f32 %v2875_v18, %v2827_v59 }
 0x3fb   :  { %v2961_v35 = vpop.f32.mrf.mxu3  ;;  %3732 = vmatpush.bf16.msrb.mxu0 %v5474_v55  ;;  %3780 = vmatpush.bf16.msrb.mxu1 %v5480_v44 }
 0x3fc   :  { %v2962_v14 = vadd.f32 %v2961_v35, %v2913_v54  ;;  %v2924_v58 = vpop.f32.mrf.mxu1 }
 0x3fd   :  { %v2925_v5 = vadd.f32 %v2924_v58, %v2876_v24 }
 0x3fe   :  { %v2986_v17 = vmax.f32 %v2962_v14, 0.0 }
 0x3ff   :  { %3733 = vmatpush.bf16.msrb.mxu0 %v5473_v32  ;;  %3781 = vmatpush.bf16.msrb.mxu1 %v5479_v41 }
 0x400   :  { %v3490_v57 = vpack.c.bf16 %v2986_v17, %v2986_v17 }
 0x402   :  { %5107 = vmatmul.msk.bf16.vlgmr.msrb.gmra.mxu2 %vm1392_vm1, %v3490_v57 }
 0x403   :  { %v2963_v2 = vpop.f32.mrf.mxu3  ;;  %3782 = vmatpush.bf16.msrb.mxu1 %v5478_v12 }
 0x404   :  { %v2964_v61 = vadd.f32 %v2963_v2, %v2915_v62 }
 0x406   :  { %v2987_v37 = vmax.f32 %v2964_v61, 0.0 }
 0x407   :  { %3783 = vmatpush.bf16.msrb.mxu1 %v5477_v19 }
 0x408   :  { %v3540_v8 = vpack.c.bf16 %v2987_v37, %v2987_v37 }
 0x40a   :  { %5124 = vmatmul.msk.bf16.vlgmr.msra.gmra.mxu0 %vm1392_vm1, %v3540_v8 }
 0x40b   :  { %v2966_v40 = vpop.f32.mrf.mxu3 }
 0x40c   :  { %v2967_v48 = vadd.f32 %v2966_v40, %v2918_v60 }
 0x40e   :  { %v2988_v30 = vmax.f32 %v2967_v48, 0.0 }
 0x410   :  { %v3590_v38 = vpack.c.bf16 %v2988_v30, %v2988_v30 }
 0x412   :  { %5141 = vmatmul.msk.bf16.vlgmr.msra.gmra.mxu1 %vm1392_vm1, %v3590_v38 }
 0x413   :  { %v2968_v11 = vpop.f32.mrf.mxu3 }
 0x414   :  { %v2969_v4 = vadd.f32 %v2968_v11, %v2920_v27 }
 0x416   :  { %v2989_v0 = vmax.f32 %v2969_v4, 0.0 }
 0x418   :  { %v3640_v45 = vpack.c.bf16 %v2989_v0, %v2989_v0 }
 0x41a   :  { %5158 = vmatmul.msk.bf16.vlgmr.msra.gmra.mxu2 %vm1392_vm1, %v3640_v45 }
 0x41b   :  { %v2971_v47 = vpop.f32.mrf.mxu3 }
 0x41c   :  { %v2972_v51 = vadd.f32 %v2971_v47, %v2923_v3 }
 0x41e   :  { %v2990_v22 = vmax.f32 %v2972_v51, 0.0 }
 0x420   :  { %v3690_v63 = vpack.c.bf16 %v2990_v22, %v2990_v22 }
 0x422   :  { %5175 = vmatmul.msk.bf16.vlgmr.msrb.gmra.mxu0 %vm1392_vm1, %v3690_v63 }
 0x423   :  { %v2973_v25 = vpop.f32.mrf.mxu3 }
 0x424   :  { %v2974_v54 = vadd.f32 %v2973_v25, %v2925_v5 }
 0x426   :  { %v2991_v29 = vmax.f32 %v2974_v54, 0.0 }
 0x428   :  { %v3740_v1 = vpack.c.bf16 %v2991_v29, %v2991_v29 }
 0x42a   :  { %5192 = vmatmul.msk.bf16.vlgmr.msrb.gmra.mxu1 %vm1392_vm1, %v3740_v1 }
 0x43d   :  { %v3046_v35 = vpop.f32.mrf.mxu2 }
 0x43f   :  { %v3135_v55 = vpop.f32.mrf.mxu0 }
 0x445   :  { %v3048_v44 = vpop.f32.mrf.mxu2 }
 0x447   :  { %v3137_v7 = vpop.f32.mrf.mxu0  ;;  %v3185_v14 = vpop.f32.mrf.mxu1 }
 0x44d   :  { %v3086_v15 = vpop.f32.mrf.mxu2 }
 0x44e   :  { %v3087_v50 = vadd.f32 %v3086_v15, %v3046_v35 }
 0x44f   :  { %v3187_v17 = vpop.f32.mrf.mxu1 }
 0x450   :  { %v3139_v21 = vadd.f32 %v3135_v55, %v3087_v50 }
 0x452   :  { %v3189_v32 = vadd.f32 %v3185_v14, %v3139_v21 }
 0x455   :  { %v3088_v41 = vpop.f32.mrf.mxu2 }
 0x457   :  { %v3285_v26 = vpop.f32.mrf.mxu0 }
 0x45d   :  { %v3235_v57 = vpop.f32.mrf.mxu2 }
 0x45e   :  { %v3239_v13 = vadd.f32 %v3235_v57, %v3189_v32 }
 0x45f   :  { %v3287_v16 = vpop.f32.mrf.mxu0  ;;  %v3335_v62 = vpop.f32.mrf.mxu1 }
 0x460   :  { %v3289_v8 = vadd.f32 %v3285_v26, %v3239_v13 }
 0x462   :  { %v3339_v46 = vadd.f32 %v3335_v62, %v3289_v8 }
 0x465   :  { %v3237_v2 = vpop.f32.mrf.mxu2 }
 0x467   :  { %v3337_v12 = vpop.f32.mrf.mxu1 }
 0x46d   :  { %v3385_v43 = vpop.f32.mrf.mxu2 }
 0x46e   :  { %v3389_v48 = vadd.f32 %v3385_v43, %v3339_v46 }
 0x46f   :  { %v3435_v61 = vpop.f32.mrf.mxu0 }
 0x470   :  { %v3439_v56 = vadd.f32 %v3435_v61, %v3389_v48 }
 0x475   :  { %v3387_v10 = vpop.f32.mrf.mxu2 }
 0x477   :  { %v3437_v33 = vpop.f32.mrf.mxu0  ;;  %v3485_v37 = vpop.f32.mrf.mxu1 }
 0x478   :  { %v3489_v49 = vadd.f32 %v3485_v37, %v3439_v56 }
 0x47f   :  { %v3487_v39 = vpop.f32.mrf.mxu1 }
 0x485   :  { %v3535_v36 = vpop.f32.mrf.mxu2 }
 0x486   :  { %v3539_v53 = vadd.f32 %v3535_v36, %v3489_v49 }
 0x487   :  { %v3585_v19 = vpop.f32.mrf.mxu0 }
 0x488   :  { %v3589_v38 = vadd.f32 %v3585_v19, %v3539_v53 }
 0x48d   :  { %v3537_v60 = vpop.f32.mrf.mxu2 }
 0x48f   :  { %v3587_v31 = vpop.f32.mrf.mxu0  ;;  %v3635_v40 = vpop.f32.mrf.mxu1 }
 0x490   :  { %v3639_v27 = vadd.f32 %v3635_v40, %v3589_v38 }
 0x497   :  { %v3637_v30 = vpop.f32.mrf.mxu1 }
 0x49d   :  { %v3685_v23 = vpop.f32.mrf.mxu2 }
 0x49e   :  { %v3689_v11 = vadd.f32 %v3685_v23, %v3639_v27 }
 0x49f   :  { %v3735_v42 = vpop.f32.mrf.mxu0 }
 0x4a0   :  { %v3739_v4 = vadd.f32 %v3735_v42, %v3689_v11 }
 0x4a5   :  { %v3687_v52 = vpop.f32.mrf.mxu2 }
 0x4a7   :  { %v3737_v9 = vpop.f32.mrf.mxu0  ;;  %v3785_v0 = vpop.f32.mrf.mxu1 }
 0x4a8   :  { %v3789_v20 = vadd.f32 %v3785_v0, %v3739_v4 }
 0x4aa   :  { %v3794_v28 = vadd.f32 %v5486_v6, %v3789_v20 }
 0x4ac   :  { %v3795_v45 = vmax.f32 %v3794_v28, 0.0 }
 0x4ae   :  { %3796 = vst.msk [vmem:[#allocation3] sm:$0xff] %vm374_vm0, %v3795_v45 }
 0x4af   :  { %v3787_v34 = vpop.f32.mrf.mxu1  ;;  %3807 = dma.vmem_to_hbm [thread:$0]  %s3803_s2, 128, %s3805_s25, [#allocation4]  }
 0x4b0   :  { %5511 = dma.done.wait [#allocation4], 128  }
 0x4b1   :  { %5512 = vsyncadd [#allocation4], 4294967168 }
 0x4b2   :  { %3812 = vsyncpa [#allocation4], 1 }

</bundles_post_ra>
